<compile_context>
chip_gen: v6e
topology: v6e:2x2x1
jax: 0.10.0
libtpu: 0.0.40
codegen_flags: <defaults>
</compile_context>

<pallas_src>
import functools

import jax
import jax.numpy as jnp
from jax.experimental import pallas as pl
from jax.experimental.pallas import tpu as pltpu

# ---------------- model config (small, consistent with a DETR decoder layer) -------------
D_MODEL = 32        # hidden size
NHEAD = 4           # attention heads
DFF = 64            # feed-forward dim
NUM_LAYERS = 2      # decoder layers
T = 8               # number of queries (tgt seq len)
S = 16              # memory seq len
B = 2               # batch
EPS = 1e-5

# ---------------- packed parameter-slab layout --------------------------------------------
SLAB_LANES = 128
LAYER_ROWS = 3 * D_MODEL + 16          # rows per decoder layer in the packed weight slab
FIN_ROWS = 8 + B * T                   # final-LN params + head masks + batch score biases


# ---------------------------------- fused decoder kernel ---------------------------------
def _decoder_kernel(tgt_ref, mem_ref, qpos_ref, pos_ref, w_ref, out_ref,
                    xs_ref, qs_ref, ms_ref, mks_ref,
                    *, num_layers, nhead, b, t, s, d, dff, eps):
    f32 = jnp.float32
    nq, nk_self, nk_cross = b * t, b * t, b * s

    # ---- stage (seq, B, D) inputs into 2-D row slabs (row = seq_idx * b + batch_idx) ----
    # Layout conversion goes through VMEM scratch via small static window stores; this
    # removes all wrapper-side transposes (separate XLA launches) and avoids in-kernel
    # value relayouts.
    for i in range(t):
        xs_ref[b * i:b * (i + 1), :] = tgt_ref[i]
        qs_ref[b * i:b * (i + 1), :] = qpos_ref[i]
    for i in range(s):
        mi = mem_ref[i]
        ms_ref[b * i:b * (i + 1), :] = mi
        mks_ref[b * i:b * (i + 1), :] = mi + pos_ref[i]   # cross-attn key input (hoisted)

    x = xs_ref[...]            # (b*t, d)
    qpos = qs_ref[...]         # (b*t, d)
    mem = ms_ref[...]          # (b*s, d)
    mem_k = mks_ref[...]       # (b*s, d)

    # ---- packed constants: final LN params, head lane-masks, batch score biases ---------
    fbase = num_layers * LAYER_ROWS
    fin_blk = w_ref[fbase:fbase + 8, :]                    # (8, 128)
    fin_g, fin_b = fin_blk[0:1, 0:d], fin_blk[1:2, 0:d]
    head_masks = fin_blk[2:2 + nhead, 0:d]                 # (nhead, d) 0/1 lane masks
    bias_blk = w_ref[fbase + 8:fbase + 8 + nq, :]          # (b*t, 128)
    bias_self = bias_blk[:, 0:nk_self]                     # 0 same batch, -1e30 otherwise
    bias_cross = bias_blk[:, nk_self:nk_self + nk_cross]

    def layer_norm(v, g, beta):
        mu = jnp.mean(v, axis=-1, keepdims=True)
        var = jnp.mean((v - mu) ** 2, axis=-1, keepdims=True)
        return (v - mu) * jax.lax.rsqrt(var + eps) * g + beta

    def attend(q2d, k2d, v2d, wo, bo, bias):
        # Heads are separated by lane masks (no width-dh lane slices) and batches by the
        # additive score bias, so every matmul is a full-width 2-D MXU op.  Head merge +
        # output projection stay fused: each masked PV output lands in its own lanes, and
        # summing over heads == concatenating over heads.
        o = None
        for h in range(nhead):
            mh = head_masks[h:h + 1, :]                    # (1, d)
            sc = jnp.einsum("qd,kd->qk", q2d * mh, k2d,
                            preferred_element_type=f32) + bias
            mx = jnp.max(sc, axis=-1, keepdims=True)
            p = jnp.exp(sc - mx)
            p = p * pl.reciprocal(jnp.sum(p, axis=-1, keepdims=True), approx=False)
            oh = jnp.dot(p, v2d * mh, preferred_element_type=f32)
            o = oh if o is None else o + oh
        return jnp.dot(o, wo, preferred_element_type=f32) + bo

    # -------------------------------- decoder layers ------------------------------------
    for l in range(num_layers):
        base = l * LAYER_ROWS
        rows_w = w_ref[base:base + 2 * d, :]               # [w_sa | w_ca | w2]
        rows_o = w_ref[base + 2 * d:base + 3 * d, :]       # [wo_sa | wo_ca | w1]
        vecs = w_ref[base + 3 * d:base + 3 * d + 12, :]    # biases + LN gammas/betas

        w_sa = rows_w[0:d, 0:3 * d]                        # (d,3d) = [Wq*scale | Wk | Wv]
        w_ca = rows_w[d:2 * d, 0:3 * d]
        w2 = rows_w[0:dff, 3 * d:3 * d + d]                # (dff, d)
        wo_sa = rows_o[:, 0:d]
        wo_ca = rows_o[:, d:2 * d]
        w1 = rows_o[:, 2 * d:2 * d + dff]                  # (d, dff)

        b_sa, bo_sa = vecs[0:1, 0:3 * d], vecs[1:2, 0:d]
        b_ca, bo_ca = vecs[2:3, 0:3 * d], vecs[3:4, 0:d]
        b1, b2 = vecs[4:5, 0:dff], vecs[5:6, 0:d]
        g1, bn1 = vecs[6:7, 0:d], vecs[7:8, 0:d]
        g2, bn2 = vecs[8:9, 0:d], vecs[9:10, 0:d]
        g3, bn3 = vecs[10:11, 0:d], vecs[11:12, 0:d]

        # ---- self attention (q-input == k-input -> fused Q|K projection)
        qk_in = x + qpos
        qk = jnp.dot(qk_in, w_sa[:, :2 * d],
                     preferred_element_type=f32) + b_sa[:, :2 * d]
        v = jnp.dot(x, w_sa[:, 2 * d:],
                    preferred_element_type=f32) + b_sa[:, 2 * d:]
        sa = attend(qk[:, :d], qk[:, d:], v, wo_sa, bo_sa, bias_self)
        x = layer_norm(x + sa, g1, bn1)

        # ---- cross attention
        q = jnp.dot(x + qpos, w_ca[:, :d],
                    preferred_element_type=f32) + b_ca[:, :d]
        k = jnp.dot(mem_k, w_ca[:, d:2 * d],
                    preferred_element_type=f32) + b_ca[:, d:2 * d]
        vv = jnp.dot(mem, w_ca[:, 2 * d:],
                     preferred_element_type=f32) + b_ca[:, 2 * d:]
        ca = attend(q, k, vv, wo_ca, bo_ca, bias_cross)
        x = layer_norm(x + ca, g2, bn2)

        # ---- feed forward
        h1 = jnp.maximum(jnp.dot(x, w1, preferred_element_type=f32) + b1, 0.0)
        h2 = jnp.dot(h1, w2, preferred_element_type=f32) + b2
        x = layer_norm(x + h2, g3, bn3)

    # ---- final LayerNorm + write back in the native (T, B, D) layout --------------------
    y = layer_norm(x, fin_g, fin_b)                        # (b*t, d), seq-major rows
    for i in range(t):
        out_ref[i] = y[b * i:b * (i + 1), :]


# ------------------------------------ wrapper ---------------------------------------------
def transformer_decoder(tgt, memory, query_pos, pos, wslab):
    """TransformerDecoder.forward (DETR post-norm layers, masks=None, final LayerNorm)."""
    t, b, d = tgt.shape
    s = memory.shape[0]
    kernel = functools.partial(
        _decoder_kernel, num_layers=NUM_LAYERS, nhead=NHEAD,
        b=b, t=t, s=s, d=d, dff=DFF, eps=EPS)
    vmem = lambda: pl.BlockSpec(memory_space=pltpu.MemorySpace.VMEM)
    return pl.pallas_call(
        kernel,
        out_shape=jax.ShapeDtypeStruct((t, b, d), jnp.float32),
        in_specs=[vmem() for _ in range(5)],
        out_specs=vmem(),
        scratch_shapes=[
            pltpu.VMEM((b * t, d), jnp.float32),   # tgt rows (seq-major slab)
            pltpu.VMEM((b * t, d), jnp.float32),   # query_pos rows
            pltpu.VMEM((b * s, d), jnp.float32),   # memory rows
            pltpu.VMEM((b * s, d), jnp.float32),   # memory + pos rows
        ],
    )(tgt, memory, query_pos, pos, wslab)


# ------------------------------------ init / packing --------------------------------------
def init_params(key):
    """Pack every decoder parameter (plus head masks / batch biases) into one fp32 slab."""
    d, dff, nh, nl = D_MODEL, DFF, NHEAD, NUM_LAYERS
    dh = d // nh
    scale = 1.0 / (dh ** 0.5)
    assert 3 * d + d <= SLAB_LANES and 2 * d + dff <= SLAB_LANES and dff <= 2 * d
    assert B * T + B * S <= SLAB_LANES

    slab = jnp.zeros((nl * LAYER_ROWS + FIN_ROWS, SLAB_LANES), jnp.float32)

    def dense(k, din, dout):
        return (jax.random.normal(k, (din, dout), jnp.float32) * 0.02,
                jnp.zeros((dout,), jnp.float32))

    ones_d, zeros_d = jnp.ones((d,), jnp.float32), jnp.zeros((d,), jnp.float32)

    for l in range(nl):
        key, *ks = jax.random.split(key, 11)
        wq, bq = dense(ks[0], d, d)
        wk, bk = dense(ks[1], d, d)
        wv, bv = dense(ks[2], d, d)
        wo, bo = dense(ks[3], d, d)
        cq, cbq = dense(ks[4], d, d)
        ck, cbk = dense(ks[5], d, d)
        cv, cbv = dense(ks[6], d, d)
        co, cbo = dense(ks[7], d, d)
        w1, b1 = dense(ks[8], d, dff)
        w2, b2 = dense(ks[9], dff, d)

        base = l * LAYER_ROWS
        # 1/sqrt(head_dim) folded into Wq / bq (equivalent to scaling q).
        slab = slab.at[base:base + d, 0:3 * d].set(
            jnp.concatenate([wq * scale, wk, wv], axis=1))
        slab = slab.at[base + d:base + 2 * d, 0:3 * d].set(
            jnp.concatenate([cq * scale, ck, cv], axis=1))
        slab = slab.at[base:base + dff, 3 * d:3 * d + d].set(w2)
        slab = slab.at[base + 2 * d:base + 3 * d, 0:d].set(wo)
        slab = slab.at[base + 2 * d:base + 3 * d, d:2 * d].set(co)
        slab = slab.at[base + 2 * d:base + 3 * d, 2 * d:2 * d + dff].set(w1)

        vr = base + 3 * d
        slab = slab.at[vr + 0, 0:3 * d].set(jnp.concatenate([bq * scale, bk, bv]))
        slab = slab.at[vr + 1, 0:d].set(bo)
        slab = slab.at[vr + 2, 0:3 * d].set(jnp.concatenate([cbq * scale, cbk, cbv]))
        slab = slab.at[vr + 3, 0:d].set(cbo)
        slab = slab.at[vr + 4, 0:dff].set(b1)
        slab = slab.at[vr + 5, 0:d].set(b2)
        for j, g in enumerate([ones_d, zeros_d, ones_d, zeros_d, ones_d, zeros_d]):
            slab = slab.at[vr + 6 + j, 0:d].set(g)         # norm1/2/3 gamma, beta

    fbase = nl * LAYER_ROWS
    slab = slab.at[fbase + 0, 0:d].set(ones_d)             # final LayerNorm gamma
    slab = slab.at[fbase + 1, 0:d].set(zeros_d)            # final LayerNorm beta
    for h in range(nh):                                    # per-head 0/1 lane masks
        slab = slab.at[fbase + 2 + h, h * dh:(h + 1) * dh].set(1.0)

    # Additive attention-score biases separating batches (rows/cols of the seq-major slab:
    # row = seq_index * B + batch_index).
    rowb = jnp.arange(B * T) % B
    colb_self = jnp.arange(B * T) % B
    colb_cross = jnp.arange(B * S) % B
    bias_self = jnp.where(rowb[:, None] == colb_self[None, :], 0.0, -1e30)
    bias_cross = jnp.where(rowb[:, None] == colb_cross[None, :], 0.0, -1e30)
    slab = slab.at[fbase + 8:fbase + 8 + B * T, 0:B * T].set(bias_self)
    slab = slab.at[fbase + 8:fbase + 8 + B * T, B * T:B * T + B * S].set(bias_cross)
    return slab


# ------------------------------------ main --------------------------------------------------
if __name__ == "__main__":
    key = jax.random.PRNGKey(0)
    key, k_tgt, k_mem, k_pos, k_qpos, k_params = jax.random.split(key, 6)

    tgt = jax.random.normal(k_tgt, (T, B, D_MODEL), jnp.float32)
    memory = jax.random.normal(k_mem, (S, B, D_MODEL), jnp.float32)
    pos = jax.random.normal(k_pos, (S, B, D_MODEL), jnp.float32)
    query_pos = jax.random.normal(k_qpos, (T, B, D_MODEL), jnp.float32)

    wslab = init_params(k_params)

    out = jax.jit(transformer_decoder)(tgt, memory, query_pos, pos, wslab)
    out = jax.block_until_ready(out)

    assert out.shape == (T, B, D_MODEL), out.shape
    assert bool(jnp.all(jnp.isfinite(out)))
    print("KERNEL_OK")
</pallas_src>

<mosaic_0001>
module attributes {stable_mosaic.version = 11 : i64} {
  func.func @_decoder_kernel(%arg0: memref<8x2x32xf32, #tpu.memory_space<vmem>>, %arg1: memref<16x2x32xf32, #tpu.memory_space<vmem>>, %arg2: memref<8x2x32xf32, #tpu.memory_space<vmem>>, %arg3: memref<16x2x32xf32, #tpu.memory_space<vmem>>, %arg4: memref<248x128xf32, #tpu.memory_space<vmem>>, %arg5: memref<8x2x32xf32, #tpu.memory_space<vmem>>, %arg6: memref<16x32xf32, #tpu.memory_space<vmem>>, %arg7: memref<16x32xf32, #tpu.memory_space<vmem>>, %arg8: memref<32x32xf32, #tpu.memory_space<vmem>>, %arg9: memref<32x32xf32, #tpu.memory_space<vmem>>) attributes {dimension_semantics = [], scalar_prefetch = 0 : i64, scratch_operands = 4 : i64, tpu.core_type = #tpu.core_type<tc>} {
    %c0 = arith.constant 0 : index
    %c0_0 = arith.constant 0 : index
    %c0_1 = arith.constant 0 : index
    %0 = vector.load %arg0[%c0, %c0_0, %c0_1] : memref<8x2x32xf32, #tpu.memory_space<vmem>>, vector<1x2x32xf32>
    %1 = vector.shape_cast %0 : vector<1x2x32xf32> to vector<2x32xf32>
    %c0_2 = arith.constant 0 : index
    %c0_3 = arith.constant 0 : index
    %2 = vector.load %arg6[%c0_2, %c0_3] : memref<16x32xf32, #tpu.memory_space<vmem>>, vector<2x32xf32>
    tpu.vector_store %arg6[%c0_2, %c0_3], %1 {strides = array<i32>} : memref<16x32xf32, #tpu.memory_space<vmem>>, vector<2x32xf32>,
    %c0_4 = arith.constant 0 : index
    %c0_5 = arith.constant 0 : index
    %c0_6 = arith.constant 0 : index
    %3 = vector.load %arg2[%c0_4, %c0_5, %c0_6] : memref<8x2x32xf32, #tpu.memory_space<vmem>>, vector<1x2x32xf32>
    %4 = vector.shape_cast %3 : vector<1x2x32xf32> to vector<2x32xf32>
    %c0_7 = arith.constant 0 : index
    %c0_8 = arith.constant 0 : index
    %5 = vector.load %arg7[%c0_7, %c0_8] : memref<16x32xf32, #tpu.memory_space<vmem>>, vector<2x32xf32>
    tpu.vector_store %arg7[%c0_7, %c0_8], %4 {strides = array<i32>} : memref<16x32xf32, #tpu.memory_space<vmem>>, vector<2x32xf32>,
    %c1 = arith.constant 1 : index
    %c0_9 = arith.constant 0 : index
    %c0_10 = arith.constant 0 : index
    %6 = vector.load %arg0[%c1, %c0_9, %c0_10] : memref<8x2x32xf32, #tpu.memory_space<vmem>>, vector<1x2x32xf32>
    %7 = vector.shape_cast %6 : vector<1x2x32xf32> to vector<2x32xf32>
    %c2 = arith.constant 2 : index
    %c0_11 = arith.constant 0 : index
    %8 = vector.load %arg6[%c2, %c0_11] : memref<16x32xf32, #tpu.memory_space<vmem>>, vector<2x32xf32>
    tpu.vector_store %arg6[%c2, %c0_11], %7 {strides = array<i32>} : memref<16x32xf32, #tpu.memory_space<vmem>>, vector<2x32xf32>,
    %c1_12 = arith.constant 1 : index
    %c0_13 = arith.constant 0 : index
    %c0_14 = arith.constant 0 : index
    %9 = vector.load %arg2[%c1_12, %c0_13, %c0_14] : memref<8x2x32xf32, #tpu.memory_space<vmem>>, vector<1x2x32xf32>
    %10 = vector.shape_cast %9 : vector<1x2x32xf32> to vector<2x32xf32>
    %c2_15 = arith.constant 2 : index
    %c0_16 = arith.constant 0 : index
    %11 = vector.load %arg7[%c2_15, %c0_16] : memref<16x32xf32, #tpu.memory_space<vmem>>, vector<2x32xf32>
    tpu.vector_store %arg7[%c2_15, %c0_16], %10 {strides = array<i32>} : memref<16x32xf32, #tpu.memory_space<vmem>>, vector<2x32xf32>,
    %c2_17 = arith.constant 2 : index
    %c0_18 = arith.constant 0 : index
    %c0_19 = arith.constant 0 : index
    %12 = vector.load %arg0[%c2_17, %c0_18, %c0_19] : memref<8x2x32xf32, #tpu.memory_space<vmem>>, vector<1x2x32xf32>
    %13 = vector.shape_cast %12 : vector<1x2x32xf32> to vector<2x32xf32>
    %c4 = arith.constant 4 : index
    %c0_20 = arith.constant 0 : index
    %14 = vector.load %arg6[%c4, %c0_20] : memref<16x32xf32, #tpu.memory_space<vmem>>, vector<2x32xf32>
    tpu.vector_store %arg6[%c4, %c0_20], %13 {strides = array<i32>} : memref<16x32xf32, #tpu.memory_space<vmem>>, vector<2x32xf32>,
    %c2_21 = arith.constant 2 : index
    %c0_22 = arith.constant 0 : index
    %c0_23 = arith.constant 0 : index
    %15 = vector.load %arg2[%c2_21, %c0_22, %c0_23] : memref<8x2x32xf32, #tpu.memory_space<vmem>>, vector<1x2x32xf32>
    %16 = vector.shape_cast %15 : vector<1x2x32xf32> to vector<2x32xf32>
    %c4_24 = arith.constant 4 : index
    %c0_25 = arith.constant 0 : index
    %17 = vector.load %arg7[%c4_24, %c0_25] : memref<16x32xf32, #tpu.memory_space<vmem>>, vector<2x32xf32>
    tpu.vector_store %arg7[%c4_24, %c0_25], %16 {strides = array<i32>} : memref<16x32xf32, #tpu.memory_space<vmem>>, vector<2x32xf32>,
    %c3 = arith.constant 3 : index
    %c0_26 = arith.constant 0 : index
    %c0_27 = arith.constant 0 : index
    %18 = vector.load %arg0[%c3, %c0_26, %c0_27] : memref<8x2x32xf32, #tpu.memory_space<vmem>>, vector<1x2x32xf32>
    %19 = vector.shape_cast %18 : vector<1x2x32xf32> to vector<2x32xf32>
    %c6 = arith.constant 6 : index
    %c0_28 = arith.constant 0 : index
    %20 = vector.load %arg6[%c6, %c0_28] : memref<16x32xf32, #tpu.memory_space<vmem>>, vector<2x32xf32>
    tpu.vector_store %arg6[%c6, %c0_28], %19 {strides = array<i32>} : memref<16x32xf32, #tpu.memory_space<vmem>>, vector<2x32xf32>,
    %c3_29 = arith.constant 3 : index
    %c0_30 = arith.constant 0 : index
    %c0_31 = arith.constant 0 : index
    %21 = vector.load %arg2[%c3_29, %c0_30, %c0_31] : memref<8x2x32xf32, #tpu.memory_space<vmem>>, vector<1x2x32xf32>
    %22 = vector.shape_cast %21 : vector<1x2x32xf32> to vector<2x32xf32>
    %c6_32 = arith.constant 6 : index
    %c0_33 = arith.constant 0 : index
    %23 = vector.load %arg7[%c6_32, %c0_33] : memref<16x32xf32, #tpu.memory_space<vmem>>, vector<2x32xf32>
    tpu.vector_store %arg7[%c6_32, %c0_33], %22 {strides = array<i32>} : memref<16x32xf32, #tpu.memory_space<vmem>>, vector<2x32xf32>,
    %c4_34 = arith.constant 4 : index
    %c0_35 = arith.constant 0 : index
    %c0_36 = arith.constant 0 : index
    %24 = vector.load %arg0[%c4_34, %c0_35, %c0_36] : memref<8x2x32xf32, #tpu.memory_space<vmem>>, vector<1x2x32xf32>
    %25 = vector.shape_cast %24 : vector<1x2x32xf32> to vector<2x32xf32>
    %c8 = arith.constant 8 : index
    %c0_37 = arith.constant 0 : index
    %26 = vector.load %arg6[%c8, %c0_37] : memref<16x32xf32, #tpu.memory_space<vmem>>, vector<2x32xf32>
    tpu.vector_store %arg6[%c8, %c0_37], %25 {strides = array<i32>} : memref<16x32xf32, #tpu.memory_space<vmem>>, vector<2x32xf32>,
    %c4_38 = arith.constant 4 : index
    %c0_39 = arith.constant 0 : index
    %c0_40 = arith.constant 0 : index
    %27 = vector.load %arg2[%c4_38, %c0_39, %c0_40] : memref<8x2x32xf32, #tpu.memory_space<vmem>>, vector<1x2x32xf32>
    %28 = vector.shape_cast %27 : vector<1x2x32xf32> to vector<2x32xf32>
    %c8_41 = arith.constant 8 : index
    %c0_42 = arith.constant 0 : index
    %29 = vector.load %arg7[%c8_41, %c0_42] : memref<16x32xf32, #tpu.memory_space<vmem>>, vector<2x32xf32>
    tpu.vector_store %arg7[%c8_41, %c0_42], %28 {strides = array<i32>} : memref<16x32xf32, #tpu.memory_space<vmem>>, vector<2x32xf32>,
    %c5 = arith.constant 5 : index
    %c0_43 = arith.constant 0 : index
    %c0_44 = arith.constant 0 : index
    %30 = vector.load %arg0[%c5, %c0_43, %c0_44] : memref<8x2x32xf32, #tpu.memory_space<vmem>>, vector<1x2x32xf32>
    %31 = vector.shape_cast %30 : vector<1x2x32xf32> to vector<2x32xf32>
    %c10 = arith.constant 10 : index
    %c0_45 = arith.constant 0 : index
    %32 = vector.load %arg6[%c10, %c0_45] : memref<16x32xf32, #tpu.memory_space<vmem>>, vector<2x32xf32>
    tpu.vector_store %arg6[%c10, %c0_45], %31 {strides = array<i32>} : memref<16x32xf32, #tpu.memory_space<vmem>>, vector<2x32xf32>,
    %c5_46 = arith.constant 5 : index
    %c0_47 = arith.constant 0 : index
    %c0_48 = arith.constant 0 : index
    %33 = vector.load %arg2[%c5_46, %c0_47, %c0_48] : memref<8x2x32xf32, #tpu.memory_space<vmem>>, vector<1x2x32xf32>
    %34 = vector.shape_cast %33 : vector<1x2x32xf32> to vector<2x32xf32>
    %c10_49 = arith.constant 10 : index
    %c0_50 = arith.constant 0 : index
    %35 = vector.load %arg7[%c10_49, %c0_50] : memref<16x32xf32, #tpu.memory_space<vmem>>, vector<2x32xf32>
    tpu.vector_store %arg7[%c10_49, %c0_50], %34 {strides = array<i32>} : memref<16x32xf32, #tpu.memory_space<vmem>>, vector<2x32xf32>,
    %c6_51 = arith.constant 6 : index
    %c0_52 = arith.constant 0 : index
    %c0_53 = arith.constant 0 : index
    %36 = vector.load %arg0[%c6_51, %c0_52, %c0_53] : memref<8x2x32xf32, #tpu.memory_space<vmem>>, vector<1x2x32xf32>
    %37 = vector.shape_cast %36 : vector<1x2x32xf32> to vector<2x32xf32>
    %c12 = arith.constant 12 : index
    %c0_54 = arith.constant 0 : index
    %38 = vector.load %arg6[%c12, %c0_54] : memref<16x32xf32, #tpu.memory_space<vmem>>, vector<2x32xf32>
    tpu.vector_store %arg6[%c12, %c0_54], %37 {strides = array<i32>} : memref<16x32xf32, #tpu.memory_space<vmem>>, vector<2x32xf32>,
    %c6_55 = arith.constant 6 : index
    %c0_56 = arith.constant 0 : index
    %c0_57 = arith.constant 0 : index
    %39 = vector.load %arg2[%c6_55, %c0_56, %c0_57] : memref<8x2x32xf32, #tpu.memory_space<vmem>>, vector<1x2x32xf32>
    %40 = vector.shape_cast %39 : vector<1x2x32xf32> to vector<2x32xf32>
    %c12_58 = arith.constant 12 : index
    %c0_59 = arith.constant 0 : index
    %41 = vector.load %arg7[%c12_58, %c0_59] : memref<16x32xf32, #tpu.memory_space<vmem>>, vector<2x32xf32>
    tpu.vector_store %arg7[%c12_58, %c0_59], %40 {strides = array<i32>} : memref<16x32xf32, #tpu.memory_space<vmem>>, vector<2x32xf32>,
    %c7 = arith.constant 7 : index
    %c0_60 = arith.constant 0 : index
    %c0_61 = arith.constant 0 : index
    %42 = vector.load %arg0[%c7, %c0_60, %c0_61] : memref<8x2x32xf32, #tpu.memory_space<vmem>>, vector<1x2x32xf32>
    %43 = vector.shape_cast %42 : vector<1x2x32xf32> to vector<2x32xf32>
    %c14 = arith.constant 14 : index
    %c0_62 = arith.constant 0 : index
    %44 = vector.load %arg6[%c14, %c0_62] : memref<16x32xf32, #tpu.memory_space<vmem>>, vector<2x32xf32>
    tpu.vector_store %arg6[%c14, %c0_62], %43 {strides = array<i32>} : memref<16x32xf32, #tpu.memory_space<vmem>>, vector<2x32xf32>,
    %c7_63 = arith.constant 7 : index
    %c0_64 = arith.constant 0 : index
    %c0_65 = arith.constant 0 : index
    %45 = vector.load %arg2[%c7_63, %c0_64, %c0_65] : memref<8x2x32xf32, #tpu.memory_space<vmem>>, vector<1x2x32xf32>
    %46 = vector.shape_cast %45 : vector<1x2x32xf32> to vector<2x32xf32>
    %c14_66 = arith.constant 14 : index
    %c0_67 = arith.constant 0 : index
    %47 = vector.load %arg7[%c14_66, %c0_67] : memref<16x32xf32, #tpu.memory_space<vmem>>, vector<2x32xf32>
    tpu.vector_store %arg7[%c14_66, %c0_67], %46 {strides = array<i32>} : memref<16x32xf32, #tpu.memory_space<vmem>>, vector<2x32xf32>,
    %c0_68 = arith.constant 0 : index
    %c0_69 = arith.constant 0 : index
    %c0_70 = arith.constant 0 : index
    %48 = vector.load %arg1[%c0_68, %c0_69, %c0_70] : memref<16x2x32xf32, #tpu.memory_space<vmem>>, vector<1x2x32xf32>
    %49 = vector.shape_cast %48 : vector<1x2x32xf32> to vector<2x32xf32>
    %c0_71 = arith.constant 0 : index
    %c0_72 = arith.constant 0 : index
    %50 = vector.load %arg8[%c0_71, %c0_72] : memref<32x32xf32, #tpu.memory_space<vmem>>, vector<2x32xf32>
    tpu.vector_store %arg8[%c0_71, %c0_72], %49 {strides = array<i32>} : memref<32x32xf32, #tpu.memory_space<vmem>>, vector<2x32xf32>,
    %c0_73 = arith.constant 0 : index
    %c0_74 = arith.constant 0 : index
    %c0_75 = arith.constant 0 : index
    %51 = vector.load %arg3[%c0_73, %c0_74, %c0_75] : memref<16x2x32xf32, #tpu.memory_space<vmem>>, vector<1x2x32xf32>
    %52 = vector.shape_cast %51 : vector<1x2x32xf32> to vector<2x32xf32>
    %53 = arith.addf %49, %52 : vector<2x32xf32>
    %c0_76 = arith.constant 0 : index
    %c0_77 = arith.constant 0 : index
    %54 = vector.load %arg9[%c0_76, %c0_77] : memref<32x32xf32, #tpu.memory_space<vmem>>, vector<2x32xf32>
    tpu.vector_store %arg9[%c0_76, %c0_77], %53 {strides = array<i32>} : memref<32x32xf32, #tpu.memory_space<vmem>>, vector<2x32xf32>,
    %c1_78 = arith.constant 1 : index
    %c0_79 = arith.constant 0 : index
    %c0_80 = arith.constant 0 : index
    %55 = vector.load %arg1[%c1_78, %c0_79, %c0_80] : memref<16x2x32xf32, #tpu.memory_space<vmem>>, vector<1x2x32xf32>
    %56 = vector.shape_cast %55 : vector<1x2x32xf32> to vector<2x32xf32>
    %c2_81 = arith.constant 2 : index
    %c0_82 = arith.constant 0 : index
    %57 = vector.load %arg8[%c2_81, %c0_82] : memref<32x32xf32, #tpu.memory_space<vmem>>, vector<2x32xf32>
    tpu.vector_store %arg8[%c2_81, %c0_82], %56 {strides = array<i32>} : memref<32x32xf32, #tpu.memory_space<vmem>>, vector<2x32xf32>,
    %c1_83 = arith.constant 1 : index
    %c0_84 = arith.constant 0 : index
    %c0_85 = arith.constant 0 : index
    %58 = vector.load %arg3[%c1_83, %c0_84, %c0_85] : memref<16x2x32xf32, #tpu.memory_space<vmem>>, vector<1x2x32xf32>
    %59 = vector.shape_cast %58 : vector<1x2x32xf32> to vector<2x32xf32>
    %60 = arith.addf %56, %59 : vector<2x32xf32>
    %c2_86 = arith.constant 2 : index
    %c0_87 = arith.constant 0 : index
    %61 = vector.load %arg9[%c2_86, %c0_87] : memref<32x32xf32, #tpu.memory_space<vmem>>, vector<2x32xf32>
    tpu.vector_store %arg9[%c2_86, %c0_87], %60 {strides = array<i32>} : memref<32x32xf32, #tpu.memory_space<vmem>>, vector<2x32xf32>,
    %c2_88 = arith.constant 2 : index
    %c0_89 = arith.constant 0 : index
    %c0_90 = arith.constant 0 : index
    %62 = vector.load %arg1[%c2_88, %c0_89, %c0_90] : memref<16x2x32xf32, #tpu.memory_space<vmem>>, vector<1x2x32xf32>
    %63 = vector.shape_cast %62 : vector<1x2x32xf32> to vector<2x32xf32>
    %c4_91 = arith.constant 4 : index
    %c0_92 = arith.constant 0 : index
    %64 = vector.load %arg8[%c4_91, %c0_92] : memref<32x32xf32, #tpu.memory_space<vmem>>, vector<2x32xf32>
    tpu.vector_store %arg8[%c4_91, %c0_92], %63 {strides = array<i32>} : memref<32x32xf32, #tpu.memory_space<vmem>>, vector<2x32xf32>,
    %c2_93 = arith.constant 2 : index
    %c0_94 = arith.constant 0 : index
    %c0_95 = arith.constant 0 : index
    %65 = vector.load %arg3[%c2_93, %c0_94, %c0_95] : memref<16x2x32xf32, #tpu.memory_space<vmem>>, vector<1x2x32xf32>
    %66 = vector.shape_cast %65 : vector<1x2x32xf32> to vector<2x32xf32>
    %67 = arith.addf %63, %66 : vector<2x32xf32>
    %c4_96 = arith.constant 4 : index
    %c0_97 = arith.constant 0 : index
    %68 = vector.load %arg9[%c4_96, %c0_97] : memref<32x32xf32, #tpu.memory_space<vmem>>, vector<2x32xf32>
    tpu.vector_store %arg9[%c4_96, %c0_97], %67 {strides = array<i32>} : memref<32x32xf32, #tpu.memory_space<vmem>>, vector<2x32xf32>,
    %c3_98 = arith.constant 3 : index
    %c0_99 = arith.constant 0 : index
    %c0_100 = arith.constant 0 : index
    %69 = vector.load %arg1[%c3_98, %c0_99, %c0_100] : memref<16x2x32xf32, #tpu.memory_space<vmem>>, vector<1x2x32xf32>
    %70 = vector.shape_cast %69 : vector<1x2x32xf32> to vector<2x32xf32>
    %c6_101 = arith.constant 6 : index
    %c0_102 = arith.constant 0 : index
    %71 = vector.load %arg8[%c6_101, %c0_102] : memref<32x32xf32, #tpu.memory_space<vmem>>, vector<2x32xf32>
    tpu.vector_store %arg8[%c6_101, %c0_102], %70 {strides = array<i32>} : memref<32x32xf32, #tpu.memory_space<vmem>>, vector<2x32xf32>,
    %c3_103 = arith.constant 3 : index
    %c0_104 = arith.constant 0 : index
    %c0_105 = arith.constant 0 : index
    %72 = vector.load %arg3[%c3_103, %c0_104, %c0_105] : memref<16x2x32xf32, #tpu.memory_space<vmem>>, vector<1x2x32xf32>
    %73 = vector.shape_cast %72 : vector<1x2x32xf32> to vector<2x32xf32>
    %74 = arith.addf %70, %73 : vector<2x32xf32>
    %c6_106 = arith.constant 6 : index
    %c0_107 = arith.constant 0 : index
    %75 = vector.load %arg9[%c6_106, %c0_107] : memref<32x32xf32, #tpu.memory_space<vmem>>, vector<2x32xf32>
    tpu.vector_store %arg9[%c6_106, %c0_107], %74 {strides = array<i32>} : memref<32x32xf32, #tpu.memory_space<vmem>>, vector<2x32xf32>,
    %c4_108 = arith.constant 4 : index
    %c0_109 = arith.constant 0 : index
    %c0_110 = arith.constant 0 : index
    %76 = vector.load %arg1[%c4_108, %c0_109, %c0_110] : memref<16x2x32xf32, #tpu.memory_space<vmem>>, vector<1x2x32xf32>
    %77 = vector.shape_cast %76 : vector<1x2x32xf32> to vector<2x32xf32>
    %c8_111 = arith.constant 8 : index
    %c0_112 = arith.constant 0 : index
    %78 = vector.load %arg8[%c8_111, %c0_112] : memref<32x32xf32, #tpu.memory_space<vmem>>, vector<2x32xf32>
    tpu.vector_store %arg8[%c8_111, %c0_112], %77 {strides = array<i32>} : memref<32x32xf32, #tpu.memory_space<vmem>>, vector<2x32xf32>,
    %c4_113 = arith.constant 4 : index
    %c0_114 = arith.constant 0 : index
    %c0_115 = arith.constant 0 : index
    %79 = vector.load %arg3[%c4_113, %c0_114, %c0_115] : memref<16x2x32xf32, #tpu.memory_space<vmem>>, vector<1x2x32xf32>
    %80 = vector.shape_cast %79 : vector<1x2x32xf32> to vector<2x32xf32>
    %81 = arith.addf %77, %80 : vector<2x32xf32>
    %c8_116 = arith.constant 8 : index
    %c0_117 = arith.constant 0 : index
    %82 = vector.load %arg9[%c8_116, %c0_117] : memref<32x32xf32, #tpu.memory_space<vmem>>, vector<2x32xf32>
    tpu.vector_store %arg9[%c8_116, %c0_117], %81 {strides = array<i32>} : memref<32x32xf32, #tpu.memory_space<vmem>>, vector<2x32xf32>,
    %c5_118 = arith.constant 5 : index
    %c0_119 = arith.constant 0 : index
    %c0_120 = arith.constant 0 : index
    %83 = vector.load %arg1[%c5_118, %c0_119, %c0_120] : memref<16x2x32xf32, #tpu.memory_space<vmem>>, vector<1x2x32xf32>
    %84 = vector.shape_cast %83 : vector<1x2x32xf32> to vector<2x32xf32>
    %c10_121 = arith.constant 10 : index
    %c0_122 = arith.constant 0 : index
    %85 = vector.load %arg8[%c10_121, %c0_122] : memref<32x32xf32, #tpu.memory_space<vmem>>, vector<2x32xf32>
    tpu.vector_store %arg8[%c10_121, %c0_122], %84 {strides = array<i32>} : memref<32x32xf32, #tpu.memory_space<vmem>>, vector<2x32xf32>,
    %c5_123 = arith.constant 5 : index
    %c0_124 = arith.constant 0 : index
    %c0_125 = arith.constant 0 : index
    %86 = vector.load %arg3[%c5_123, %c0_124, %c0_125] : memref<16x2x32xf32, #tpu.memory_space<vmem>>, vector<1x2x32xf32>
    %87 = vector.shape_cast %86 : vector<1x2x32xf32> to vector<2x32xf32>
    %88 = arith.addf %84, %87 : vector<2x32xf32>
    %c10_126 = arith.constant 10 : index
    %c0_127 = arith.constant 0 : index
    %89 = vector.load %arg9[%c10_126, %c0_127] : memref<32x32xf32, #tpu.memory_space<vmem>>, vector<2x32xf32>
    tpu.vector_store %arg9[%c10_126, %c0_127], %88 {strides = array<i32>} : memref<32x32xf32, #tpu.memory_space<vmem>>, vector<2x32xf32>,
    %c6_128 = arith.constant 6 : index
    %c0_129 = arith.constant 0 : index
    %c0_130 = arith.constant 0 : index
    %90 = vector.load %arg1[%c6_128, %c0_129, %c0_130] : memref<16x2x32xf32, #tpu.memory_space<vmem>>, vector<1x2x32xf32>
    %91 = vector.shape_cast %90 : vector<1x2x32xf32> to vector<2x32xf32>
    %c12_131 = arith.constant 12 : index
    %c0_132 = arith.constant 0 : index
    %92 = vector.load %arg8[%c12_131, %c0_132] : memref<32x32xf32, #tpu.memory_space<vmem>>, vector<2x32xf32>
    tpu.vector_store %arg8[%c12_131, %c0_132], %91 {strides = array<i32>} : memref<32x32xf32, #tpu.memory_space<vmem>>, vector<2x32xf32>,
    %c6_133 = arith.constant 6 : index
    %c0_134 = arith.constant 0 : index
    %c0_135 = arith.constant 0 : index
    %93 = vector.load %arg3[%c6_133, %c0_134, %c0_135] : memref<16x2x32xf32, #tpu.memory_space<vmem>>, vector<1x2x32xf32>
    %94 = vector.shape_cast %93 : vector<1x2x32xf32> to vector<2x32xf32>
    %95 = arith.addf %91, %94 : vector<2x32xf32>
    %c12_136 = arith.constant 12 : index
    %c0_137 = arith.constant 0 : index
    %96 = vector.load %arg9[%c12_136, %c0_137] : memref<32x32xf32, #tpu.memory_space<vmem>>, vector<2x32xf32>
    tpu.vector_store %arg9[%c12_136, %c0_137], %95 {strides = array<i32>} : memref<32x32xf32, #tpu.memory_space<vmem>>, vector<2x32xf32>,
    %c7_138 = arith.constant 7 : index
    %c0_139 = arith.constant 0 : index
    %c0_140 = arith.constant 0 : index
    %97 = vector.load %arg1[%c7_138, %c0_139, %c0_140] : memref<16x2x32xf32, #tpu.memory_space<vmem>>, vector<1x2x32xf32>
    %98 = vector.shape_cast %97 : vector<1x2x32xf32> to vector<2x32xf32>
    %c14_141 = arith.constant 14 : index
    %c0_142 = arith.constant 0 : index
    %99 = vector.load %arg8[%c14_141, %c0_142] : memref<32x32xf32, #tpu.memory_space<vmem>>, vector<2x32xf32>
    tpu.vector_store %arg8[%c14_141, %c0_142], %98 {strides = array<i32>} : memref<32x32xf32, #tpu.memory_space<vmem>>, vector<2x32xf32>,
    %c7_143 = arith.constant 7 : index
    %c0_144 = arith.constant 0 : index
    %c0_145 = arith.constant 0 : index
    %100 = vector.load %arg3[%c7_143, %c0_144, %c0_145] : memref<16x2x32xf32, #tpu.memory_space<vmem>>, vector<1x2x32xf32>
    %101 = vector.shape_cast %100 : vector<1x2x32xf32> to vector<2x32xf32>
    %102 = arith.addf %98, %101 : vector<2x32xf32>
    %c14_146 = arith.constant 14 : index
    %c0_147 = arith.constant 0 : index
    %103 = vector.load %arg9[%c14_146, %c0_147] : memref<32x32xf32, #tpu.memory_space<vmem>>, vector<2x32xf32>
    tpu.vector_store %arg9[%c14_146, %c0_147], %102 {strides = array<i32>} : memref<32x32xf32, #tpu.memory_space<vmem>>, vector<2x32xf32>,
    %c8_148 = arith.constant 8 : index
    %c0_149 = arith.constant 0 : index
    %c0_150 = arith.constant 0 : index
    %104 = vector.load %arg1[%c8_148, %c0_149, %c0_150] : memref<16x2x32xf32, #tpu.memory_space<vmem>>, vector<1x2x32xf32>
    %105 = vector.shape_cast %104 : vector<1x2x32xf32> to vector<2x32xf32>
    %c16 = arith.constant 16 : index
    %c0_151 = arith.constant 0 : index
    %106 = vector.load %arg8[%c16, %c0_151] : memref<32x32xf32, #tpu.memory_space<vmem>>, vector<2x32xf32>
    tpu.vector_store %arg8[%c16, %c0_151], %105 {strides = array<i32>} : memref<32x32xf32, #tpu.memory_space<vmem>>, vector<2x32xf32>,
    %c8_152 = arith.constant 8 : index
    %c0_153 = arith.constant 0 : index
    %c0_154 = arith.constant 0 : index
    %107 = vector.load %arg3[%c8_152, %c0_153, %c0_154] : memref<16x2x32xf32, #tpu.memory_space<vmem>>, vector<1x2x32xf32>
    %108 = vector.shape_cast %107 : vector<1x2x32xf32> to vector<2x32xf32>
    %109 = arith.addf %105, %108 : vector<2x32xf32>
    %c16_155 = arith.constant 16 : index
    %c0_156 = arith.constant 0 : index
    %110 = vector.load %arg9[%c16_155, %c0_156] : memref<32x32xf32, #tpu.memory_space<vmem>>, vector<2x32xf32>
    tpu.vector_store %arg9[%c16_155, %c0_156], %109 {strides = array<i32>} : memref<32x32xf32, #tpu.memory_space<vmem>>, vector<2x32xf32>,
    %c9 = arith.constant 9 : index
    %c0_157 = arith.constant 0 : index
    %c0_158 = arith.constant 0 : index
    %111 = vector.load %arg1[%c9, %c0_157, %c0_158] : memref<16x2x32xf32, #tpu.memory_space<vmem>>, vector<1x2x32xf32>
    %112 = vector.shape_cast %111 : vector<1x2x32xf32> to vector<2x32xf32>
    %c18 = arith.constant 18 : index
    %c0_159 = arith.constant 0 : index
    %113 = vector.load %arg8[%c18, %c0_159] : memref<32x32xf32, #tpu.memory_space<vmem>>, vector<2x32xf32>
    tpu.vector_store %arg8[%c18, %c0_159], %112 {strides = array<i32>} : memref<32x32xf32, #tpu.memory_space<vmem>>, vector<2x32xf32>,
    %c9_160 = arith.constant 9 : index
    %c0_161 = arith.constant 0 : index
    %c0_162 = arith.constant 0 : index
    %114 = vector.load %arg3[%c9_160, %c0_161, %c0_162] : memref<16x2x32xf32, #tpu.memory_space<vmem>>, vector<1x2x32xf32>
    %115 = vector.shape_cast %114 : vector<1x2x32xf32> to vector<2x32xf32>
    %116 = arith.addf %112, %115 : vector<2x32xf32>
    %c18_163 = arith.constant 18 : index
    %c0_164 = arith.constant 0 : index
    %117 = vector.load %arg9[%c18_163, %c0_164] : memref<32x32xf32, #tpu.memory_space<vmem>>, vector<2x32xf32>
    tpu.vector_store %arg9[%c18_163, %c0_164], %116 {strides = array<i32>} : memref<32x32xf32, #tpu.memory_space<vmem>>, vector<2x32xf32>,
    %c10_165 = arith.constant 10 : index
    %c0_166 = arith.constant 0 : index
    %c0_167 = arith.constant 0 : index
    %118 = vector.load %arg1[%c10_165, %c0_166, %c0_167] : memref<16x2x32xf32, #tpu.memory_space<vmem>>, vector<1x2x32xf32>
    %119 = vector.shape_cast %118 : vector<1x2x32xf32> to vector<2x32xf32>
    %c20 = arith.constant 20 : index
    %c0_168 = arith.constant 0 : index
    %120 = vector.load %arg8[%c20, %c0_168] : memref<32x32xf32, #tpu.memory_space<vmem>>, vector<2x32xf32>
    tpu.vector_store %arg8[%c20, %c0_168], %119 {strides = array<i32>} : memref<32x32xf32, #tpu.memory_space<vmem>>, vector<2x32xf32>,
    %c10_169 = arith.constant 10 : index
    %c0_170 = arith.constant 0 : index
    %c0_171 = arith.constant 0 : index
    %121 = vector.load %arg3[%c10_169, %c0_170, %c0_171] : memref<16x2x32xf32, #tpu.memory_space<vmem>>, vector<1x2x32xf32>
    %122 = vector.shape_cast %121 : vector<1x2x32xf32> to vector<2x32xf32>
    %123 = arith.addf %119, %122 : vector<2x32xf32>
    %c20_172 = arith.constant 20 : index
    %c0_173 = arith.constant 0 : index
    %124 = vector.load %arg9[%c20_172, %c0_173] : memref<32x32xf32, #tpu.memory_space<vmem>>, vector<2x32xf32>
    tpu.vector_store %arg9[%c20_172, %c0_173], %123 {strides = array<i32>} : memref<32x32xf32, #tpu.memory_space<vmem>>, vector<2x32xf32>,
    %c11 = arith.constant 11 : index
    %c0_174 = arith.constant 0 : index
    %c0_175 = arith.constant 0 : index
    %125 = vector.load %arg1[%c11, %c0_174, %c0_175] : memref<16x2x32xf32, #tpu.memory_space<vmem>>, vector<1x2x32xf32>
    %126 = vector.shape_cast %125 : vector<1x2x32xf32> to vector<2x32xf32>
    %c22 = arith.constant 22 : index
    %c0_176 = arith.constant 0 : index
    %127 = vector.load %arg8[%c22, %c0_176] : memref<32x32xf32, #tpu.memory_space<vmem>>, vector<2x32xf32>
    tpu.vector_store %arg8[%c22, %c0_176], %126 {strides = array<i32>} : memref<32x32xf32, #tpu.memory_space<vmem>>, vector<2x32xf32>,
    %c11_177 = arith.constant 11 : index
    %c0_178 = arith.constant 0 : index
    %c0_179 = arith.constant 0 : index
    %128 = vector.load %arg3[%c11_177, %c0_178, %c0_179] : memref<16x2x32xf32, #tpu.memory_space<vmem>>, vector<1x2x32xf32>
    %129 = vector.shape_cast %128 : vector<1x2x32xf32> to vector<2x32xf32>
    %130 = arith.addf %126, %129 : vector<2x32xf32>
    %c22_180 = arith.constant 22 : index
    %c0_181 = arith.constant 0 : index
    %131 = vector.load %arg9[%c22_180, %c0_181] : memref<32x32xf32, #tpu.memory_space<vmem>>, vector<2x32xf32>
    tpu.vector_store %arg9[%c22_180, %c0_181], %130 {strides = array<i32>} : memref<32x32xf32, #tpu.memory_space<vmem>>, vector<2x32xf32>,
    %c12_182 = arith.constant 12 : index
    %c0_183 = arith.constant 0 : index
    %c0_184 = arith.constant 0 : index
    %132 = vector.load %arg1[%c12_182, %c0_183, %c0_184] : memref<16x2x32xf32, #tpu.memory_space<vmem>>, vector<1x2x32xf32>
    %133 = vector.shape_cast %132 : vector<1x2x32xf32> to vector<2x32xf32>
    %c24 = arith.constant 24 : index
    %c0_185 = arith.constant 0 : index
    %134 = vector.load %arg8[%c24, %c0_185] : memref<32x32xf32, #tpu.memory_space<vmem>>, vector<2x32xf32>
    tpu.vector_store %arg8[%c24, %c0_185], %133 {strides = array<i32>} : memref<32x32xf32, #tpu.memory_space<vmem>>, vector<2x32xf32>,
    %c12_186 = arith.constant 12 : index
    %c0_187 = arith.constant 0 : index
    %c0_188 = arith.constant 0 : index
    %135 = vector.load %arg3[%c12_186, %c0_187, %c0_188] : memref<16x2x32xf32, #tpu.memory_space<vmem>>, vector<1x2x32xf32>
    %136 = vector.shape_cast %135 : vector<1x2x32xf32> to vector<2x32xf32>
    %137 = arith.addf %133, %136 : vector<2x32xf32>
    %c24_189 = arith.constant 24 : index
    %c0_190 = arith.constant 0 : index
    %138 = vector.load %arg9[%c24_189, %c0_190] : memref<32x32xf32, #tpu.memory_space<vmem>>, vector<2x32xf32>
    tpu.vector_store %arg9[%c24_189, %c0_190], %137 {strides = array<i32>} : memref<32x32xf32, #tpu.memory_space<vmem>>, vector<2x32xf32>,
    %c13 = arith.constant 13 : index
    %c0_191 = arith.constant 0 : index
    %c0_192 = arith.constant 0 : index
    %139 = vector.load %arg1[%c13, %c0_191, %c0_192] : memref<16x2x32xf32, #tpu.memory_space<vmem>>, vector<1x2x32xf32>
    %140 = vector.shape_cast %139 : vector<1x2x32xf32> to vector<2x32xf32>
    %c26 = arith.constant 26 : index
    %c0_193 = arith.constant 0 : index
    %141 = vector.load %arg8[%c26, %c0_193] : memref<32x32xf32, #tpu.memory_space<vmem>>, vector<2x32xf32>
    tpu.vector_store %arg8[%c26, %c0_193], %140 {strides = array<i32>} : memref<32x32xf32, #tpu.memory_space<vmem>>, vector<2x32xf32>,
    %c13_194 = arith.constant 13 : index
    %c0_195 = arith.constant 0 : index
    %c0_196 = arith.constant 0 : index
    %142 = vector.load %arg3[%c13_194, %c0_195, %c0_196] : memref<16x2x32xf32, #tpu.memory_space<vmem>>, vector<1x2x32xf32>
    %143 = vector.shape_cast %142 : vector<1x2x32xf32> to vector<2x32xf32>
    %144 = arith.addf %140, %143 : vector<2x32xf32>
    %c26_197 = arith.constant 26 : index
    %c0_198 = arith.constant 0 : index
    %145 = vector.load %arg9[%c26_197, %c0_198] : memref<32x32xf32, #tpu.memory_space<vmem>>, vector<2x32xf32>
    tpu.vector_store %arg9[%c26_197, %c0_198], %144 {strides = array<i32>} : memref<32x32xf32, #tpu.memory_space<vmem>>, vector<2x32xf32>,
    %c14_199 = arith.constant 14 : index
    %c0_200 = arith.constant 0 : index
    %c0_201 = arith.constant 0 : index
    %146 = vector.load %arg1[%c14_199, %c0_200, %c0_201] : memref<16x2x32xf32, #tpu.memory_space<vmem>>, vector<1x2x32xf32>
    %147 = vector.shape_cast %146 : vector<1x2x32xf32> to vector<2x32xf32>
    %c28 = arith.constant 28 : index
    %c0_202 = arith.constant 0 : index
    %148 = vector.load %arg8[%c28, %c0_202] : memref<32x32xf32, #tpu.memory_space<vmem>>, vector<2x32xf32>
    tpu.vector_store %arg8[%c28, %c0_202], %147 {strides = array<i32>} : memref<32x32xf32, #tpu.memory_space<vmem>>, vector<2x32xf32>,
    %c14_203 = arith.constant 14 : index
    %c0_204 = arith.constant 0 : index
    %c0_205 = arith.constant 0 : index
    %149 = vector.load %arg3[%c14_203, %c0_204, %c0_205] : memref<16x2x32xf32, #tpu.memory_space<vmem>>, vector<1x2x32xf32>
    %150 = vector.shape_cast %149 : vector<1x2x32xf32> to vector<2x32xf32>
    %151 = arith.addf %147, %150 : vector<2x32xf32>
    %c28_206 = arith.constant 28 : index
    %c0_207 = arith.constant 0 : index
    %152 = vector.load %arg9[%c28_206, %c0_207] : memref<32x32xf32, #tpu.memory_space<vmem>>, vector<2x32xf32>
    tpu.vector_store %arg9[%c28_206, %c0_207], %151 {strides = array<i32>} : memref<32x32xf32, #tpu.memory_space<vmem>>, vector<2x32xf32>,
    %c15 = arith.constant 15 : index
    %c0_208 = arith.constant 0 : index
    %c0_209 = arith.constant 0 : index
    %153 = vector.load %arg1[%c15, %c0_208, %c0_209] : memref<16x2x32xf32, #tpu.memory_space<vmem>>, vector<1x2x32xf32>
    %154 = vector.shape_cast %153 : vector<1x2x32xf32> to vector<2x32xf32>
    %c30 = arith.constant 30 : index
    %c0_210 = arith.constant 0 : index
    %155 = vector.load %arg8[%c30, %c0_210] : memref<32x32xf32, #tpu.memory_space<vmem>>, vector<2x32xf32>
    tpu.vector_store %arg8[%c30, %c0_210], %154 {strides = array<i32>} : memref<32x32xf32, #tpu.memory_space<vmem>>, vector<2x32xf32>,
    %c15_211 = arith.constant 15 : index
    %c0_212 = arith.constant 0 : index
    %c0_213 = arith.constant 0 : index
    %156 = vector.load %arg3[%c15_211, %c0_212, %c0_213] : memref<16x2x32xf32, #tpu.memory_space<vmem>>, vector<1x2x32xf32>
    %157 = vector.shape_cast %156 : vector<1x2x32xf32> to vector<2x32xf32>
    %158 = arith.addf %154, %157 : vector<2x32xf32>
    %c30_214 = arith.constant 30 : index
    %c0_215 = arith.constant 0 : index
    %159 = vector.load %arg9[%c30_214, %c0_215] : memref<32x32xf32, #tpu.memory_space<vmem>>, vector<2x32xf32>
    tpu.vector_store %arg9[%c30_214, %c0_215], %158 {strides = array<i32>} : memref<32x32xf32, #tpu.memory_space<vmem>>, vector<2x32xf32>,
    %c0_216 = arith.constant 0 : index
    %c0_217 = arith.constant 0 : index
    %160 = vector.load %arg6[%c0_216, %c0_217] : memref<16x32xf32, #tpu.memory_space<vmem>>, vector<16x32xf32>
    %c0_218 = arith.constant 0 : index
    %c0_219 = arith.constant 0 : index
    %161 = vector.load %arg7[%c0_218, %c0_219] : memref<16x32xf32, #tpu.memory_space<vmem>>, vector<16x32xf32>
    %c0_220 = arith.constant 0 : index
    %c0_221 = arith.constant 0 : index
    %162 = vector.load %arg8[%c0_220, %c0_221] : memref<32x32xf32, #tpu.memory_space<vmem>>, vector<32x32xf32>
    %c0_222 = arith.constant 0 : index
    %c0_223 = arith.constant 0 : index
    %163 = vector.load %arg9[%c0_222, %c0_223] : memref<32x32xf32, #tpu.memory_space<vmem>>, vector<32x32xf32>
    %c224 = arith.constant 224 : index
    %c0_224 = arith.constant 0 : index
    %164 = vector.load %arg4[%c224, %c0_224] : memref<248x128xf32, #tpu.memory_space<vmem>>, vector<8x128xf32>
    %165 = vector.extract_strided_slice %164 {offsets = [0, 0], sizes = [1, 32], strides = [1, 1]} : vector<8x128xf32> to vector<1x32xf32>
    %166 = vector.extract_strided_slice %164 {offsets = [1, 0], sizes = [1, 32], strides = [1, 1]} : vector<8x128xf32> to vector<1x32xf32>
    %167 = vector.extract_strided_slice %164 {offsets = [2, 0], sizes = [4, 32], strides = [1, 1]} : vector<8x128xf32> to vector<4x32xf32>
    %c232 = arith.constant 232 : index
    %c0_225 = arith.constant 0 : index
    %168 = vector.load %arg4[%c232, %c0_225] : memref<248x128xf32, #tpu.memory_space<vmem>>, vector<16x128xf32>
    %169 = vector.extract_strided_slice %168 {offsets = [0, 0], sizes = [16, 16], strides = [1, 1]} : vector<16x128xf32> to vector<16x16xf32>
    %170 = vector.extract_strided_slice %168 {offsets = [0, 16], sizes = [16, 32], strides = [1, 1]} : vector<16x128xf32> to vector<16x32xf32>
    %c0_226 = arith.constant 0 : index
    %c0_227 = arith.constant 0 : index
    %171 = vector.load %arg4[%c0_226, %c0_227] : memref<248x128xf32, #tpu.memory_space<vmem>>, vector<64x128xf32>
    %c64 = arith.constant 64 : index
    %c0_228 = arith.constant 0 : index
    %172 = vector.load %arg4[%c64, %c0_228] : memref<248x128xf32, #tpu.memory_space<vmem>>, vector<32x128xf32>
    %c96 = arith.constant 96 : index
    %c0_229 = arith.constant 0 : index
    %173 = vector.load %arg4[%c96, %c0_229] : memref<248x128xf32, #tpu.memory_space<vmem>>, vector<12x128xf32>
    %174 = vector.extract_strided_slice %171 {offsets = [0, 0], sizes = [32, 96], strides = [1, 1]} : vector<64x128xf32> to vector<32x96xf32>
    %175 = vector.extract_strided_slice %171 {offsets = [32, 0], sizes = [32, 96], strides = [1, 1]} : vector<64x128xf32> to vector<32x96xf32>
    %176 = vector.extract_strided_slice %171 {offsets = [0, 96], sizes = [64, 32], strides = [1, 1]} : vector<64x128xf32> to vector<64x32xf32>
    %177 = vector.extract_strided_slice %172 {offsets = [0, 0], sizes = [32, 32], strides = [1, 1]} : vector<32x128xf32> to vector<32x32xf32>
    %178 = vector.extract_strided_slice %172 {offsets = [0, 32], sizes = [32, 32], strides = [1, 1]} : vector<32x128xf32> to vector<32x32xf32>
    %179 = vector.extract_strided_slice %172 {offsets = [0, 64], sizes = [32, 64], strides = [1, 1]} : vector<32x128xf32> to vector<32x64xf32>
    %180 = vector.extract_strided_slice %173 {offsets = [0, 0], sizes = [1, 96], strides = [1, 1]} : vector<12x128xf32> to vector<1x96xf32>
    %181 = vector.extract_strided_slice %173 {offsets = [1, 0], sizes = [1, 32], strides = [1, 1]} : vector<12x128xf32> to vector<1x32xf32>
    %182 = vector.extract_strided_slice %173 {offsets = [2, 0], sizes = [1, 96], strides = [1, 1]} : vector<12x128xf32> to vector<1x96xf32>
    %183 = vector.extract_strided_slice %173 {offsets = [3, 0], sizes = [1, 32], strides = [1, 1]} : vector<12x128xf32> to vector<1x32xf32>
    %184 = vector.extract_strided_slice %173 {offsets = [4, 0], sizes = [1, 64], strides = [1, 1]} : vector<12x128xf32> to vector<1x64xf32>
    %185 = vector.extract_strided_slice %173 {offsets = [5, 0], sizes = [1, 32], strides = [1, 1]} : vector<12x128xf32> to vector<1x32xf32>
    %186 = vector.extract_strided_slice %173 {offsets = [6, 0], sizes = [1, 32], strides = [1, 1]} : vector<12x128xf32> to vector<1x32xf32>
    %187 = vector.extract_strided_slice %173 {offsets = [7, 0], sizes = [1, 32], strides = [1, 1]} : vector<12x128xf32> to vector<1x32xf32>
    %188 = vector.extract_strided_slice %173 {offsets = [8, 0], sizes = [1, 32], strides = [1, 1]} : vector<12x128xf32> to vector<1x32xf32>
    %189 = vector.extract_strided_slice %173 {offsets = [9, 0], sizes = [1, 32], strides = [1, 1]} : vector<12x128xf32> to vector<1x32xf32>
    %190 = vector.extract_strided_slice %173 {offsets = [10, 0], sizes = [1, 32], strides = [1, 1]} : vector<12x128xf32> to vector<1x32xf32>
    %191 = vector.extract_strided_slice %173 {offsets = [11, 0], sizes = [1, 32], strides = [1, 1]} : vector<12x128xf32> to vector<1x32xf32>
    %192 = arith.addf %160, %161 : vector<16x32xf32>
    %193 = vector.extract_strided_slice %174 {offsets = [0, 0], sizes = [32, 64], strides = [1, 1]} : vector<32x96xf32> to vector<32x64xf32>
    %cst = arith.constant dense<0.000000e+00> : vector<16x64xf32>
    %194 = tpu.matmul %192, %193, %cst {dimension_numbers = #tpu.dot_dimension_numbers<[1], [0], [0], [1], [0, 0, 1, 1], [], []>} : vector<16x32xf32>, vector<32x64xf32>, vector<16x64xf32> -> vector<16x64xf32>
    %195 = vector.extract_strided_slice %180 {offsets = [0, 0], sizes = [1, 64], strides = [1, 1]} : vector<1x96xf32> to vector<1x64xf32>
    %196 = vector.broadcast %195 : vector<1x64xf32> to vector<16x64xf32>
    %197 = arith.addf %194, %196 : vector<16x64xf32>
    %198 = vector.extract_strided_slice %174 {offsets = [0, 64], sizes = [32, 32], strides = [1, 1]} : vector<32x96xf32> to vector<32x32xf32>
    %cst_230 = arith.constant dense<0.000000e+00> : vector<16x32xf32>
    %199 = tpu.matmul %160, %198, %cst_230 {dimension_numbers = #tpu.dot_dimension_numbers<[1], [0], [0], [1], [0, 0, 1, 1], [], []>} : vector<16x32xf32>, vector<32x32xf32>, vector<16x32xf32> -> vector<16x32xf32>
    %200 = vector.extract_strided_slice %180 {offsets = [0, 64], sizes = [1, 32], strides = [1, 1]} : vector<1x96xf32> to vector<1x32xf32>
    %201 = vector.broadcast %200 : vector<1x32xf32> to vector<16x32xf32>
    %202 = arith.addf %199, %201 : vector<16x32xf32>
    %203 = vector.extract_strided_slice %197 {offsets = [0, 0], sizes = [16, 32], strides = [1, 1]} : vector<16x64xf32> to vector<16x32xf32>
    %204 = vector.extract_strided_slice %197 {offsets = [0, 32], sizes = [16, 32], strides = [1, 1]} : vector<16x64xf32> to vector<16x32xf32>
    %205 = vector.extract_strided_slice %167 {offsets = [0, 0], sizes = [1, 32], strides = [1, 1]} : vector<4x32xf32> to vector<1x32xf32>
    %206 = vector.broadcast %205 : vector<1x32xf32> to vector<16x32xf32>
    %207 = arith.mulf %203, %206 : vector<16x32xf32>
    "tpu.trace_start"() <{level = 10 : i32, message = "qd,kd->qk"}> : () -> ()
    %cst_231 = arith.constant dense<0.000000e+00> : vector<16x16xf32>
    %208 = tpu.matmul %207, %204, %cst_231 {dimension_numbers = #tpu.dot_dimension_numbers<[1], [1], [0], [0], [0, 0, 1, 0], [], []>} : vector<16x32xf32>, vector<16x32xf32>, vector<16x16xf32> -> vector<16x16xf32>
    "tpu.trace_stop"() : () -> ()
    %209 = arith.addf %208, %169 : vector<16x16xf32>
    %cst_232 = arith.constant dense<0xFF800000> : vector<16xf32>
    %210 = vector.multi_reduction <maximumf>, %209, %cst_232 [1] : vector<16x16xf32> to vector<16xf32>
    %211 = vector.shape_cast %210 : vector<16xf32> to vector<16x1xf32>
    %212 = vector.broadcast %211 : vector<16x1xf32> to vector<16x16xf32>
    %213 = arith.subf %209, %212 : vector<16x16xf32>
    %214 = math.exp %213 : vector<16x16xf32>
    %cst_233 = arith.constant dense<0.000000e+00> : vector<16xf32>
    %215 = vector.multi_reduction <add>, %214, %cst_233 [1] : vector<16x16xf32> to vector<16xf32>
    %216 = vector.shape_cast %215 : vector<16xf32> to vector<16x1xf32>
    %217 = tpu.reciprocal %216 : vector<16x1xf32> -> vector<16x1xf32>
    %218 = vector.broadcast %217 : vector<16x1xf32> to vector<16x16xf32>
    %219 = arith.mulf %214, %218 : vector<16x16xf32>
    %220 = vector.broadcast %205 : vector<1x32xf32> to vector<16x32xf32>
    %221 = arith.mulf %202, %220 : vector<16x32xf32>
    %cst_234 = arith.constant dense<0.000000e+00> : vector<16x32xf32>
    %222 = tpu.matmul %219, %221, %cst_234 {dimension_numbers = #tpu.dot_dimension_numbers<[1], [0], [0], [1], [0, 0, 1, 1], [], []>} : vector<16x16xf32>, vector<16x32xf32>, vector<16x32xf32> -> vector<16x32xf32>
    %223 = vector.extract_strided_slice %167 {offsets = [1, 0], sizes = [1, 32], strides = [1, 1]} : vector<4x32xf32> to vector<1x32xf32>
    %224 = vector.broadcast %223 : vector<1x32xf32> to vector<16x32xf32>
    %225 = arith.mulf %203, %224 : vector<16x32xf32>
    "tpu.trace_start"() <{level = 10 : i32, message = "qd,kd->qk"}> : () -> ()
    %cst_235 = arith.constant dense<0.000000e+00> : vector<16x16xf32>
    %226 = tpu.matmul %225, %204, %cst_235 {dimension_numbers = #tpu.dot_dimension_numbers<[1], [1], [0], [0], [0, 0, 1, 0], [], []>} : vector<16x32xf32>, vector<16x32xf32>, vector<16x16xf32> -> vector<16x16xf32>
    "tpu.trace_stop"() : () -> ()
    %227 = arith.addf %226, %169 : vector<16x16xf32>
    %cst_236 = arith.constant dense<0xFF800000> : vector<16xf32>
    %228 = vector.multi_reduction <maximumf>, %227, %cst_236 [1] : vector<16x16xf32> to vector<16xf32>
    %229 = vector.shape_cast %228 : vector<16xf32> to vector<16x1xf32>
    %230 = vector.broadcast %229 : vector<16x1xf32> to vector<16x16xf32>
    %231 = arith.subf %227, %230 : vector<16x16xf32>
    %232 = math.exp %231 : vector<16x16xf32>
    %cst_237 = arith.constant dense<0.000000e+00> : vector<16xf32>
    %233 = vector.multi_reduction <add>, %232, %cst_237 [1] : vector<16x16xf32> to vector<16xf32>
    %234 = vector.shape_cast %233 : vector<16xf32> to vector<16x1xf32>
    %235 = tpu.reciprocal %234 : vector<16x1xf32> -> vector<16x1xf32>
    %236 = vector.broadcast %235 : vector<16x1xf32> to vector<16x16xf32>
    %237 = arith.mulf %232, %236 : vector<16x16xf32>
    %238 = vector.broadcast %223 : vector<1x32xf32> to vector<16x32xf32>
    %239 = arith.mulf %202, %238 : vector<16x32xf32>
    %cst_238 = arith.constant dense<0.000000e+00> : vector<16x32xf32>
    %240 = tpu.matmul %237, %239, %cst_238 {dimension_numbers = #tpu.dot_dimension_numbers<[1], [0], [0], [1], [0, 0, 1, 1], [], []>} : vector<16x16xf32>, vector<16x32xf32>, vector<16x32xf32> -> vector<16x32xf32>
    %241 = arith.addf %222, %240 : vector<16x32xf32>
    %242 = vector.extract_strided_slice %167 {offsets = [2, 0], sizes = [1, 32], strides = [1, 1]} : vector<4x32xf32> to vector<1x32xf32>
    %243 = vector.broadcast %242 : vector<1x32xf32> to vector<16x32xf32>
    %244 = arith.mulf %203, %243 : vector<16x32xf32>
    "tpu.trace_start"() <{level = 10 : i32, message = "qd,kd->qk"}> : () -> ()
    %cst_239 = arith.constant dense<0.000000e+00> : vector<16x16xf32>
    %245 = tpu.matmul %244, %204, %cst_239 {dimension_numbers = #tpu.dot_dimension_numbers<[1], [1], [0], [0], [0, 0, 1, 0], [], []>} : vector<16x32xf32>, vector<16x32xf32>, vector<16x16xf32> -> vector<16x16xf32>
    "tpu.trace_stop"() : () -> ()
    %246 = arith.addf %245, %169 : vector<16x16xf32>
    %cst_240 = arith.constant dense<0xFF800000> : vector<16xf32>
    %247 = vector.multi_reduction <maximumf>, %246, %cst_240 [1] : vector<16x16xf32> to vector<16xf32>
    %248 = vector.shape_cast %247 : vector<16xf32> to vector<16x1xf32>
    %249 = vector.broadcast %248 : vector<16x1xf32> to vector<16x16xf32>
    %250 = arith.subf %246, %249 : vector<16x16xf32>
    %251 = math.exp %250 : vector<16x16xf32>
    %cst_241 = arith.constant dense<0.000000e+00> : vector<16xf32>
    %252 = vector.multi_reduction <add>, %251, %cst_241 [1] : vector<16x16xf32> to vector<16xf32>
    %253 = vector.shape_cast %252 : vector<16xf32> to vector<16x1xf32>
    %254 = tpu.reciprocal %253 : vector<16x1xf32> -> vector<16x1xf32>
    %255 = vector.broadcast %254 : vector<16x1xf32> to vector<16x16xf32>
    %256 = arith.mulf %251, %255 : vector<16x16xf32>
    %257 = vector.broadcast %242 : vector<1x32xf32> to vector<16x32xf32>
    %258 = arith.mulf %202, %257 : vector<16x32xf32>
    %cst_242 = arith.constant dense<0.000000e+00> : vector<16x32xf32>
    %259 = tpu.matmul %256, %258, %cst_242 {dimension_numbers = #tpu.dot_dimension_numbers<[1], [0], [0], [1], [0, 0, 1, 1], [], []>} : vector<16x16xf32>, vector<16x32xf32>, vector<16x32xf32> -> vector<16x32xf32>
    %260 = arith.addf %241, %259 : vector<16x32xf32>
    %261 = vector.extract_strided_slice %167 {offsets = [3, 0], sizes = [1, 32], strides = [1, 1]} : vector<4x32xf32> to vector<1x32xf32>
    %262 = vector.broadcast %261 : vector<1x32xf32> to vector<16x32xf32>
    %263 = arith.mulf %203, %262 : vector<16x32xf32>
    "tpu.trace_start"() <{level = 10 : i32, message = "qd,kd->qk"}> : () -> ()
    %cst_243 = arith.constant dense<0.000000e+00> : vector<16x16xf32>
    %264 = tpu.matmul %263, %204, %cst_243 {dimension_numbers = #tpu.dot_dimension_numbers<[1], [1], [0], [0], [0, 0, 1, 0], [], []>} : vector<16x32xf32>, vector<16x32xf32>, vector<16x16xf32> -> vector<16x16xf32>
    "tpu.trace_stop"() : () -> ()
    %265 = arith.addf %264, %169 : vector<16x16xf32>
    %cst_244 = arith.constant dense<0xFF800000> : vector<16xf32>
    %266 = vector.multi_reduction <maximumf>, %265, %cst_244 [1] : vector<16x16xf32> to vector<16xf32>
    %267 = vector.shape_cast %266 : vector<16xf32> to vector<16x1xf32>
    %268 = vector.broadcast %267 : vector<16x1xf32> to vector<16x16xf32>
    %269 = arith.subf %265, %268 : vector<16x16xf32>
    %270 = math.exp %269 : vector<16x16xf32>
    %cst_245 = arith.constant dense<0.000000e+00> : vector<16xf32>
    %271 = vector.multi_reduction <add>, %270, %cst_245 [1] : vector<16x16xf32> to vector<16xf32>
    %272 = vector.shape_cast %271 : vector<16xf32> to vector<16x1xf32>
    %273 = tpu.reciprocal %272 : vector<16x1xf32> -> vector<16x1xf32>
    %274 = vector.broadcast %273 : vector<16x1xf32> to vector<16x16xf32>
    %275 = arith.mulf %270, %274 : vector<16x16xf32>
    %276 = vector.broadcast %261 : vector<1x32xf32> to vector<16x32xf32>
    %277 = arith.mulf %202, %276 : vector<16x32xf32>
    %cst_246 = arith.constant dense<0.000000e+00> : vector<16x32xf32>
    %278 = tpu.matmul %275, %277, %cst_246 {dimension_numbers = #tpu.dot_dimension_numbers<[1], [0], [0], [1], [0, 0, 1, 1], [], []>} : vector<16x16xf32>, vector<16x32xf32>, vector<16x32xf32> -> vector<16x32xf32>
    %279 = arith.addf %260, %278 : vector<16x32xf32>
    %cst_247 = arith.constant dense<0.000000e+00> : vector<16x32xf32>
    %280 = tpu.matmul %279, %177, %cst_247 {dimension_numbers = #tpu.dot_dimension_numbers<[1], [0], [0], [1], [0, 0, 1, 1], [], []>} : vector<16x32xf32>, vector<32x32xf32>, vector<16x32xf32> -> vector<16x32xf32>
    %281 = vector.broadcast %181 : vector<1x32xf32> to vector<16x32xf32>
    %282 = arith.addf %280, %281 : vector<16x32xf32>
    %283 = arith.addf %160, %282 : vector<16x32xf32>
    %cst_248 = arith.constant dense<0.000000e+00> : vector<16xf32>
    %284 = vector.multi_reduction <add>, %283, %cst_248 [1] : vector<16x32xf32> to vector<16xf32>
    %285 = vector.shape_cast %284 : vector<16xf32> to vector<16x1xf32>
    %cst_249 = arith.constant 3.200000e+01 : f32
    %286 = vector.broadcast %cst_249 : f32 to vector<16x1xf32>
    %287 = arith.divf %285, %286 : vector<16x1xf32>
    %288 = vector.broadcast %287 : vector<16x1xf32> to vector<16x32xf32>
    %289 = arith.subf %283, %288 : vector<16x32xf32>
    %290 = arith.mulf %289, %289 : vector<16x32xf32>
    %cst_250 = arith.constant dense<0.000000e+00> : vector<16xf32>
    %291 = vector.multi_reduction <add>, %290, %cst_250 [1] : vector<16x32xf32> to vector<16xf32>
    %292 = vector.shape_cast %291 : vector<16xf32> to vector<16x1xf32>
    %cst_251 = arith.constant 3.200000e+01 : f32
    %293 = vector.broadcast %cst_251 : f32 to vector<16x1xf32>
    %294 = arith.divf %292, %293 : vector<16x1xf32>
    %295 = vector.broadcast %287 : vector<16x1xf32> to vector<16x32xf32>
    %296 = arith.subf %283, %295 : vector<16x32xf32>
    %cst_252 = arith.constant 9.99999974E-6 : f32
    %297 = vector.broadcast %cst_252 : f32 to vector<16x1xf32>
    %298 = arith.addf %294, %297 : vector<16x1xf32>
    %299 = math.rsqrt %298 : vector<16x1xf32>
    %300 = vector.broadcast %299 : vector<16x1xf32> to vector<16x32xf32>
    %301 = arith.mulf %296, %300 : vector<16x32xf32>
    %302 = vector.broadcast %186 : vector<1x32xf32> to vector<16x32xf32>
    %303 = arith.mulf %301, %302 : vector<16x32xf32>
    %304 = vector.broadcast %187 : vector<1x32xf32> to vector<16x32xf32>
    %305 = arith.addf %303, %304 : vector<16x32xf32>
    %306 = arith.addf %305, %161 : vector<16x32xf32>
    %307 = vector.extract_strided_slice %175 {offsets = [0, 0], sizes = [32, 32], strides = [1, 1]} : vector<32x96xf32> to vector<32x32xf32>
    %cst_253 = arith.constant dense<0.000000e+00> : vector<16x32xf32>
    %308 = tpu.matmul %306, %307, %cst_253 {dimension_numbers = #tpu.dot_dimension_numbers<[1], [0], [0], [1], [0, 0, 1, 1], [], []>} : vector<16x32xf32>, vector<32x32xf32>, vector<16x32xf32> -> vector<16x32xf32>
    %309 = vector.extract_strided_slice %182 {offsets = [0, 0], sizes = [1, 32], strides = [1, 1]} : vector<1x96xf32> to vector<1x32xf32>
    %310 = vector.broadcast %309 : vector<1x32xf32> to vector<16x32xf32>
    %311 = arith.addf %308, %310 : vector<16x32xf32>
    %312 = vector.extract_strided_slice %175 {offsets = [0, 32], sizes = [32, 32], strides = [1, 1]} : vector<32x96xf32> to vector<32x32xf32>
    %cst_254 = arith.constant dense<0.000000e+00> : vector<32x32xf32>
    %313 = tpu.matmul %163, %312, %cst_254 {dimension_numbers = #tpu.dot_dimension_numbers<[1], [0], [0], [1], [0, 0, 1, 1], [], []>} : vector<32x32xf32>, vector<32x32xf32>, vector<32x32xf32> -> vector<32x32xf32>
    %314 = vector.extract_strided_slice %182 {offsets = [0, 32], sizes = [1, 32], strides = [1, 1]} : vector<1x96xf32> to vector<1x32xf32>
    %315 = vector.broadcast %314 : vector<1x32xf32> to vector<32x32xf32>
    %316 = arith.addf %313, %315 : vector<32x32xf32>
    %317 = vector.extract_strided_slice %175 {offsets = [0, 64], sizes = [32, 32], strides = [1, 1]} : vector<32x96xf32> to vector<32x32xf32>
    %cst_255 = arith.constant dense<0.000000e+00> : vector<32x32xf32>
    %318 = tpu.matmul %162, %317, %cst_255 {dimension_numbers = #tpu.dot_dimension_numbers<[1], [0], [0], [1], [0, 0, 1, 1], [], []>} : vector<32x32xf32>, vector<32x32xf32>, vector<32x32xf32> -> vector<32x32xf32>
    %319 = vector.extract_strided_slice %182 {offsets = [0, 64], sizes = [1, 32], strides = [1, 1]} : vector<1x96xf32> to vector<1x32xf32>
    %320 = vector.broadcast %319 : vector<1x32xf32> to vector<32x32xf32>
    %321 = arith.addf %318, %320 : vector<32x32xf32>
    %322 = vector.extract_strided_slice %167 {offsets = [0, 0], sizes = [1, 32], strides = [1, 1]} : vector<4x32xf32> to vector<1x32xf32>
    %323 = vector.broadcast %322 : vector<1x32xf32> to vector<16x32xf32>
    %324 = arith.mulf %311, %323 : vector<16x32xf32>
    "tpu.trace_start"() <{level = 10 : i32, message = "qd,kd->qk"}> : () -> ()
    %cst_256 = arith.constant dense<0.000000e+00> : vector<16x32xf32>
    %325 = tpu.matmul %324, %316, %cst_256 {dimension_numbers = #tpu.dot_dimension_numbers<[1], [1], [0], [0], [0, 0, 1, 0], [], []>} : vector<16x32xf32>, vector<32x32xf32>, vector<16x32xf32> -> vector<16x32xf32>
    "tpu.trace_stop"() : () -> ()
    %326 = arith.addf %325, %170 : vector<16x32xf32>
    %cst_257 = arith.constant dense<0xFF800000> : vector<16xf32>
    %327 = vector.multi_reduction <maximumf>, %326, %cst_257 [1] : vector<16x32xf32> to vector<16xf32>
    %328 = vector.shape_cast %327 : vector<16xf32> to vector<16x1xf32>
    %329 = vector.broadcast %328 : vector<16x1xf32> to vector<16x32xf32>
    %330 = arith.subf %326, %329 : vector<16x32xf32>
    %331 = math.exp %330 : vector<16x32xf32>
    %cst_258 = arith.constant dense<0.000000e+00> : vector<16xf32>
    %332 = vector.multi_reduction <add>, %331, %cst_258 [1] : vector<16x32xf32> to vector<16xf32>
    %333 = vector.shape_cast %332 : vector<16xf32> to vector<16x1xf32>
    %334 = tpu.reciprocal %333 : vector<16x1xf32> -> vector<16x1xf32>
    %335 = vector.broadcast %334 : vector<16x1xf32> to vector<16x32xf32>
    %336 = arith.mulf %331, %335 : vector<16x32xf32>
    %337 = vector.broadcast %322 : vector<1x32xf32> to vector<32x32xf32>
    %338 = arith.mulf %321, %337 : vector<32x32xf32>
    %cst_259 = arith.constant dense<0.000000e+00> : vector<16x32xf32>
    %339 = tpu.matmul %336, %338, %cst_259 {dimension_numbers = #tpu.dot_dimension_numbers<[1], [0], [0], [1], [0, 0, 1, 1], [], []>} : vector<16x32xf32>, vector<32x32xf32>, vector<16x32xf32> -> vector<16x32xf32>
    %340 = vector.extract_strided_slice %167 {offsets = [1, 0], sizes = [1, 32], strides = [1, 1]} : vector<4x32xf32> to vector<1x32xf32>
    %341 = vector.broadcast %340 : vector<1x32xf32> to vector<16x32xf32>
    %342 = arith.mulf %311, %341 : vector<16x32xf32>
    "tpu.trace_start"() <{level = 10 : i32, message = "qd,kd->qk"}> : () -> ()
    %cst_260 = arith.constant dense<0.000000e+00> : vector<16x32xf32>
    %343 = tpu.matmul %342, %316, %cst_260 {dimension_numbers = #tpu.dot_dimension_numbers<[1], [1], [0], [0], [0, 0, 1, 0], [], []>} : vector<16x32xf32>, vector<32x32xf32>, vector<16x32xf32> -> vector<16x32xf32>
    "tpu.trace_stop"() : () -> ()
    %344 = arith.addf %343, %170 : vector<16x32xf32>
    %cst_261 = arith.constant dense<0xFF800000> : vector<16xf32>
    %345 = vector.multi_reduction <maximumf>, %344, %cst_261 [1] : vector<16x32xf32> to vector<16xf32>
    %346 = vector.shape_cast %345 : vector<16xf32> to vector<16x1xf32>
    %347 = vector.broadcast %346 : vector<16x1xf32> to vector<16x32xf32>
    %348 = arith.subf %344, %347 : vector<16x32xf32>
    %349 = math.exp %348 : vector<16x32xf32>
    %cst_262 = arith.constant dense<0.000000e+00> : vector<16xf32>
    %350 = vector.multi_reduction <add>, %349, %cst_262 [1] : vector<16x32xf32> to vector<16xf32>
    %351 = vector.shape_cast %350 : vector<16xf32> to vector<16x1xf32>
    %352 = tpu.reciprocal %351 : vector<16x1xf32> -> vector<16x1xf32>
    %353 = vector.broadcast %352 : vector<16x1xf32> to vector<16x32xf32>
    %354 = arith.mulf %349, %353 : vector<16x32xf32>
    %355 = vector.broadcast %340 : vector<1x32xf32> to vector<32x32xf32>
    %356 = arith.mulf %321, %355 : vector<32x32xf32>
    %cst_263 = arith.constant dense<0.000000e+00> : vector<16x32xf32>
    %357 = tpu.matmul %354, %356, %cst_263 {dimension_numbers = #tpu.dot_dimension_numbers<[1], [0], [0], [1], [0, 0, 1, 1], [], []>} : vector<16x32xf32>, vector<32x32xf32>, vector<16x32xf32> -> vector<16x32xf32>
    %358 = arith.addf %339, %357 : vector<16x32xf32>
    %359 = vector.extract_strided_slice %167 {offsets = [2, 0], sizes = [1, 32], strides = [1, 1]} : vector<4x32xf32> to vector<1x32xf32>
    %360 = vector.broadcast %359 : vector<1x32xf32> to vector<16x32xf32>
    %361 = arith.mulf %311, %360 : vector<16x32xf32>
    "tpu.trace_start"() <{level = 10 : i32, message = "qd,kd->qk"}> : () -> ()
    %cst_264 = arith.constant dense<0.000000e+00> : vector<16x32xf32>
    %362 = tpu.matmul %361, %316, %cst_264 {dimension_numbers = #tpu.dot_dimension_numbers<[1], [1], [0], [0], [0, 0, 1, 0], [], []>} : vector<16x32xf32>, vector<32x32xf32>, vector<16x32xf32> -> vector<16x32xf32>
    "tpu.trace_stop"() : () -> ()
    %363 = arith.addf %362, %170 : vector<16x32xf32>
    %cst_265 = arith.constant dense<0xFF800000> : vector<16xf32>
    %364 = vector.multi_reduction <maximumf>, %363, %cst_265 [1] : vector<16x32xf32> to vector<16xf32>
    %365 = vector.shape_cast %364 : vector<16xf32> to vector<16x1xf32>
    %366 = vector.broadcast %365 : vector<16x1xf32> to vector<16x32xf32>
    %367 = arith.subf %363, %366 : vector<16x32xf32>
    %368 = math.exp %367 : vector<16x32xf32>
    %cst_266 = arith.constant dense<0.000000e+00> : vector<16xf32>
    %369 = vector.multi_reduction <add>, %368, %cst_266 [1] : vector<16x32xf32> to vector<16xf32>
    %370 = vector.shape_cast %369 : vector<16xf32> to vector<16x1xf32>
    %371 = tpu.reciprocal %370 : vector<16x1xf32> -> vector<16x1xf32>
    %372 = vector.broadcast %371 : vector<16x1xf32> to vector<16x32xf32>
    %373 = arith.mulf %368, %372 : vector<16x32xf32>
    %374 = vector.broadcast %359 : vector<1x32xf32> to vector<32x32xf32>
    %375 = arith.mulf %321, %374 : vector<32x32xf32>
    %cst_267 = arith.constant dense<0.000000e+00> : vector<16x32xf32>
    %376 = tpu.matmul %373, %375, %cst_267 {dimension_numbers = #tpu.dot_dimension_numbers<[1], [0], [0], [1], [0, 0, 1, 1], [], []>} : vector<16x32xf32>, vector<32x32xf32>, vector<16x32xf32> -> vector<16x32xf32>
    %377 = arith.addf %358, %376 : vector<16x32xf32>
    %378 = vector.extract_strided_slice %167 {offsets = [3, 0], sizes = [1, 32], strides = [1, 1]} : vector<4x32xf32> to vector<1x32xf32>
    %379 = vector.broadcast %378 : vector<1x32xf32> to vector<16x32xf32>
    %380 = arith.mulf %311, %379 : vector<16x32xf32>
    "tpu.trace_start"() <{level = 10 : i32, message = "qd,kd->qk"}> : () -> ()
    %cst_268 = arith.constant dense<0.000000e+00> : vector<16x32xf32>
    %381 = tpu.matmul %380, %316, %cst_268 {dimension_numbers = #tpu.dot_dimension_numbers<[1], [1], [0], [0], [0, 0, 1, 0], [], []>} : vector<16x32xf32>, vector<32x32xf32>, vector<16x32xf32> -> vector<16x32xf32>
    "tpu.trace_stop"() : () -> ()
    %382 = arith.addf %381, %170 : vector<16x32xf32>
    %cst_269 = arith.constant dense<0xFF800000> : vector<16xf32>
    %383 = vector.multi_reduction <maximumf>, %382, %cst_269 [1] : vector<16x32xf32> to vector<16xf32>
    %384 = vector.shape_cast %383 : vector<16xf32> to vector<16x1xf32>
    %385 = vector.broadcast %384 : vector<16x1xf32> to vector<16x32xf32>
    %386 = arith.subf %382, %385 : vector<16x32xf32>
    %387 = math.exp %386 : vector<16x32xf32>
    %cst_270 = arith.constant dense<0.000000e+00> : vector<16xf32>
    %388 = vector.multi_reduction <add>, %387, %cst_270 [1] : vector<16x32xf32> to vector<16xf32>
    %389 = vector.shape_cast %388 : vector<16xf32> to vector<16x1xf32>
    %390 = tpu.reciprocal %389 : vector<16x1xf32> -> vector<16x1xf32>
    %391 = vector.broadcast %390 : vector<16x1xf32> to vector<16x32xf32>
    %392 = arith.mulf %387, %391 : vector<16x32xf32>
    %393 = vector.broadcast %378 : vector<1x32xf32> to vector<32x32xf32>
    %394 = arith.mulf %321, %393 : vector<32x32xf32>
    %cst_271 = arith.constant dense<0.000000e+00> : vector<16x32xf32>
    %395 = tpu.matmul %392, %394, %cst_271 {dimension_numbers = #tpu.dot_dimension_numbers<[1], [0], [0], [1], [0, 0, 1, 1], [], []>} : vector<16x32xf32>, vector<32x32xf32>, vector<16x32xf32> -> vector<16x32xf32>
    %396 = arith.addf %377, %395 : vector<16x32xf32>
    %cst_272 = arith.constant dense<0.000000e+00> : vector<16x32xf32>
    %397 = tpu.matmul %396, %178, %cst_272 {dimension_numbers = #tpu.dot_dimension_numbers<[1], [0], [0], [1], [0, 0, 1, 1], [], []>} : vector<16x32xf32>, vector<32x32xf32>, vector<16x32xf32> -> vector<16x32xf32>
    %398 = vector.broadcast %183 : vector<1x32xf32> to vector<16x32xf32>
    %399 = arith.addf %397, %398 : vector<16x32xf32>
    %400 = arith.addf %305, %399 : vector<16x32xf32>
    %cst_273 = arith.constant dense<0.000000e+00> : vector<16xf32>
    %401 = vector.multi_reduction <add>, %400, %cst_273 [1] : vector<16x32xf32> to vector<16xf32>
    %402 = vector.shape_cast %401 : vector<16xf32> to vector<16x1xf32>
    %cst_274 = arith.constant 3.200000e+01 : f32
    %403 = vector.broadcast %cst_274 : f32 to vector<16x1xf32>
    %404 = arith.divf %402, %403 : vector<16x1xf32>
    %405 = vector.broadcast %404 : vector<16x1xf32> to vector<16x32xf32>
    %406 = arith.subf %400, %405 : vector<16x32xf32>
    %407 = arith.mulf %406, %406 : vector<16x32xf32>
    %cst_275 = arith.constant dense<0.000000e+00> : vector<16xf32>
    %408 = vector.multi_reduction <add>, %407, %cst_275 [1] : vector<16x32xf32> to vector<16xf32>
    %409 = vector.shape_cast %408 : vector<16xf32> to vector<16x1xf32>
    %cst_276 = arith.constant 3.200000e+01 : f32
    %410 = vector.broadcast %cst_276 : f32 to vector<16x1xf32>
    %411 = arith.divf %409, %410 : vector<16x1xf32>
    %412 = vector.broadcast %404 : vector<16x1xf32> to vector<16x32xf32>
    %413 = arith.subf %400, %412 : vector<16x32xf32>
    %cst_277 = arith.constant 9.99999974E-6 : f32
    %414 = vector.broadcast %cst_277 : f32 to vector<16x1xf32>
    %415 = arith.addf %411, %414 : vector<16x1xf32>
    %416 = math.rsqrt %415 : vector<16x1xf32>
    %417 = vector.broadcast %416 : vector<16x1xf32> to vector<16x32xf32>
    %418 = arith.mulf %413, %417 : vector<16x32xf32>
    %419 = vector.broadcast %188 : vector<1x32xf32> to vector<16x32xf32>
    %420 = arith.mulf %418, %419 : vector<16x32xf32>
    %421 = vector.broadcast %189 : vector<1x32xf32> to vector<16x32xf32>
    %422 = arith.addf %420, %421 : vector<16x32xf32>
    %cst_278 = arith.constant dense<0.000000e+00> : vector<16x64xf32>
    %423 = tpu.matmul %422, %179, %cst_278 {dimension_numbers = #tpu.dot_dimension_numbers<[1], [0], [0], [1], [0, 0, 1, 1], [], []>} : vector<16x32xf32>, vector<32x64xf32>, vector<16x64xf32> -> vector<16x64xf32>
    %424 = vector.broadcast %184 : vector<1x64xf32> to vector<16x64xf32>
    %425 = arith.addf %423, %424 : vector<16x64xf32>
    %cst_279 = arith.constant 0.000000e+00 : f32
    %426 = vector.broadcast %cst_279 : f32 to vector<16x64xf32>
    %427 = arith.maximumf %425, %426 : vector<16x64xf32>
    %cst_280 = arith.constant dense<0.000000e+00> : vector<16x32xf32>
    %428 = tpu.matmul %427, %176, %cst_280 {dimension_numbers = #tpu.dot_dimension_numbers<[1], [0], [0], [1], [0, 0, 1, 1], [], []>} : vector<16x64xf32>, vector<64x32xf32>, vector<16x32xf32> -> vector<16x32xf32>
    %429 = vector.broadcast %185 : vector<1x32xf32> to vector<16x32xf32>
    %430 = arith.addf %428, %429 : vector<16x32xf32>
    %431 = arith.addf %422, %430 : vector<16x32xf32>
    %cst_281 = arith.constant dense<0.000000e+00> : vector<16xf32>
    %432 = vector.multi_reduction <add>, %431, %cst_281 [1] : vector<16x32xf32> to vector<16xf32>
    %433 = vector.shape_cast %432 : vector<16xf32> to vector<16x1xf32>
    %cst_282 = arith.constant 3.200000e+01 : f32
    %434 = vector.broadcast %cst_282 : f32 to vector<16x1xf32>
    %435 = arith.divf %433, %434 : vector<16x1xf32>
    %436 = vector.broadcast %435 : vector<16x1xf32> to vector<16x32xf32>
    %437 = arith.subf %431, %436 : vector<16x32xf32>
    %438 = arith.mulf %437, %437 : vector<16x32xf32>
    %cst_283 = arith.constant dense<0.000000e+00> : vector<16xf32>
    %439 = vector.multi_reduction <add>, %438, %cst_283 [1] : vector<16x32xf32> to vector<16xf32>
    %440 = vector.shape_cast %439 : vector<16xf32> to vector<16x1xf32>
    %cst_284 = arith.constant 3.200000e+01 : f32
    %441 = vector.broadcast %cst_284 : f32 to vector<16x1xf32>
    %442 = arith.divf %440, %441 : vector<16x1xf32>
    %443 = vector.broadcast %435 : vector<16x1xf32> to vector<16x32xf32>
    %444 = arith.subf %431, %443 : vector<16x32xf32>
    %cst_285 = arith.constant 9.99999974E-6 : f32
    %445 = vector.broadcast %cst_285 : f32 to vector<16x1xf32>
    %446 = arith.addf %442, %445 : vector<16x1xf32>
    %447 = math.rsqrt %446 : vector<16x1xf32>
    %448 = vector.broadcast %447 : vector<16x1xf32> to vector<16x32xf32>
    %449 = arith.mulf %444, %448 : vector<16x32xf32>
    %450 = vector.broadcast %190 : vector<1x32xf32> to vector<16x32xf32>
    %451 = arith.mulf %449, %450 : vector<16x32xf32>
    %452 = vector.broadcast %191 : vector<1x32xf32> to vector<16x32xf32>
    %453 = arith.addf %451, %452 : vector<16x32xf32>
    %c112 = arith.constant 112 : index
    %c0_286 = arith.constant 0 : index
    %454 = vector.load %arg4[%c112, %c0_286] : memref<248x128xf32, #tpu.memory_space<vmem>>, vector<64x128xf32>
    %c176 = arith.constant 176 : index
    %c0_287 = arith.constant 0 : index
    %455 = vector.load %arg4[%c176, %c0_287] : memref<248x128xf32, #tpu.memory_space<vmem>>, vector<32x128xf32>
    %c208 = arith.constant 208 : index
    %c0_288 = arith.constant 0 : index
    %456 = vector.load %arg4[%c208, %c0_288] : memref<248x128xf32, #tpu.memory_space<vmem>>, vector<12x128xf32>
    %457 = vector.extract_strided_slice %454 {offsets = [0, 0], sizes = [32, 96], strides = [1, 1]} : vector<64x128xf32> to vector<32x96xf32>
    %458 = vector.extract_strided_slice %454 {offsets = [32, 0], sizes = [32, 96], strides = [1, 1]} : vector<64x128xf32> to vector<32x96xf32>
    %459 = vector.extract_strided_slice %454 {offsets = [0, 96], sizes = [64, 32], strides = [1, 1]} : vector<64x128xf32> to vector<64x32xf32>
    %460 = vector.extract_strided_slice %455 {offsets = [0, 0], sizes = [32, 32], strides = [1, 1]} : vector<32x128xf32> to vector<32x32xf32>
    %461 = vector.extract_strided_slice %455 {offsets = [0, 32], sizes = [32, 32], strides = [1, 1]} : vector<32x128xf32> to vector<32x32xf32>
    %462 = vector.extract_strided_slice %455 {offsets = [0, 64], sizes = [32, 64], strides = [1, 1]} : vector<32x128xf32> to vector<32x64xf32>
    %463 = vector.extract_strided_slice %456 {offsets = [0, 0], sizes = [1, 96], strides = [1, 1]} : vector<12x128xf32> to vector<1x96xf32>
    %464 = vector.extract_strided_slice %456 {offsets = [1, 0], sizes = [1, 32], strides = [1, 1]} : vector<12x128xf32> to vector<1x32xf32>
    %465 = vector.extract_strided_slice %456 {offsets = [2, 0], sizes = [1, 96], strides = [1, 1]} : vector<12x128xf32> to vector<1x96xf32>
    %466 = vector.extract_strided_slice %456 {offsets = [3, 0], sizes = [1, 32], strides = [1, 1]} : vector<12x128xf32> to vector<1x32xf32>
    %467 = vector.extract_strided_slice %456 {offsets = [4, 0], sizes = [1, 64], strides = [1, 1]} : vector<12x128xf32> to vector<1x64xf32>
    %468 = vector.extract_strided_slice %456 {offsets = [5, 0], sizes = [1, 32], strides = [1, 1]} : vector<12x128xf32> to vector<1x32xf32>
    %469 = vector.extract_strided_slice %456 {offsets = [6, 0], sizes = [1, 32], strides = [1, 1]} : vector<12x128xf32> to vector<1x32xf32>
    %470 = vector.extract_strided_slice %456 {offsets = [7, 0], sizes = [1, 32], strides = [1, 1]} : vector<12x128xf32> to vector<1x32xf32>
    %471 = vector.extract_strided_slice %456 {offsets = [8, 0], sizes = [1, 32], strides = [1, 1]} : vector<12x128xf32> to vector<1x32xf32>
    %472 = vector.extract_strided_slice %456 {offsets = [9, 0], sizes = [1, 32], strides = [1, 1]} : vector<12x128xf32> to vector<1x32xf32>
    %473 = vector.extract_strided_slice %456 {offsets = [10, 0], sizes = [1, 32], strides = [1, 1]} : vector<12x128xf32> to vector<1x32xf32>
    %474 = vector.extract_strided_slice %456 {offsets = [11, 0], sizes = [1, 32], strides = [1, 1]} : vector<12x128xf32> to vector<1x32xf32>
    %475 = arith.addf %453, %161 : vector<16x32xf32>
    %476 = vector.extract_strided_slice %457 {offsets = [0, 0], sizes = [32, 64], strides = [1, 1]} : vector<32x96xf32> to vector<32x64xf32>
    %cst_289 = arith.constant dense<0.000000e+00> : vector<16x64xf32>
    %477 = tpu.matmul %475, %476, %cst_289 {dimension_numbers = #tpu.dot_dimension_numbers<[1], [0], [0], [1], [0, 0, 1, 1], [], []>} : vector<16x32xf32>, vector<32x64xf32>, vector<16x64xf32> -> vector<16x64xf32>
    %478 = vector.extract_strided_slice %463 {offsets = [0, 0], sizes = [1, 64], strides = [1, 1]} : vector<1x96xf32> to vector<1x64xf32>
    %479 = vector.broadcast %478 : vector<1x64xf32> to vector<16x64xf32>
    %480 = arith.addf %477, %479 : vector<16x64xf32>
    %481 = vector.extract_strided_slice %457 {offsets = [0, 64], sizes = [32, 32], strides = [1, 1]} : vector<32x96xf32> to vector<32x32xf32>
    %cst_290 = arith.constant dense<0.000000e+00> : vector<16x32xf32>
    %482 = tpu.matmul %453, %481, %cst_290 {dimension_numbers = #tpu.dot_dimension_numbers<[1], [0], [0], [1], [0, 0, 1, 1], [], []>} : vector<16x32xf32>, vector<32x32xf32>, vector<16x32xf32> -> vector<16x32xf32>
    %483 = vector.extract_strided_slice %463 {offsets = [0, 64], sizes = [1, 32], strides = [1, 1]} : vector<1x96xf32> to vector<1x32xf32>
    %484 = vector.broadcast %483 : vector<1x32xf32> to vector<16x32xf32>
    %485 = arith.addf %482, %484 : vector<16x32xf32>
    %486 = vector.extract_strided_slice %480 {offsets = [0, 0], sizes = [16, 32], strides = [1, 1]} : vector<16x64xf32> to vector<16x32xf32>
    %487 = vector.extract_strided_slice %480 {offsets = [0, 32], sizes = [16, 32], strides = [1, 1]} : vector<16x64xf32> to vector<16x32xf32>
    %488 = vector.extract_strided_slice %167 {offsets = [0, 0], sizes = [1, 32], strides = [1, 1]} : vector<4x32xf32> to vector<1x32xf32>
    %489 = vector.broadcast %488 : vector<1x32xf32> to vector<16x32xf32>
    %490 = arith.mulf %486, %489 : vector<16x32xf32>
    "tpu.trace_start"() <{level = 10 : i32, message = "qd,kd->qk"}> : () -> ()
    %cst_291 = arith.constant dense<0.000000e+00> : vector<16x16xf32>
    %491 = tpu.matmul %490, %487, %cst_291 {dimension_numbers = #tpu.dot_dimension_numbers<[1], [1], [0], [0], [0, 0, 1, 0], [], []>} : vector<16x32xf32>, vector<16x32xf32>, vector<16x16xf32> -> vector<16x16xf32>
    "tpu.trace_stop"() : () -> ()
    %492 = arith.addf %491, %169 : vector<16x16xf32>
    %cst_292 = arith.constant dense<0xFF800000> : vector<16xf32>
    %493 = vector.multi_reduction <maximumf>, %492, %cst_292 [1] : vector<16x16xf32> to vector<16xf32>
    %494 = vector.shape_cast %493 : vector<16xf32> to vector<16x1xf32>
    %495 = vector.broadcast %494 : vector<16x1xf32> to vector<16x16xf32>
    %496 = arith.subf %492, %495 : vector<16x16xf32>
    %497 = math.exp %496 : vector<16x16xf32>
    %cst_293 = arith.constant dense<0.000000e+00> : vector<16xf32>
    %498 = vector.multi_reduction <add>, %497, %cst_293 [1] : vector<16x16xf32> to vector<16xf32>
    %499 = vector.shape_cast %498 : vector<16xf32> to vector<16x1xf32>
    %500 = tpu.reciprocal %499 : vector<16x1xf32> -> vector<16x1xf32>
    %501 = vector.broadcast %500 : vector<16x1xf32> to vector<16x16xf32>
    %502 = arith.mulf %497, %501 : vector<16x16xf32>
    %503 = vector.broadcast %488 : vector<1x32xf32> to vector<16x32xf32>
    %504 = arith.mulf %485, %503 : vector<16x32xf32>
    %cst_294 = arith.constant dense<0.000000e+00> : vector<16x32xf32>
    %505 = tpu.matmul %502, %504, %cst_294 {dimension_numbers = #tpu.dot_dimension_numbers<[1], [0], [0], [1], [0, 0, 1, 1], [], []>} : vector<16x16xf32>, vector<16x32xf32>, vector<16x32xf32> -> vector<16x32xf32>
    %506 = vector.extract_strided_slice %167 {offsets = [1, 0], sizes = [1, 32], strides = [1, 1]} : vector<4x32xf32> to vector<1x32xf32>
    %507 = vector.broadcast %506 : vector<1x32xf32> to vector<16x32xf32>
    %508 = arith.mulf %486, %507 : vector<16x32xf32>
    "tpu.trace_start"() <{level = 10 : i32, message = "qd,kd->qk"}> : () -> ()
    %cst_295 = arith.constant dense<0.000000e+00> : vector<16x16xf32>
    %509 = tpu.matmul %508, %487, %cst_295 {dimension_numbers = #tpu.dot_dimension_numbers<[1], [1], [0], [0], [0, 0, 1, 0], [], []>} : vector<16x32xf32>, vector<16x32xf32>, vector<16x16xf32> -> vector<16x16xf32>
    "tpu.trace_stop"() : () -> ()
    %510 = arith.addf %509, %169 : vector<16x16xf32>
    %cst_296 = arith.constant dense<0xFF800000> : vector<16xf32>
    %511 = vector.multi_reduction <maximumf>, %510, %cst_296 [1] : vector<16x16xf32> to vector<16xf32>
    %512 = vector.shape_cast %511 : vector<16xf32> to vector<16x1xf32>
    %513 = vector.broadcast %512 : vector<16x1xf32> to vector<16x16xf32>
    %514 = arith.subf %510, %513 : vector<16x16xf32>
    %515 = math.exp %514 : vector<16x16xf32>
    %cst_297 = arith.constant dense<0.000000e+00> : vector<16xf32>
    %516 = vector.multi_reduction <add>, %515, %cst_297 [1] : vector<16x16xf32> to vector<16xf32>
    %517 = vector.shape_cast %516 : vector<16xf32> to vector<16x1xf32>
    %518 = tpu.reciprocal %517 : vector<16x1xf32> -> vector<16x1xf32>
    %519 = vector.broadcast %518 : vector<16x1xf32> to vector<16x16xf32>
    %520 = arith.mulf %515, %519 : vector<16x16xf32>
    %521 = vector.broadcast %506 : vector<1x32xf32> to vector<16x32xf32>
    %522 = arith.mulf %485, %521 : vector<16x32xf32>
    %cst_298 = arith.constant dense<0.000000e+00> : vector<16x32xf32>
    %523 = tpu.matmul %520, %522, %cst_298 {dimension_numbers = #tpu.dot_dimension_numbers<[1], [0], [0], [1], [0, 0, 1, 1], [], []>} : vector<16x16xf32>, vector<16x32xf32>, vector<16x32xf32> -> vector<16x32xf32>
    %524 = arith.addf %505, %523 : vector<16x32xf32>
    %525 = vector.extract_strided_slice %167 {offsets = [2, 0], sizes = [1, 32], strides = [1, 1]} : vector<4x32xf32> to vector<1x32xf32>
    %526 = vector.broadcast %525 : vector<1x32xf32> to vector<16x32xf32>
    %527 = arith.mulf %486, %526 : vector<16x32xf32>
    "tpu.trace_start"() <{level = 10 : i32, message = "qd,kd->qk"}> : () -> ()
    %cst_299 = arith.constant dense<0.000000e+00> : vector<16x16xf32>
    %528 = tpu.matmul %527, %487, %cst_299 {dimension_numbers = #tpu.dot_dimension_numbers<[1], [1], [0], [0], [0, 0, 1, 0], [], []>} : vector<16x32xf32>, vector<16x32xf32>, vector<16x16xf32> -> vector<16x16xf32>
    "tpu.trace_stop"() : () -> ()
    %529 = arith.addf %528, %169 : vector<16x16xf32>
    %cst_300 = arith.constant dense<0xFF800000> : vector<16xf32>
    %530 = vector.multi_reduction <maximumf>, %529, %cst_300 [1] : vector<16x16xf32> to vector<16xf32>
    %531 = vector.shape_cast %530 : vector<16xf32> to vector<16x1xf32>
    %532 = vector.broadcast %531 : vector<16x1xf32> to vector<16x16xf32>
    %533 = arith.subf %529, %532 : vector<16x16xf32>
    %534 = math.exp %533 : vector<16x16xf32>
    %cst_301 = arith.constant dense<0.000000e+00> : vector<16xf32>
    %535 = vector.multi_reduction <add>, %534, %cst_301 [1] : vector<16x16xf32> to vector<16xf32>
    %536 = vector.shape_cast %535 : vector<16xf32> to vector<16x1xf32>
    %537 = tpu.reciprocal %536 : vector<16x1xf32> -> vector<16x1xf32>
    %538 = vector.broadcast %537 : vector<16x1xf32> to vector<16x16xf32>
    %539 = arith.mulf %534, %538 : vector<16x16xf32>
    %540 = vector.broadcast %525 : vector<1x32xf32> to vector<16x32xf32>
    %541 = arith.mulf %485, %540 : vector<16x32xf32>
    %cst_302 = arith.constant dense<0.000000e+00> : vector<16x32xf32>
    %542 = tpu.matmul %539, %541, %cst_302 {dimension_numbers = #tpu.dot_dimension_numbers<[1], [0], [0], [1], [0, 0, 1, 1], [], []>} : vector<16x16xf32>, vector<16x32xf32>, vector<16x32xf32> -> vector<16x32xf32>
    %543 = arith.addf %524, %542 : vector<16x32xf32>
    %544 = vector.extract_strided_slice %167 {offsets = [3, 0], sizes = [1, 32], strides = [1, 1]} : vector<4x32xf32> to vector<1x32xf32>
    %545 = vector.broadcast %544 : vector<1x32xf32> to vector<16x32xf32>
    %546 = arith.mulf %486, %545 : vector<16x32xf32>
    "tpu.trace_start"() <{level = 10 : i32, message = "qd,kd->qk"}> : () -> ()
    %cst_303 = arith.constant dense<0.000000e+00> : vector<16x16xf32>
    %547 = tpu.matmul %546, %487, %cst_303 {dimension_numbers = #tpu.dot_dimension_numbers<[1], [1], [0], [0], [0, 0, 1, 0], [], []>} : vector<16x32xf32>, vector<16x32xf32>, vector<16x16xf32> -> vector<16x16xf32>
    "tpu.trace_stop"() : () -> ()
    %548 = arith.addf %547, %169 : vector<16x16xf32>
    %cst_304 = arith.constant dense<0xFF800000> : vector<16xf32>
    %549 = vector.multi_reduction <maximumf>, %548, %cst_304 [1] : vector<16x16xf32> to vector<16xf32>
    %550 = vector.shape_cast %549 : vector<16xf32> to vector<16x1xf32>
    %551 = vector.broadcast %550 : vector<16x1xf32> to vector<16x16xf32>
    %552 = arith.subf %548, %551 : vector<16x16xf32>
    %553 = math.exp %552 : vector<16x16xf32>
    %cst_305 = arith.constant dense<0.000000e+00> : vector<16xf32>
    %554 = vector.multi_reduction <add>, %553, %cst_305 [1] : vector<16x16xf32> to vector<16xf32>
    %555 = vector.shape_cast %554 : vector<16xf32> to vector<16x1xf32>
    %556 = tpu.reciprocal %555 : vector<16x1xf32> -> vector<16x1xf32>
    %557 = vector.broadcast %556 : vector<16x1xf32> to vector<16x16xf32>
    %558 = arith.mulf %553, %557 : vector<16x16xf32>
    %559 = vector.broadcast %544 : vector<1x32xf32> to vector<16x32xf32>
    %560 = arith.mulf %485, %559 : vector<16x32xf32>
    %cst_306 = arith.constant dense<0.000000e+00> : vector<16x32xf32>
    %561 = tpu.matmul %558, %560, %cst_306 {dimension_numbers = #tpu.dot_dimension_numbers<[1], [0], [0], [1], [0, 0, 1, 1], [], []>} : vector<16x16xf32>, vector<16x32xf32>, vector<16x32xf32> -> vector<16x32xf32>
    %562 = arith.addf %543, %561 : vector<16x32xf32>
    %cst_307 = arith.constant dense<0.000000e+00> : vector<16x32xf32>
    %563 = tpu.matmul %562, %460, %cst_307 {dimension_numbers = #tpu.dot_dimension_numbers<[1], [0], [0], [1], [0, 0, 1, 1], [], []>} : vector<16x32xf32>, vector<32x32xf32>, vector<16x32xf32> -> vector<16x32xf32>
    %564 = vector.broadcast %464 : vector<1x32xf32> to vector<16x32xf32>
    %565 = arith.addf %563, %564 : vector<16x32xf32>
    %566 = arith.addf %453, %565 : vector<16x32xf32>
    %cst_308 = arith.constant dense<0.000000e+00> : vector<16xf32>
    %567 = vector.multi_reduction <add>, %566, %cst_308 [1] : vector<16x32xf32> to vector<16xf32>
    %568 = vector.shape_cast %567 : vector<16xf32> to vector<16x1xf32>
    %cst_309 = arith.constant 3.200000e+01 : f32
    %569 = vector.broadcast %cst_309 : f32 to vector<16x1xf32>
    %570 = arith.divf %568, %569 : vector<16x1xf32>
    %571 = vector.broadcast %570 : vector<16x1xf32> to vector<16x32xf32>
    %572 = arith.subf %566, %571 : vector<16x32xf32>
    %573 = arith.mulf %572, %572 : vector<16x32xf32>
    %cst_310 = arith.constant dense<0.000000e+00> : vector<16xf32>
    %574 = vector.multi_reduction <add>, %573, %cst_310 [1] : vector<16x32xf32> to vector<16xf32>
    %575 = vector.shape_cast %574 : vector<16xf32> to vector<16x1xf32>
    %cst_311 = arith.constant 3.200000e+01 : f32
    %576 = vector.broadcast %cst_311 : f32 to vector<16x1xf32>
    %577 = arith.divf %575, %576 : vector<16x1xf32>
    %578 = vector.broadcast %570 : vector<16x1xf32> to vector<16x32xf32>
    %579 = arith.subf %566, %578 : vector<16x32xf32>
    %cst_312 = arith.constant 9.99999974E-6 : f32
    %580 = vector.broadcast %cst_312 : f32 to vector<16x1xf32>
    %581 = arith.addf %577, %580 : vector<16x1xf32>
    %582 = math.rsqrt %581 : vector<16x1xf32>
    %583 = vector.broadcast %582 : vector<16x1xf32> to vector<16x32xf32>
    %584 = arith.mulf %579, %583 : vector<16x32xf32>
    %585 = vector.broadcast %469 : vector<1x32xf32> to vector<16x32xf32>
    %586 = arith.mulf %584, %585 : vector<16x32xf32>
    %587 = vector.broadcast %470 : vector<1x32xf32> to vector<16x32xf32>
    %588 = arith.addf %586, %587 : vector<16x32xf32>
    %589 = arith.addf %588, %161 : vector<16x32xf32>
    %590 = vector.extract_strided_slice %458 {offsets = [0, 0], sizes = [32, 32], strides = [1, 1]} : vector<32x96xf32> to vector<32x32xf32>
    %cst_313 = arith.constant dense<0.000000e+00> : vector<16x32xf32>
    %591 = tpu.matmul %589, %590, %cst_313 {dimension_numbers = #tpu.dot_dimension_numbers<[1], [0], [0], [1], [0, 0, 1, 1], [], []>} : vector<16x32xf32>, vector<32x32xf32>, vector<16x32xf32> -> vector<16x32xf32>
    %592 = vector.extract_strided_slice %465 {offsets = [0, 0], sizes = [1, 32], strides = [1, 1]} : vector<1x96xf32> to vector<1x32xf32>
    %593 = vector.broadcast %592 : vector<1x32xf32> to vector<16x32xf32>
    %594 = arith.addf %591, %593 : vector<16x32xf32>
    %595 = vector.extract_strided_slice %458 {offsets = [0, 32], sizes = [32, 32], strides = [1, 1]} : vector<32x96xf32> to vector<32x32xf32>
    %cst_314 = arith.constant dense<0.000000e+00> : vector<32x32xf32>
    %596 = tpu.matmul %163, %595, %cst_314 {dimension_numbers = #tpu.dot_dimension_numbers<[1], [0], [0], [1], [0, 0, 1, 1], [], []>} : vector<32x32xf32>, vector<32x32xf32>, vector<32x32xf32> -> vector<32x32xf32>
    %597 = vector.extract_strided_slice %465 {offsets = [0, 32], sizes = [1, 32], strides = [1, 1]} : vector<1x96xf32> to vector<1x32xf32>
    %598 = vector.broadcast %597 : vector<1x32xf32> to vector<32x32xf32>
    %599 = arith.addf %596, %598 : vector<32x32xf32>
    %600 = vector.extract_strided_slice %458 {offsets = [0, 64], sizes = [32, 32], strides = [1, 1]} : vector<32x96xf32> to vector<32x32xf32>
    %cst_315 = arith.constant dense<0.000000e+00> : vector<32x32xf32>
    %601 = tpu.matmul %162, %600, %cst_315 {dimension_numbers = #tpu.dot_dimension_numbers<[1], [0], [0], [1], [0, 0, 1, 1], [], []>} : vector<32x32xf32>, vector<32x32xf32>, vector<32x32xf32> -> vector<32x32xf32>
    %602 = vector.extract_strided_slice %465 {offsets = [0, 64], sizes = [1, 32], strides = [1, 1]} : vector<1x96xf32> to vector<1x32xf32>
    %603 = vector.broadcast %602 : vector<1x32xf32> to vector<32x32xf32>
    %604 = arith.addf %601, %603 : vector<32x32xf32>
    %605 = vector.extract_strided_slice %167 {offsets = [0, 0], sizes = [1, 32], strides = [1, 1]} : vector<4x32xf32> to vector<1x32xf32>
    %606 = vector.broadcast %605 : vector<1x32xf32> to vector<16x32xf32>
    %607 = arith.mulf %594, %606 : vector<16x32xf32>
    "tpu.trace_start"() <{level = 10 : i32, message = "qd,kd->qk"}> : () -> ()
    %cst_316 = arith.constant dense<0.000000e+00> : vector<16x32xf32>
    %608 = tpu.matmul %607, %599, %cst_316 {dimension_numbers = #tpu.dot_dimension_numbers<[1], [1], [0], [0], [0, 0, 1, 0], [], []>} : vector<16x32xf32>, vector<32x32xf32>, vector<16x32xf32> -> vector<16x32xf32>
    "tpu.trace_stop"() : () -> ()
    %609 = arith.addf %608, %170 : vector<16x32xf32>
    %cst_317 = arith.constant dense<0xFF800000> : vector<16xf32>
    %610 = vector.multi_reduction <maximumf>, %609, %cst_317 [1] : vector<16x32xf32> to vector<16xf32>
    %611 = vector.shape_cast %610 : vector<16xf32> to vector<16x1xf32>
    %612 = vector.broadcast %611 : vector<16x1xf32> to vector<16x32xf32>
    %613 = arith.subf %609, %612 : vector<16x32xf32>
    %614 = math.exp %613 : vector<16x32xf32>
    %cst_318 = arith.constant dense<0.000000e+00> : vector<16xf32>
    %615 = vector.multi_reduction <add>, %614, %cst_318 [1] : vector<16x32xf32> to vector<16xf32>
    %616 = vector.shape_cast %615 : vector<16xf32> to vector<16x1xf32>
    %617 = tpu.reciprocal %616 : vector<16x1xf32> -> vector<16x1xf32>
    %618 = vector.broadcast %617 : vector<16x1xf32> to vector<16x32xf32>
    %619 = arith.mulf %614, %618 : vector<16x32xf32>
    %620 = vector.broadcast %605 : vector<1x32xf32> to vector<32x32xf32>
    %621 = arith.mulf %604, %620 : vector<32x32xf32>
    %cst_319 = arith.constant dense<0.000000e+00> : vector<16x32xf32>
    %622 = tpu.matmul %619, %621, %cst_319 {dimension_numbers = #tpu.dot_dimension_numbers<[1], [0], [0], [1], [0, 0, 1, 1], [], []>} : vector<16x32xf32>, vector<32x32xf32>, vector<16x32xf32> -> vector<16x32xf32>
    %623 = vector.extract_strided_slice %167 {offsets = [1, 0], sizes = [1, 32], strides = [1, 1]} : vector<4x32xf32> to vector<1x32xf32>
    %624 = vector.broadcast %623 : vector<1x32xf32> to vector<16x32xf32>
    %625 = arith.mulf %594, %624 : vector<16x32xf32>
    "tpu.trace_start"() <{level = 10 : i32, message = "qd,kd->qk"}> : () -> ()
    %cst_320 = arith.constant dense<0.000000e+00> : vector<16x32xf32>
    %626 = tpu.matmul %625, %599, %cst_320 {dimension_numbers = #tpu.dot_dimension_numbers<[1], [1], [0], [0], [0, 0, 1, 0], [], []>} : vector<16x32xf32>, vector<32x32xf32>, vector<16x32xf32> -> vector<16x32xf32>
    "tpu.trace_stop"() : () -> ()
    %627 = arith.addf %626, %170 : vector<16x32xf32>
    %cst_321 = arith.constant dense<0xFF800000> : vector<16xf32>
    %628 = vector.multi_reduction <maximumf>, %627, %cst_321 [1] : vector<16x32xf32> to vector<16xf32>
    %629 = vector.shape_cast %628 : vector<16xf32> to vector<16x1xf32>
    %630 = vector.broadcast %629 : vector<16x1xf32> to vector<16x32xf32>
    %631 = arith.subf %627, %630 : vector<16x32xf32>
    %632 = math.exp %631 : vector<16x32xf32>
    %cst_322 = arith.constant dense<0.000000e+00> : vector<16xf32>
    %633 = vector.multi_reduction <add>, %632, %cst_322 [1] : vector<16x32xf32> to vector<16xf32>
    %634 = vector.shape_cast %633 : vector<16xf32> to vector<16x1xf32>
    %635 = tpu.reciprocal %634 : vector<16x1xf32> -> vector<16x1xf32>
    %636 = vector.broadcast %635 : vector<16x1xf32> to vector<16x32xf32>
    %637 = arith.mulf %632, %636 : vector<16x32xf32>
    %638 = vector.broadcast %623 : vector<1x32xf32> to vector<32x32xf32>
    %639 = arith.mulf %604, %638 : vector<32x32xf32>
    %cst_323 = arith.constant dense<0.000000e+00> : vector<16x32xf32>
    %640 = tpu.matmul %637, %639, %cst_323 {dimension_numbers = #tpu.dot_dimension_numbers<[1], [0], [0], [1], [0, 0, 1, 1], [], []>} : vector<16x32xf32>, vector<32x32xf32>, vector<16x32xf32> -> vector<16x32xf32>
    %641 = arith.addf %622, %640 : vector<16x32xf32>
    %642 = vector.extract_strided_slice %167 {offsets = [2, 0], sizes = [1, 32], strides = [1, 1]} : vector<4x32xf32> to vector<1x32xf32>
    %643 = vector.broadcast %642 : vector<1x32xf32> to vector<16x32xf32>
    %644 = arith.mulf %594, %643 : vector<16x32xf32>
    "tpu.trace_start"() <{level = 10 : i32, message = "qd,kd->qk"}> : () -> ()
    %cst_324 = arith.constant dense<0.000000e+00> : vector<16x32xf32>
    %645 = tpu.matmul %644, %599, %cst_324 {dimension_numbers = #tpu.dot_dimension_numbers<[1], [1], [0], [0], [0, 0, 1, 0], [], []>} : vector<16x32xf32>, vector<32x32xf32>, vector<16x32xf32> -> vector<16x32xf32>
    "tpu.trace_stop"() : () -> ()
    %646 = arith.addf %645, %170 : vector<16x32xf32>
    %cst_325 = arith.constant dense<0xFF800000> : vector<16xf32>
    %647 = vector.multi_reduction <maximumf>, %646, %cst_325 [1] : vector<16x32xf32> to vector<16xf32>
    %648 = vector.shape_cast %647 : vector<16xf32> to vector<16x1xf32>
    %649 = vector.broadcast %648 : vector<16x1xf32> to vector<16x32xf32>
    %650 = arith.subf %646, %649 : vector<16x32xf32>
    %651 = math.exp %650 : vector<16x32xf32>
    %cst_326 = arith.constant dense<0.000000e+00> : vector<16xf32>
    %652 = vector.multi_reduction <add>, %651, %cst_326 [1] : vector<16x32xf32> to vector<16xf32>
    %653 = vector.shape_cast %652 : vector<16xf32> to vector<16x1xf32>
    %654 = tpu.reciprocal %653 : vector<16x1xf32> -> vector<16x1xf32>
    %655 = vector.broadcast %654 : vector<16x1xf32> to vector<16x32xf32>
    %656 = arith.mulf %651, %655 : vector<16x32xf32>
    %657 = vector.broadcast %642 : vector<1x32xf32> to vector<32x32xf32>
    %658 = arith.mulf %604, %657 : vector<32x32xf32>
    %cst_327 = arith.constant dense<0.000000e+00> : vector<16x32xf32>
    %659 = tpu.matmul %656, %658, %cst_327 {dimension_numbers = #tpu.dot_dimension_numbers<[1], [0], [0], [1], [0, 0, 1, 1], [], []>} : vector<16x32xf32>, vector<32x32xf32>, vector<16x32xf32> -> vector<16x32xf32>
    %660 = arith.addf %641, %659 : vector<16x32xf32>
    %661 = vector.extract_strided_slice %167 {offsets = [3, 0], sizes = [1, 32], strides = [1, 1]} : vector<4x32xf32> to vector<1x32xf32>
    %662 = vector.broadcast %661 : vector<1x32xf32> to vector<16x32xf32>
    %663 = arith.mulf %594, %662 : vector<16x32xf32>
    "tpu.trace_start"() <{level = 10 : i32, message = "qd,kd->qk"}> : () -> ()
    %cst_328 = arith.constant dense<0.000000e+00> : vector<16x32xf32>
    %664 = tpu.matmul %663, %599, %cst_328 {dimension_numbers = #tpu.dot_dimension_numbers<[1], [1], [0], [0], [0, 0, 1, 0], [], []>} : vector<16x32xf32>, vector<32x32xf32>, vector<16x32xf32> -> vector<16x32xf32>
    "tpu.trace_stop"() : () -> ()
    %665 = arith.addf %664, %170 : vector<16x32xf32>
    %cst_329 = arith.constant dense<0xFF800000> : vector<16xf32>
    %666 = vector.multi_reduction <maximumf>, %665, %cst_329 [1] : vector<16x32xf32> to vector<16xf32>
    %667 = vector.shape_cast %666 : vector<16xf32> to vector<16x1xf32>
    %668 = vector.broadcast %667 : vector<16x1xf32> to vector<16x32xf32>
    %669 = arith.subf %665, %668 : vector<16x32xf32>
    %670 = math.exp %669 : vector<16x32xf32>
    %cst_330 = arith.constant dense<0.000000e+00> : vector<16xf32>
    %671 = vector.multi_reduction <add>, %670, %cst_330 [1] : vector<16x32xf32> to vector<16xf32>
    %672 = vector.shape_cast %671 : vector<16xf32> to vector<16x1xf32>
    %673 = tpu.reciprocal %672 : vector<16x1xf32> -> vector<16x1xf32>
    %674 = vector.broadcast %673 : vector<16x1xf32> to vector<16x32xf32>
    %675 = arith.mulf %670, %674 : vector<16x32xf32>
    %676 = vector.broadcast %661 : vector<1x32xf32> to vector<32x32xf32>
    %677 = arith.mulf %604, %676 : vector<32x32xf32>
    %cst_331 = arith.constant dense<0.000000e+00> : vector<16x32xf32>
    %678 = tpu.matmul %675, %677, %cst_331 {dimension_numbers = #tpu.dot_dimension_numbers<[1], [0], [0], [1], [0, 0, 1, 1], [], []>} : vector<16x32xf32>, vector<32x32xf32>, vector<16x32xf32> -> vector<16x32xf32>
    %679 = arith.addf %660, %678 : vector<16x32xf32>
    %cst_332 = arith.constant dense<0.000000e+00> : vector<16x32xf32>
    %680 = tpu.matmul %679, %461, %cst_332 {dimension_numbers = #tpu.dot_dimension_numbers<[1], [0], [0], [1], [0, 0, 1, 1], [], []>} : vector<16x32xf32>, vector<32x32xf32>, vector<16x32xf32> -> vector<16x32xf32>
    %681 = vector.broadcast %466 : vector<1x32xf32> to vector<16x32xf32>
    %682 = arith.addf %680, %681 : vector<16x32xf32>
    %683 = arith.addf %588, %682 : vector<16x32xf32>
    %cst_333 = arith.constant dense<0.000000e+00> : vector<16xf32>
    %684 = vector.multi_reduction <add>, %683, %cst_333 [1] : vector<16x32xf32> to vector<16xf32>
    %685 = vector.shape_cast %684 : vector<16xf32> to vector<16x1xf32>
    %cst_334 = arith.constant 3.200000e+01 : f32
    %686 = vector.broadcast %cst_334 : f32 to vector<16x1xf32>
    %687 = arith.divf %685, %686 : vector<16x1xf32>
    %688 = vector.broadcast %687 : vector<16x1xf32> to vector<16x32xf32>
    %689 = arith.subf %683, %688 : vector<16x32xf32>
    %690 = arith.mulf %689, %689 : vector<16x32xf32>
    %cst_335 = arith.constant dense<0.000000e+00> : vector<16xf32>
    %691 = vector.multi_reduction <add>, %690, %cst_335 [1] : vector<16x32xf32> to vector<16xf32>
    %692 = vector.shape_cast %691 : vector<16xf32> to vector<16x1xf32>
    %cst_336 = arith.constant 3.200000e+01 : f32
    %693 = vector.broadcast %cst_336 : f32 to vector<16x1xf32>
    %694 = arith.divf %692, %693 : vector<16x1xf32>
    %695 = vector.broadcast %687 : vector<16x1xf32> to vector<16x32xf32>
    %696 = arith.subf %683, %695 : vector<16x32xf32>
    %cst_337 = arith.constant 9.99999974E-6 : f32
    %697 = vector.broadcast %cst_337 : f32 to vector<16x1xf32>
    %698 = arith.addf %694, %697 : vector<16x1xf32>
    %699 = math.rsqrt %698 : vector<16x1xf32>
    %700 = vector.broadcast %699 : vector<16x1xf32> to vector<16x32xf32>
    %701 = arith.mulf %696, %700 : vector<16x32xf32>
    %702 = vector.broadcast %471 : vector<1x32xf32> to vector<16x32xf32>
    %703 = arith.mulf %701, %702 : vector<16x32xf32>
    %704 = vector.broadcast %472 : vector<1x32xf32> to vector<16x32xf32>
    %705 = arith.addf %703, %704 : vector<16x32xf32>
    %cst_338 = arith.constant dense<0.000000e+00> : vector<16x64xf32>
    %706 = tpu.matmul %705, %462, %cst_338 {dimension_numbers = #tpu.dot_dimension_numbers<[1], [0], [0], [1], [0, 0, 1, 1], [], []>} : vector<16x32xf32>, vector<32x64xf32>, vector<16x64xf32> -> vector<16x64xf32>
    %707 = vector.broadcast %467 : vector<1x64xf32> to vector<16x64xf32>
    %708 = arith.addf %706, %707 : vector<16x64xf32>
    %cst_339 = arith.constant 0.000000e+00 : f32
    %709 = vector.broadcast %cst_339 : f32 to vector<16x64xf32>
    %710 = arith.maximumf %708, %709 : vector<16x64xf32>
    %cst_340 = arith.constant dense<0.000000e+00> : vector<16x32xf32>
    %711 = tpu.matmul %710, %459, %cst_340 {dimension_numbers = #tpu.dot_dimension_numbers<[1], [0], [0], [1], [0, 0, 1, 1], [], []>} : vector<16x64xf32>, vector<64x32xf32>, vector<16x32xf32> -> vector<16x32xf32>
    %712 = vector.broadcast %468 : vector<1x32xf32> to vector<16x32xf32>
    %713 = arith.addf %711, %712 : vector<16x32xf32>
    %714 = arith.addf %705, %713 : vector<16x32xf32>
    %cst_341 = arith.constant dense<0.000000e+00> : vector<16xf32>
    %715 = vector.multi_reduction <add>, %714, %cst_341 [1] : vector<16x32xf32> to vector<16xf32>
    %716 = vector.shape_cast %715 : vector<16xf32> to vector<16x1xf32>
    %cst_342 = arith.constant 3.200000e+01 : f32
    %717 = vector.broadcast %cst_342 : f32 to vector<16x1xf32>
    %718 = arith.divf %716, %717 : vector<16x1xf32>
    %719 = vector.broadcast %718 : vector<16x1xf32> to vector<16x32xf32>
    %720 = arith.subf %714, %719 : vector<16x32xf32>
    %721 = arith.mulf %720, %720 : vector<16x32xf32>
    %cst_343 = arith.constant dense<0.000000e+00> : vector<16xf32>
    %722 = vector.multi_reduction <add>, %721, %cst_343 [1] : vector<16x32xf32> to vector<16xf32>
    %723 = vector.shape_cast %722 : vector<16xf32> to vector<16x1xf32>
    %cst_344 = arith.constant 3.200000e+01 : f32
    %724 = vector.broadcast %cst_344 : f32 to vector<16x1xf32>
    %725 = arith.divf %723, %724 : vector<16x1xf32>
    %726 = vector.broadcast %718 : vector<16x1xf32> to vector<16x32xf32>
    %727 = arith.subf %714, %726 : vector<16x32xf32>
    %cst_345 = arith.constant 9.99999974E-6 : f32
    %728 = vector.broadcast %cst_345 : f32 to vector<16x1xf32>
    %729 = arith.addf %725, %728 : vector<16x1xf32>
    %730 = math.rsqrt %729 : vector<16x1xf32>
    %731 = vector.broadcast %730 : vector<16x1xf32> to vector<16x32xf32>
    %732 = arith.mulf %727, %731 : vector<16x32xf32>
    %733 = vector.broadcast %473 : vector<1x32xf32> to vector<16x32xf32>
    %734 = arith.mulf %732, %733 : vector<16x32xf32>
    %735 = vector.broadcast %474 : vector<1x32xf32> to vector<16x32xf32>
    %736 = arith.addf %734, %735 : vector<16x32xf32>
    %cst_346 = arith.constant dense<0.000000e+00> : vector<16xf32>
    %737 = vector.multi_reduction <add>, %736, %cst_346 [1] : vector<16x32xf32> to vector<16xf32>
    %738 = vector.shape_cast %737 : vector<16xf32> to vector<16x1xf32>
    %cst_347 = arith.constant 3.200000e+01 : f32
    %739 = vector.broadcast %cst_347 : f32 to vector<16x1xf32>
    %740 = arith.divf %738, %739 : vector<16x1xf32>
    %741 = vector.broadcast %740 : vector<16x1xf32> to vector<16x32xf32>
    %742 = arith.subf %736, %741 : vector<16x32xf32>
    %743 = arith.mulf %742, %742 : vector<16x32xf32>
    %cst_348 = arith.constant dense<0.000000e+00> : vector<16xf32>
    %744 = vector.multi_reduction <add>, %743, %cst_348 [1] : vector<16x32xf32> to vector<16xf32>
    %745 = vector.shape_cast %744 : vector<16xf32> to vector<16x1xf32>
    %cst_349 = arith.constant 3.200000e+01 : f32
    %746 = vector.broadcast %cst_349 : f32 to vector<16x1xf32>
    %747 = arith.divf %745, %746 : vector<16x1xf32>
    %748 = vector.broadcast %740 : vector<16x1xf32> to vector<16x32xf32>
    %749 = arith.subf %736, %748 : vector<16x32xf32>
    %cst_350 = arith.constant 9.99999974E-6 : f32
    %750 = vector.broadcast %cst_350 : f32 to vector<16x1xf32>
    %751 = arith.addf %747, %750 : vector<16x1xf32>
    %752 = math.rsqrt %751 : vector<16x1xf32>
    %753 = vector.broadcast %752 : vector<16x1xf32> to vector<16x32xf32>
    %754 = arith.mulf %749, %753 : vector<16x32xf32>
    %755 = vector.broadcast %165 : vector<1x32xf32> to vector<16x32xf32>
    %756 = arith.mulf %754, %755 : vector<16x32xf32>
    %757 = vector.broadcast %166 : vector<1x32xf32> to vector<16x32xf32>
    %758 = arith.addf %756, %757 : vector<16x32xf32>
    %759 = vector.extract_strided_slice %758 {offsets = [0, 0], sizes = [2, 32], strides = [1, 1]} : vector<16x32xf32> to vector<2x32xf32>
    %c0_351 = arith.constant 0 : index
    %c0_352 = arith.constant 0 : index
    %c0_353 = arith.constant 0 : index
    %760 = vector.load %arg5[%c0_351, %c0_352, %c0_353] : memref<8x2x32xf32, #tpu.memory_space<vmem>>, vector<1x2x32xf32>
    %761 = vector.shape_cast %760 : vector<1x2x32xf32> to vector<2x32xf32>
    %762 = vector.shape_cast %759 : vector<2x32xf32> to vector<1x2x32xf32>
    tpu.vector_store %arg5[%c0_351, %c0_352, %c0_353], %762 {strides = array<i32>} : memref<8x2x32xf32, #tpu.memory_space<vmem>>, vector<1x2x32xf32>,
    %763 = vector.extract_strided_slice %758 {offsets = [2, 0], sizes = [2, 32], strides = [1, 1]} : vector<16x32xf32> to vector<2x32xf32>
    %c1_354 = arith.constant 1 : index
    %c0_355 = arith.constant 0 : index
    %c0_356 = arith.constant 0 : index
    %764 = vector.load %arg5[%c1_354, %c0_355, %c0_356] : memref<8x2x32xf32, #tpu.memory_space<vmem>>, vector<1x2x32xf32>
    %765 = vector.shape_cast %764 : vector<1x2x32xf32> to vector<2x32xf32>
    %766 = vector.shape_cast %763 : vector<2x32xf32> to vector<1x2x32xf32>
    tpu.vector_store %arg5[%c1_354, %c0_355, %c0_356], %766 {strides = array<i32>} : memref<8x2x32xf32, #tpu.memory_space<vmem>>, vector<1x2x32xf32>,
    %767 = vector.extract_strided_slice %758 {offsets = [4, 0], sizes = [2, 32], strides = [1, 1]} : vector<16x32xf32> to vector<2x32xf32>
    %c2_357 = arith.constant 2 : index
    %c0_358 = arith.constant 0 : index
    %c0_359 = arith.constant 0 : index
    %768 = vector.load %arg5[%c2_357, %c0_358, %c0_359] : memref<8x2x32xf32, #tpu.memory_space<vmem>>, vector<1x2x32xf32>
    %769 = vector.shape_cast %768 : vector<1x2x32xf32> to vector<2x32xf32>
    %770 = vector.shape_cast %767 : vector<2x32xf32> to vector<1x2x32xf32>
    tpu.vector_store %arg5[%c2_357, %c0_358, %c0_359], %770 {strides = array<i32>} : memref<8x2x32xf32, #tpu.memory_space<vmem>>, vector<1x2x32xf32>,
    %771 = vector.extract_strided_slice %758 {offsets = [6, 0], sizes = [2, 32], strides = [1, 1]} : vector<16x32xf32> to vector<2x32xf32>
    %c3_360 = arith.constant 3 : index
    %c0_361 = arith.constant 0 : index
    %c0_362 = arith.constant 0 : index
    %772 = vector.load %arg5[%c3_360, %c0_361, %c0_362] : memref<8x2x32xf32, #tpu.memory_space<vmem>>, vector<1x2x32xf32>
    %773 = vector.shape_cast %772 : vector<1x2x32xf32> to vector<2x32xf32>
    %774 = vector.shape_cast %771 : vector<2x32xf32> to vector<1x2x32xf32>
    tpu.vector_store %arg5[%c3_360, %c0_361, %c0_362], %774 {strides = array<i32>} : memref<8x2x32xf32, #tpu.memory_space<vmem>>, vector<1x2x32xf32>,
    %775 = vector.extract_strided_slice %758 {offsets = [8, 0], sizes = [2, 32], strides = [1, 1]} : vector<16x32xf32> to vector<2x32xf32>
    %c4_363 = arith.constant 4 : index
    %c0_364 = arith.constant 0 : index
    %c0_365 = arith.constant 0 : index
    %776 = vector.load %arg5[%c4_363, %c0_364, %c0_365] : memref<8x2x32xf32, #tpu.memory_space<vmem>>, vector<1x2x32xf32>
    %777 = vector.shape_cast %776 : vector<1x2x32xf32> to vector<2x32xf32>
    %778 = vector.shape_cast %775 : vector<2x32xf32> to vector<1x2x32xf32>
    tpu.vector_store %arg5[%c4_363, %c0_364, %c0_365], %778 {strides = array<i32>} : memref<8x2x32xf32, #tpu.memory_space<vmem>>, vector<1x2x32xf32>,
    %779 = vector.extract_strided_slice %758 {offsets = [10, 0], sizes = [2, 32], strides = [1, 1]} : vector<16x32xf32> to vector<2x32xf32>
    %c5_366 = arith.constant 5 : index
    %c0_367 = arith.constant 0 : index
    %c0_368 = arith.constant 0 : index
    %780 = vector.load %arg5[%c5_366, %c0_367, %c0_368] : memref<8x2x32xf32, #tpu.memory_space<vmem>>, vector<1x2x32xf32>
    %781 = vector.shape_cast %780 : vector<1x2x32xf32> to vector<2x32xf32>
    %782 = vector.shape_cast %779 : vector<2x32xf32> to vector<1x2x32xf32>
    tpu.vector_store %arg5[%c5_366, %c0_367, %c0_368], %782 {strides = array<i32>} : memref<8x2x32xf32, #tpu.memory_space<vmem>>, vector<1x2x32xf32>,
    %783 = vector.extract_strided_slice %758 {offsets = [12, 0], sizes = [2, 32], strides = [1, 1]} : vector<16x32xf32> to vector<2x32xf32>
    %c6_369 = arith.constant 6 : index
    %c0_370 = arith.constant 0 : index
    %c0_371 = arith.constant 0 : index
    %784 = vector.load %arg5[%c6_369, %c0_370, %c0_371] : memref<8x2x32xf32, #tpu.memory_space<vmem>>, vector<1x2x32xf32>
    %785 = vector.shape_cast %784 : vector<1x2x32xf32> to vector<2x32xf32>
    %786 = vector.shape_cast %783 : vector<2x32xf32> to vector<1x2x32xf32>
    tpu.vector_store %arg5[%c6_369, %c0_370, %c0_371], %786 {strides = array<i32>} : memref<8x2x32xf32, #tpu.memory_space<vmem>>, vector<1x2x32xf32>,
    %787 = vector.extract_strided_slice %758 {offsets = [14, 0], sizes = [2, 32], strides = [1, 1]} : vector<16x32xf32> to vector<2x32xf32>
    %c7_372 = arith.constant 7 : index
    %c0_373 = arith.constant 0 : index
    %c0_374 = arith.constant 0 : index
    %788 = vector.load %arg5[%c7_372, %c0_373, %c0_374] : memref<8x2x32xf32, #tpu.memory_space<vmem>>, vector<1x2x32xf32>
    %789 = vector.shape_cast %788 : vector<1x2x32xf32> to vector<2x32xf32>
    %790 = vector.shape_cast %787 : vector<2x32xf32> to vector<1x2x32xf32>
    tpu.vector_store %arg5[%c7_372, %c0_373, %c0_374], %790 {strides = array<i32>} : memref<8x2x32xf32, #tpu.memory_space<vmem>>, vector<1x2x32xf32>,
    return
  }
}

</mosaic_0001>

<bundles_post_ra>
// kernel: transformer_decoder.1
= control target key start
LH: loop header
LB: loop body
LE: loop exit
PB: predicated region body
PF: predicated region fallthrough
CT: control target
= control target key end

     0   :  { %10 = vsyncpa [#allocation7], 0  ;;  %s7935_s0 = inlined_call_operand.hbm [shape: f32[8,2,32], index: 0, kind: input, shape index: {}]   ;;  %s7936_s1 = inlined_call_operand.hbm [shape: f32[16,2,32], index: 1, kind: input, shape index: {}]   ;;  %s7937_s2 = inlined_call_operand.hbm [shape: f32[8,2,32], index: 2, kind: input, shape index: {}]   ;;  %s7938_s3 = inlined_call_operand.hbm [shape: f32[16,2,32], index: 3, kind: input, shape index: {}]   ;;  %s7939_s4 = inlined_call_operand.hbm [shape: f32[248,128], index: 4, kind: input, shape index: {}]   ;;  %s7940_s5 = inlined_call_operand.hbm [shape: f32[8,2,32], index: 5, kind: output, shape index: {}]  }
   0x1   :  { %11 = vsyncpa [#allocation10], 0 }
   0x2   :  { %12 = vsyncpa [#allocation13], 0 }
   0x3   :  { %13 = vsyncpa [#allocation8], 0  ;;  %s6766_s18 = smov [#allocation9]   ;;  %s6767_s20 = smov [#allocation12]  }
   0x4   :  { %s31_s19 = sshll.u32 %s6766_s18, 4  ;;  %s55_s21 = sshll.u32 %s6767_s20, 4  ;;  %s32_s19 = int_to_ptr.vmem [resolvable:$true] %s31_s19  ;;  %s56_s21 = int_to_ptr.vmem [resolvable:$true] %s55_s21 }
   0x5   :  { %s6646_s22 = scalar_lea.vmem %s32_s19, 512  ;;  %p6651_p1 = scmp.lt.s32.totalorder %s32_s19, %s32_s19 }
   0x6   :  { %p6647_p0 = scmp.ne.s32.totalorder %s32_s19, %s6646_s22  ;;  %p6652_p2 = scmp.lt.s32.totalorder %s6646_s22, %s6646_s22 }
   0x8   :  { %p6653_p3 = por %p6652_p2, %p6651_p1 }
   0xa   :  { %p6654_p4 = pnand %p6653_p3, %p6647_p0 }
   0xc   :  { %6657 = shalt.err (!%p6654_p4)
}
   0xd   :  { %s6768_s23 = smov 32   ;;  %s6769_s24 = smov 2  }
   0xe   :  { %37 = dma.hbm_to_vmem [thread:$0]  %s7936_s1, 512, %s32_s19, [#allocation10], %s6768_s23, %s6768_s23, %s6769_s24  }
   0xf   :  { %s6666_s27 = scalar_lea.vmem %s56_s21, 512  ;;  %p6671_p6 = scmp.lt.s32.totalorder %s56_s21, %s56_s21 }
  0x10   :  { %p6667_p5 = scmp.ne.s32.totalorder %s56_s21, %s6666_s27  ;;  %p6672_p7 = scmp.lt.s32.totalorder %s6666_s27, %s6666_s27 }
  0x12   :  { %p6673_p8 = por %p6672_p7, %p6671_p6 }
  0x14   :  { %p6674_p9 = pnand %p6673_p8, %p6667_p5 }
  0x16   :  { %6677 = shalt.err (!%p6674_p9)
}
  0x17   :  { %61 = dma.hbm_to_vmem [thread:$0]  %s7938_s3, 512, %s56_s21, [#allocation13], %s6768_s23, %s6768_s23, %s6769_s24  }
  0x18   :  { %s6770_s30 = smov [#allocation6]   ;;  %s6771_s7 = smov [#allocation11]  }
  0x19   :  { %s19_s6 = sshll.u32 %s6770_s30, 4  ;;  %s43_s8 = sshll.u32 %s6771_s7, 4  ;;  %s20_s6 = int_to_ptr.vmem [resolvable:$true] %s19_s6  ;;  %s44_s8 = int_to_ptr.vmem [resolvable:$true] %s43_s8 }
  0x1a   :  { %s6686_s1 = scalar_lea.vmem %s20_s6, 256  ;;  %p6691_p11 = scmp.lt.s32.totalorder %s20_s6, %s20_s6 }
  0x1b   :  { %p6687_p10 = scmp.ne.s32.totalorder %s20_s6, %s6686_s1  ;;  %p6692_p12 = scmp.lt.s32.totalorder %s6686_s1, %s6686_s1 }
  0x1d   :  { %p6693_p13 = por %p6692_p12, %p6691_p11 }
  0x1f   :  { %p6694_p0 = pnand %p6693_p13, %p6687_p10 }
  0x21   :  { %6697 = shalt.err (!%p6694_p0)
}
  0x22   :  { %25 = dma.hbm_to_vmem [thread:$0]  %s7935_s0, 256, %s20_s6, [#allocation7], %s6768_s23, %s6768_s23, %s6769_s24  }
  0x23   :  { %s6706_s3 = scalar_lea.vmem %s44_s8, 256  ;;  %p6711_p2 = scmp.lt.s32.totalorder %s44_s8, %s44_s8 }
  0x24   :  { %p6707_p1 = scmp.ne.s32.totalorder %s44_s8, %s6706_s3  ;;  %p6712_p3 = scmp.lt.s32.totalorder %s6706_s3, %s6706_s3 }
  0x26   :  { %p6713_p4 = por %p6712_p3, %p6711_p2 }
  0x28   :  { %p6714_p5 = pnand %p6713_p4, %p6707_p1 }
  0x2a   :  { %6717 = shalt.err (!%p6714_p5)
}
  0x2b   :  { %49 = dma.hbm_to_vmem [thread:$0]  %s7937_s2, 256, %s44_s8, [#allocation10], %s6768_s23, %s6768_s23, %s6769_s24  }
  0x2c   :  { %s6772_s13 = smov [#allocation14]  }
  0x2d   :  { %s67_s14 = sshll.u32 %s6772_s13, 4  ;;  %s68_s14 = int_to_ptr.vmem [resolvable:$true] %s67_s14 }
  0x2e   :  { %s6726_s15 = scalar_lea.vmem %s68_s14, 3968  ;;  %p6731_p7 = scmp.lt.s32.totalorder %s68_s14, %s68_s14 }
  0x2f   :  { %p6727_p6 = scmp.ne.s32.totalorder %s68_s14, %s6726_s15  ;;  %p6732_p8 = scmp.lt.s32.totalorder %s6726_s15, %s6726_s15 }
  0x31   :  { %p6733_p9 = por %p6732_p8, %p6731_p7 }
  0x33   :  { %p6734_p10 = pnand %p6733_p9, %p6727_p6 }
  0x35   :  { %6737 = shalt.err (!%p6734_p10)
}
  0x36   :  { %s6773_s0 = smov 128   ;;  %s6774_s16 = smov 8  }
  0x37   :  { %73 = dma.hbm_to_vmem [thread:$0]  %s7939_s4, 3968, %s68_s14, [#allocation13], %s6773_s0, %s6773_s0, %s6774_s16  }
  0x38   :  { %6758 = dma.done.wait [#allocation7], 256  }
  0x39   :  { %6759 = vsyncadd [#allocation7], 4294967040 }
  0x3a   :  { %6760 = dma.done.wait [#allocation10], 768  }
  0x3b   :  { %6761 = vsyncadd [#allocation10], 4294966528 }
  0x3c   :  { %6762 = dma.done.wait [#allocation13], 4480  }
  0x3d   :  { %6763 = vsyncadd [#allocation13], 4294962816  ;;  %vm90_vm0 = vcmask 254976   ;;  %v264_v0 = vld [vmem:[#allocation14 + $0x18] sm:$0xff]  ;;  %v263_v1 = vld [vmem:[#allocation14 + $0x10] sm:$0xff]  ;;  %s6775_s2 = smov 64   ;;  %v277_v30 = vlaneseq }
  0x3e   :  { %5928 = vmatprep.subr.mxu1 %v264_v0  ;;  %v262_v2 = vld [vmem:[#allocation14 + $0x8] sm:$0xff]  ;;  %v89_v3 = vld [vmem:[#allocation6] sm:$0x3]  ;;  %v92_v4 = vld [vmem:[#allocation11] sm:$0x3]  ;;  %373 = vrot.lane.b32.xlu0 %v264_v0, %s6775_s2  ;;  %vm281_vm1 = vcmask 261120  }
  0x3f   :  { %5929 = vmatpush3.msra.mxu1 %v264_v0  ;;  %v261_v5 = vld [vmem:[#allocation14] sm:$0xff]  ;;  %91 = vst.msk [vmem:[#allocation2] sm:$0x3] %vm90_vm0, %v89_v3  ;;  %93 = vst.msk [vmem:[#allocation3] sm:$0x3] %vm90_vm0, %v92_v4  ;;  %369 = vrot.lane.b32.xlu1 %v262_v2, %s6775_s2  ;;  %v6874_v31 = vshrl.u32 %v277_v30, 7 }
  0x40   :  { %v95_v6 = vld [vmem:[#allocation6 + $0x2] sm:$0x3]  ;;  %v98_v7 = vld [vmem:[#allocation11 + $0x2] sm:$0x3]  ;;  %v101_v8 = vld [vmem:[#allocation6 + $0x4] sm:$0x3]  ;;  %5930 = vmatprep.subr.mxu1 %v263_v1 }
  0x41   :  { %96 = vst.msk [vmem:[#allocation2 + $0x2] sm:$0x3] %vm90_vm0, %v95_v6  ;;  %99 = vst.msk [vmem:[#allocation3 + $0x2] sm:$0x3] %vm90_vm0, %v98_v7  ;;  %v104_v9 = vld [vmem:[#allocation11 + $0x4] sm:$0x3]  ;;  %5931 = vmatpush3.msra.mxu1 %v263_v1 }
  0x42   :  { %102 = vst.msk [vmem:[#allocation2 + $0x4] sm:$0x3] %vm90_vm0, %v101_v8  ;;  %v107_v10 = vld [vmem:[#allocation6 + $0x6] sm:$0x3]  ;;  %v110_v11 = vld [vmem:[#allocation11 + $0x6] sm:$0x3]  ;;  %5932 = vmatprep.subr.mxu1 %v262_v2  ;;  %371 = vrot.lane.b32.xlu0 %v263_v1, %s6775_s2 }
  0x43   :  { %105 = vst.msk [vmem:[#allocation3 + $0x4] sm:$0x3] %vm90_vm0, %v104_v9  ;;  %108 = vst.msk [vmem:[#allocation2 + $0x6] sm:$0x3] %vm90_vm0, %v107_v10  ;;  %v113_v12 = vld [vmem:[#allocation6 + $0x8] sm:$0x3]  ;;  %5933 = vmatpush3.msra.mxu1 %v262_v2  ;;  %367 = vrot.lane.b32.xlu1 %v261_v5, %s6775_s2 }
  0x44   :  { %111 = vst.msk [vmem:[#allocation3 + $0x6] sm:$0x3] %vm90_vm0, %v110_v11  ;;  %v116_v13 = vld [vmem:[#allocation11 + $0x8] sm:$0x3]  ;;  %v119_v14 = vld [vmem:[#allocation6 + $0xa] sm:$0x3]  ;;  %5934 = vmatprep.subr.mxu1 %v261_v5 }
  0x45   :  { %114 = vst.msk [vmem:[#allocation2 + $0x8] sm:$0x3] %vm90_vm0, %v113_v12  ;;  %117 = vst.msk [vmem:[#allocation3 + $0x8] sm:$0x3] %vm90_vm0, %v116_v13  ;;  %v122_v15 = vld [vmem:[#allocation11 + $0xa] sm:$0x3]  ;;  %5935 = vmatpush3.msra.mxu1 %v261_v5 }
  0x46   :  { %120 = vst.msk [vmem:[#allocation2 + $0xa] sm:$0x3] %vm90_vm0, %v119_v14  ;;  %v125_v16 = vld [vmem:[#allocation6 + $0xc] sm:$0x3]  ;;  %v128_v17 = vld [vmem:[#allocation11 + $0xc] sm:$0x3] }
  0x47   :  { %123 = vst.msk [vmem:[#allocation3 + $0xa] sm:$0x3] %vm90_vm0, %v122_v15  ;;  %126 = vst.msk [vmem:[#allocation2 + $0xc] sm:$0x3] %vm90_vm0, %v125_v16  ;;  %v131_v18 = vld [vmem:[#allocation6 + $0xe] sm:$0x3] }
  0x48   :  { %129 = vst.msk [vmem:[#allocation3 + $0xc] sm:$0x3] %vm90_vm0, %v128_v17  ;;  %v134_v19 = vld [vmem:[#allocation11 + $0xe] sm:$0x3]  ;;  %132 = vst.msk [vmem:[#allocation2 + $0xe] sm:$0x3] %vm90_vm0, %v131_v18 }
  0x49   :  { %135 = vst.msk [vmem:[#allocation3 + $0xe] sm:$0x3] %vm90_vm0, %v134_v19  ;;  %v6877_v32 = vsub.s32 0, %v6874_v31  ;;  %v6879_v33 = vld [vmem:[#allocation14 + $0x60] sm:$0xff]  ;;  %v6884_v35 = vsub.s32 2, %v6874_v31  ;;  %v6887_v36 = vsub.s32 3, %v6874_v31 }
  0x4a   :  { %v6856_v20 = vld [vmem:[#allocation2] sm:$0xff]  ;;  %s6776_s4 = smov 96   ;;  %v6939_v52 = vld [vmem:[#allocation14 + $0xf0] sm:$0xff]  ;;  %v6941_v54 = vld [vmem:[#allocation14 + $0xe8] sm:$0xff]  ;;  %vm561_vm2 = vcmask 130048   ;;  %v6949_v0 = vsub.s32 4, %v6874_v31 }
  0x4b   :  { %v6858_v21 = vld [vmem:[#allocation3] sm:$0xff]  ;;  %v280_v34 = vrot.slane %v6879_v33, %v6877_v32  ;;  %v6889_v37 = vld [vmem:[#allocation14 + $0xe0] sm:$0xff]  ;;  %s6777_s19 = smov 112   ;;  %vm2741_vm3 = vcmask 523264   ;;  %vm5453_vm4 = vcmask 257026   ;;  %vm5456_vm5 = vcmask 259076  }
  0x4c   :  { %v275_v22 = vadd.f32 %v6858_v21, %v6856_v20  ;;  %v6895_v41 = vrot.slane %v6889_v37, %v6884_v35  ;;  %v6899_v42 = vrot.slane %v6889_v37, %v6887_v36  ;;  %v6957_v8 = vrot.slane %v6889_v37, %v6949_v0  ;;  %s6778_s20 = smov [#allocation15]  }
  0x4d   :  { %vm5459_vm6 = vcmask 261126   ;;  %s5474_s21 = sshll.u32 %s6778_s20, 4  ;;  %s5475_s21 = int_to_ptr.vmem [resolvable:$true] %s5474_s21 }
  0x4e   :  { %5936 = vmatprep.mubr.msk.f32.mxu1 %vm281_vm1, %v275_v22  ;;  %s6738_s22 = scalar_lea.vmem %s5475_s21, 256  ;;  %p6743_p12 = scmp.lt.s32.totalorder %s5475_s21, %s5475_s21 }
  0x4f   :  { %v6863_v23 = vld [vmem:[#allocation2 + $0x8] sm:$0xff]  ;;  %p6739_p11 = scmp.ne.s32.totalorder %s5475_s21, %s6738_s22  ;;  %p6744_p13 = scmp.lt.s32.totalorder %s6738_s22, %s6738_s22 }
  0x50   :  { %v6865_v24 = vld [vmem:[#allocation3 + $0x8] sm:$0xff] }
  0x51   :  { %v276_v25 = vadd.f32 %v6865_v24, %v6863_v23  ;;  %p6745_p0 = por %p6744_p13, %p6743_p12 }
  0x53   :  { %5937 = vmatmul.mubr.msk.f32.vlgmr.msra.gmra.mxu1 %vm281_vm1, %v276_v25  ;;  %p6746_p1 = pnand %p6745_p0, %p6739_p11 }
  0x54   :  { %5947 = vmatprep.mubr.msk.f32.mxu1 %vm281_vm1, %v6856_v20 }
  0xb0   :  { %v374_v26 = vpop.permute.xlu0 %373 }
  0xb1   :  { %5939 = vmatprep.subr.mxu1 %v374_v26  ;;  %v370_v27 = vpop.permute.xlu1 %369 }
  0xb2   :  { %5940 = vmatpush3.msra.mxu1 %v374_v26 }
  0xb4   :  { %v372_v28 = vpop.permute.xlu0 %371 }
  0xb5   :  { %5941 = vmatprep.subr.mxu1 %v372_v28  ;;  %v368_v29 = vpop.permute.xlu1 %367 }
  0xb6   :  { %5942 = vmatpush3.msra.mxu1 %v372_v28 }
  0xb7   :  { %5943 = vmatprep.subr.mxu1 %v370_v27 }
  0xb8   :  { %5944 = vmatpush3.msra.mxu1 %v370_v27 }
  0xb9   :  { %5945 = vmatprep.subr.mxu1 %v368_v29 }
  0xba   :  { %5946 = vmatpush3.msra.mxu1 %v368_v29 }
  0xbb   :  { %5948 = vmatmul.mubr.msk.f32.vlgmr.msra.gmra.mxu1 %vm281_vm1, %v6863_v23 }
 0x113   :  { %v5938_v38 = vpop.f32.mrf.mxu1 }
 0x114   :  { %v6891_v39 = vadd.f32 %v5938_v38, %v280_v34 }
 0x115   :  { %v354_v40 = vpop.f32.mrf.mxu1 }
 0x116   :  { %v6901_v43 = vadd.f32 %v354_v40, %v280_v34  ;;  %474 = vrot.lane.b32.xlu0 %v6891_v39, %s6776_s4  ;;  %v469_v48 = vmul.f32 %v6895_v41, %v6891_v39  ;;  %v591_v49 = vmul.f32 %v6899_v42, %v6891_v39 }
 0x118   :  { %472 = vrot.lane.b32.xlu1 %v6901_v43, %s6776_s4  ;;  %v468_v44 = vmul.f32 %v6895_v41, %v6901_v43  ;;  %v590_v45 = vmul.f32 %v6899_v42, %v6901_v43 }
 0x11a   :  { %5954 = vmatprep.mubr.msk.f32.mxu0 %vm281_vm1, %v468_v44  ;;  %5961 = vmatprep.mubr.msk.f32.mxu1 %vm281_vm1, %v590_v45  ;;  %v6977_v44 = vsub.s32 5, %v6874_v31 }
 0x17b   :  { %v5949_v50 = vpop.f32.mrf.mxu1 }
 0x17d   :  { %v455_v51 = vpop.f32.mrf.mxu1 }
 0x188   :  { %v6913_v46 = vpop.permute.xlu0 %474 }
 0x189   :  { %5950 = vmatprep.subr.msk.mxu0 %vm281_vm1, %v6913_v46  ;;  %5957 = vmatprep.subr.msk.mxu1 %vm281_vm1, %v6913_v46 }
 0x18a   :  { %5951 = vmatpush3.xpose.msk.msra.mxu0 %vm281_vm1, %v6913_v46  ;;  %5958 = vmatpush3.xpose.msk.msra.mxu1 %vm281_vm1, %v6913_v46  ;;  %v6923_v47 = vpop.permute.xlu1 %472 }
 0x18b   :  { %5952 = vmatprep.subr.msk.mxu0 %vm281_vm1, %v6923_v47  ;;  %5959 = vmatprep.subr.msk.mxu1 %vm281_vm1, %v6923_v47 }
 0x18e   :  { %5953 = vmatpush3.xpose.msk.msra.mxu0 %vm281_vm1, %v6923_v47  ;;  %5960 = vmatpush3.xpose.msk.msra.mxu1 %vm281_vm1, %v6923_v47 }
 0x191   :  { %5955 = vmatmul.mubr.msk.f32.vlgmr.msra.gmra.mxu0 %vm281_vm1, %v469_v48  ;;  %5962 = vmatmul.mubr.msk.f32.vlgmr.msra.gmra.mxu1 %vm281_vm1, %v591_v49  ;;  %v863_v48 = vmul.f32 %v6957_v8, %v6901_v43  ;;  %v6987_v49 = vrot.slane %v6889_v37, %v6977_v44 }
 0x251   :  { %v5963_v53 = vpop.f32.mrf.mxu1  ;;  %v5956_v12 = vpop.f32.mrf.mxu0 }
 0x252   :  { %v670_v55 = vadd.f32 %v5963_v53, %v6939_v52  ;;  %v558_v19 = vadd.f32 %v5956_v12, %v6939_v52  ;;  %v864_v53 = vmul.f32 %v6957_v8, %v6891_v39 }
 0x253   :  { %v664_v56 = vpop.f32.mrf.mxu1  ;;  %v552_v16 = vpop.f32.mrf.mxu0 }
 0x254   :  { %v665_v57 = vadd.f32 %v664_v56, %v6941_v54  ;;  %v676_v58 = vsel %vm561_vm2, %v670_v55, -inf  ;;  %v553_v17 = vadd.f32 %v552_v16, %v6941_v54  ;;  %v565_v25 = vsel %vm561_vm2, %v558_v19, -inf }
 0x255   :  { %677 = vmax.xlane.f32.xlu1 %v676_v58 }
 0x256   :  { %v673_v59 = vsel %vm561_vm2, %v665_v57, -inf  ;;  %v562_v22 = vsel %vm561_vm2, %v553_v17, -inf }
 0x257   :  { %674 = vmax.xlane.f32.xlu0 %v673_v59 }
 0x266   :  { %380 = vrot.lane.b32.xlu1 %v280_v34, %s6775_s2 }
 0x2de   :  { %v678_v60 = vpop.xlane.xlu1 %677 }
 0x2df   :  { %v680_v61 = vsub.f32 %v670_v55, %v678_v60 }
 0x2e0   :  { %v675_v62 = vpop.xlane.xlu0 %674 }
 0x2e1   :  { %v679_v63 = vsub.f32 %v665_v57, %v675_v62  ;;  %v683_v2 = vmul.f32 1.442695, %v680_v61 }
 0x2e2   :  { %v381_v1 = vpop.permute.xlu1 %380 }
 0x2e3   :  { %v681_v3 = vmul.f32 1.442695, %v679_v63  ;;  %v6951_v4 = vadd.f32 %v455_v51, %v381_v1  ;;  %v461_v5 = vadd.f32 %v5949_v50, %v381_v1 }
 0x2e5   :  { %6455 = vpow2.f32 %v681_v3  ;;  %v696_v6 = vmul.f32 %v6899_v42, %v461_v5  ;;  %v585_v7 = vmul.f32 %v6895_v41, %v461_v5  ;;  %v695_v9 = vmul.f32 %v6899_v42, %v6951_v4 }
 0x2e6   :  { %6457 = vpow2.f32 %v683_v2  ;;  %v584_v10 = vmul.f32 %v6895_v41, %v6951_v4  ;;  %v6964_v11 = vmul.f32 %v6957_v8, %v461_v5  ;;  %v1163_v50 = vmul.f32 %v6987_v49, %v461_v5 }
 0x2e7   :  { %5964 = vmatprep.subr.mxu0 %v696_v6  ;;  %5971 = vmatprep.subr.mxu1 %v585_v7  ;;  %v1162_v37 = vmul.f32 %v6987_v49, %v6951_v4 }
 0x2e8   :  { %5965 = vmatpush3.msra.mxu0 %v696_v6  ;;  %5972 = vmatpush3.msra.mxu1 %v585_v7 }
 0x2e9   :  { %5966 = vmatprep.subr.mxu0 %v695_v9  ;;  %5973 = vmatprep.subr.mxu1 %v584_v10 }
 0x2ea   :  { %5967 = vmatpush3.msra.mxu0 %v695_v9  ;;  %5974 = vmatpush3.msra.mxu1 %v584_v10 }
 0x2eb   :  { %5978 = vmatprep.subr.msk.mxu0 %vm281_vm1, %v6913_v46  ;;  %5985 = vmatprep.subr.mxu1 %v6964_v11 }
 0x2f2   :  { %v6456_v13 = vpop.eup %6455 }
 0x2f3   :  { %v685_v14 = vsel %vm561_vm2, %v6456_v13, 0.0  ;;  %v6458_v15 = vpop.eup %6457 }
 0x2f4   :  { %686 = vadd.xlane.f32.xlu0 %v685_v14  ;;  %v688_v18 = vsel %vm561_vm2, %v6458_v15, 0.0 }
 0x2f8   :  { %689 = vadd.xlane.f32.xlu0 %v688_v18 }
 0x2fc   :  { %563 = vmax.xlane.f32.xlu0 %v562_v22 }
 0x300   :  { %566 = vmax.xlane.f32.xlu0 %v565_v25 }
 0x37d   :  { %v687_v26 = vpop.xlane.xlu0 %686 }
 0x37e   :  { %6459 = vrcp.f32 %v687_v26 }
 0x381   :  { %v690_v27 = vpop.xlane.xlu0 %689 }
 0x382   :  { %6461 = vrcp.f32 %v690_v27 }
 0x385   :  { %v564_v28 = vpop.xlane.xlu0 %563 }
 0x386   :  { %v568_v29 = vsub.f32 %v553_v17, %v564_v28 }
 0x388   :  { %v570_v30 = vmul.f32 1.442695, %v568_v29  ;;  %v968_v29 = vmul.f32 %v6957_v8, %v6951_v4  ;;  %v1057_v4 = vmul.f32 %v6987_v49, %v6901_v43 }
 0x389   :  { %v567_v59 = vpop.xlane.xlu0 %566 }
 0x38a   :  { %6463 = vpow2.f32 %v570_v30  ;;  %v569_v60 = vsub.f32 %v558_v19, %v567_v59 }
 0x38b   :  { %v6460_v34 = vpop.eup %6459 }
 0x38c   :  { %v693_v38 = vmul.f32 %v6460_v34, %v6456_v13  ;;  %v572_v61 = vmul.f32 1.442695, %v569_v60 }
 0x38e   :  { %5968 = vmatprep.mubr.msk.f32.mxu0 %vm561_vm2, %v693_v38 }
 0x38f   :  { %v6462_v40 = vpop.eup %6461 }
 0x390   :  { %v694_v45 = vmul.f32 %v6462_v40, %v6458_v15 }
 0x392   :  { %5969 = vmatmul.mubr.msk.f32.vlgmr.msra.gmra.mxu0 %vm561_vm2, %v694_v45 }
 0x393   :  { %5979 = vmatpush3.xpose.msk.msra.mxu0 %vm281_vm1, %v6913_v46  ;;  %5982 = vmatprep.mubr.msk.f32.mxu0 %vm281_vm1, %v863_v48 }
 0x394   :  { %5980 = vmatprep.subr.msk.mxu0 %vm281_vm1, %v6923_v47 }
 0x397   :  { %v6464_v51 = vpop.eup %6463  ;;  %5981 = vmatpush3.xpose.msk.msra.mxu0 %vm281_vm1, %v6923_v47 }
 0x398   :  { %5999 = vmatprep.subr.mxu0 %v1163_v50  ;;  %v574_v55 = vsel %vm561_vm2, %v6464_v51, 0.0 }
 0x399   :  { %575 = vadd.xlane.f32.xlu1 %v574_v55 }
 0x39a   :  { %5983 = vmatmul.mubr.msk.f32.vlgmr.msra.gmra.mxu0 %vm281_vm1, %v864_v53 }
 0x39b   :  { %6000 = vmatpush3.msra.mxu0 %v1163_v50 }
 0x39c   :  { %6001 = vmatprep.subr.mxu0 %v1162_v37 }
 0x39d   :  { %6002 = vmatpush3.msra.mxu0 %v1162_v37 }
 0x422   :  { %v576_v56 = vpop.xlane.xlu1 %575 }
 0x423   :  { %6465 = vrcp.f32 %v576_v56 }
 0x424   :  { %6467 = vpow2.f32 %v572_v61 }
 0x430   :  { %v6466_v57 = vpop.eup %6465 }
 0x431   :  { %v582_v58 = vmul.f32 %v6466_v57, %v6464_v51  ;;  %v6468_v9 = vpop.eup %6467 }
 0x432   :  { %v577_v10 = vsel %vm561_vm2, %v6468_v9, 0.0 }
 0x433   :  { %5975 = vmatprep.mubr.msk.f32.mxu1 %vm561_vm2, %v582_v58 }
 0x452   :  { %v5970_v62 = vpop.f32.mrf.mxu0 }
 0x454   :  { %v7001_v63 = vpop.f32.mrf.mxu0 }
 0x45a   :  { %v5984_v1 = vpop.f32.mrf.mxu0 }
 0x45b   :  { %v943_v5 = vadd.f32 %v5984_v1, %v6939_v52 }
 0x45c   :  { %v937_v2 = vpop.f32.mrf.mxu0 }
 0x45d   :  { %v938_v3 = vadd.f32 %v937_v2, %v6941_v54  ;;  %v949_v7 = vsel %vm561_vm2, %v943_v5, -inf }
 0x45f   :  { %v946_v6 = vsel %vm561_vm2, %v938_v3, -inf }
 0x460   :  { %947 = vmax.xlane.f32.xlu0 %v946_v6 }
 0x464   :  { %950 = vmax.xlane.f32.xlu0 %v949_v7 }
 0x468   :  { %578 = vadd.xlane.f32.xlu0 %v577_v10 }
 0x4e9   :  { %v948_v12 = vpop.xlane.xlu0 %947 }
 0x4ea   :  { %v952_v13 = vsub.f32 %v938_v3, %v948_v12 }
 0x4ec   :  { %v954_v14 = vmul.f32 1.442695, %v952_v13 }
 0x4ed   :  { %v951_v15 = vpop.xlane.xlu0 %950 }
 0x4ee   :  { %6469 = vpow2.f32 %v954_v14  ;;  %v953_v16 = vsub.f32 %v943_v5, %v951_v15 }
 0x4f0   :  { %v956_v17 = vmul.f32 1.442695, %v953_v16 }
 0x4f1   :  { %v579_v18 = vpop.xlane.xlu0 %578 }
 0x4f2   :  { %6471 = vpow2.f32 %v956_v17  ;;  %v7042_v17 = vld [vmem:[#allocation14 + $0x50] sm:$0xff] }
 0x4f3   :  { %6473 = vrcp.f32 %v579_v18  ;;  %v7046_v18 = vld [vmem:[#allocation14 + $0x48] sm:$0xff] }
 0x4fb   :  { %v6470_v19 = vpop.eup %6469 }
 0x4fc   :  { %v958_v22 = vsel %vm561_vm2, %v6470_v19, 0.0 }
 0x4fd   :  { %959 = vadd.xlane.f32.xlu0 %v958_v22 }
 0x4ff   :  { %v6472_v25 = vpop.eup %6471 }
 0x500   :  { %v6474_v26 = vpop.eup %6473  ;;  %v961_v27 = vsel %vm561_vm2, %v6472_v25, 0.0 }
 0x501   :  { %962 = vadd.xlane.f32.xlu0 %v961_v27  ;;  %v583_v28 = vmul.f32 %v6474_v26, %v6468_v9  ;;  %v7036_v9 = vld [vmem:[#allocation14 + $0x58] sm:$0xff] }
 0x502   :  { %6006 = vmatprep.subr.mxu0 %v7036_v9 }
 0x503   :  { %5976 = vmatmul.mubr.msk.f32.vlgmr.msra.gmra.mxu1 %vm561_vm2, %v583_v28 }
 0x504   :  { %5986 = vmatpush3.msra.mxu1 %v6964_v11  ;;  %v1058_v11 = vmul.f32 %v6987_v49, %v6891_v39 }
 0x505   :  { %5987 = vmatprep.subr.mxu1 %v968_v29 }
 0x506   :  { %5988 = vmatpush3.msra.mxu1 %v968_v29 }
 0x507   :  { %5992 = vmatprep.subr.msk.mxu1 %vm281_vm1, %v6913_v46 }
 0x586   :  { %v960_v30 = vpop.xlane.xlu0 %959 }
 0x587   :  { %6475 = vrcp.f32 %v960_v30  ;;  %v7057_v30 = vld [vmem:[#allocation14 + $0x38] sm:$0xff] }
 0x588   :  { %1470 = vrot.lane.b32.xlu1 %v7057_v30, %s6776_s4 }
 0x58a   :  { %v963_v34 = vpop.xlane.xlu0 %962 }
 0x58b   :  { %6477 = vrcp.f32 %v963_v34  ;;  %v7062_v34 = vld [vmem:[#allocation14 + $0x28] sm:$0xff] }
 0x58c   :  { %1466 = vrot.lane.b32.xlu1 %v7062_v34, %s6776_s4 }
 0x594   :  { %v6476_v38 = vpop.eup %6475 }
 0x595   :  { %v966_v40 = vmul.f32 %v6476_v38, %v6470_v19  ;;  %v7049_v19 = vld [vmem:[#allocation14 + $0x40] sm:$0xff] }
 0x597   :  { %5989 = vmatprep.mubr.msk.f32.mxu1 %vm561_vm2, %v966_v40 }
 0x598   :  { %v6478_v45 = vpop.eup %6477 }
 0x599   :  { %v967_v48 = vmul.f32 %v6478_v45, %v6472_v25 }
 0x59b   :  { %5990 = vmatmul.mubr.msk.f32.vlgmr.msra.gmra.mxu1 %vm561_vm2, %v967_v48 }
 0x59c   :  { %5993 = vmatpush3.xpose.msk.msra.mxu1 %vm281_vm1, %v6913_v46  ;;  %5996 = vmatprep.mubr.msk.f32.mxu1 %vm281_vm1, %v1057_v4 }
 0x59d   :  { %5994 = vmatprep.subr.msk.mxu1 %vm281_vm1, %v6923_v47 }
 0x5a0   :  { %5995 = vmatpush3.xpose.msk.msra.mxu1 %vm281_vm1, %v6923_v47 }
 0x5a1   :  { %6017 = vmatprep.subr.mxu1 %v7057_v30 }
 0x5a3   :  { %5997 = vmatmul.mubr.msk.f32.vlgmr.msra.gmra.mxu1 %vm281_vm1, %v1058_v11 }
 0x5a4   :  { %6018 = vmatpush3.msra.mxu1 %v7057_v30 }
 0x5c3   :  { %v5977_v50 = vpop.f32.mrf.mxu1 }
 0x5c4   :  { %v856_v51 = vadd.f32 %v5977_v50, %v5970_v62 }
 0x5c5   :  { %v850_v43 = vpop.f32.mrf.mxu1 }
 0x5c6   :  { %v851_v22 = vadd.f32 %v850_v43, %v7001_v63  ;;  %v7068_v63 = vsub.s32 1, %v6874_v31 }
 0x5c8   :  { %v1250_v38 = vrot.slane %v6879_v33, %v7068_v63 }
 0x65b   :  { %v5991_v53 = vpop.f32.mrf.mxu1 }
 0x65c   :  { %v1052_v55 = vadd.f32 %v5991_v53, %v856_v51  ;;  %v7076_v53 = vld [vmem:[#allocation14 + $0x30] sm:$0xff] }
 0x65d   :  { %v1042_v37 = vpop.f32.mrf.mxu1  ;;  %6019 = vmatprep.subr.mxu1 %v7076_v53 }
 0x65e   :  { %v1051_v26 = vadd.f32 %v1042_v37, %v851_v22  ;;  %6020 = vmatpush3.msra.mxu1 %v7076_v53  ;;  %v170_v22 = vld [vmem:[#allocation9 + $0xa] sm:$0x3] }
 0x65f   :  { %6021 = vmatprep.subr.mxu1 %v7062_v34  ;;  %171 = vst.msk [vmem:[#allocation4 + $0xa] sm:$0x3] %vm90_vm0, %v170_v22 }
 0x660   :  { %6022 = vmatpush3.msra.mxu1 %v7062_v34 }
 0x663   :  { %v5998_v46 = vpop.f32.mrf.mxu1 }
 0x664   :  { %v1137_v58 = vadd.f32 %v5998_v46, %v6939_v52 }
 0x665   :  { %v1131_v56 = vpop.f32.mrf.mxu1 }
 0x666   :  { %v1132_v57 = vadd.f32 %v1131_v56, %v6941_v54  ;;  %v1143_v47 = vsel %vm561_vm2, %v1137_v58, -inf }
 0x668   :  { %v1140_v59 = vsel %vm561_vm2, %v1132_v57, -inf }
 0x669   :  { %1141 = vmax.xlane.f32.xlu0 %v1140_v59 }
 0x66d   :  { %1144 = vmax.xlane.f32.xlu0 %v1143_v47 }
 0x6f2   :  { %v1142_v39 = vpop.xlane.xlu0 %1141 }
 0x6f3   :  { %v1146_v60 = vsub.f32 %v1132_v57, %v1142_v39 }
 0x6f5   :  { %v1148_v61 = vmul.f32 1.442695, %v1146_v60 }
 0x6f6   :  { %v1145_v1 = vpop.xlane.xlu0 %1144 }
 0x6f7   :  { %6479 = vpow2.f32 %v1148_v61  ;;  %v1147_v62 = vsub.f32 %v1137_v58, %v1145_v1  ;;  %v136_v61 = vld [vmem:[#allocation9] sm:$0x3]  ;;  %v138_v1 = vld [vmem:[#allocation12] sm:$0x3] }
 0x6f8   :  { %137 = vst.msk [vmem:[#allocation4] sm:$0x3] %vm90_vm0, %v136_v61 }
 0x6f9   :  { %v1150_v2 = vmul.f32 1.442695, %v1147_v62  ;;  %v142_v62 = vld [vmem:[#allocation9 + $0x2] sm:$0x3] }
 0x6fa   :  { %143 = vst.msk [vmem:[#allocation4 + $0x2] sm:$0x3] %vm90_vm0, %v142_v62 }
 0x6fb   :  { %6481 = vpow2.f32 %v1150_v2  ;;  %v139_v2 = vadd.f32 %v138_v1, %v136_v61  ;;  %v226_v61 = vld [vmem:[#allocation9 + $0x1a] sm:$0x3] }
 0x6fc   :  { %227 = vst.msk [vmem:[#allocation4 + $0x1a] sm:$0x3] %vm90_vm0, %v226_v61 }
 0x6fd   :  { %140 = vst.msk [vmem:[#allocation5] sm:$0x3] %vm90_vm0, %v139_v2  ;;  %v233_v2 = vld [vmem:[#allocation9 + $0x1c] sm:$0x3] }
 0x6fe   :  { %234 = vst.msk [vmem:[#allocation4 + $0x1c] sm:$0x3] %vm90_vm0, %v233_v2 }
 0x704   :  { %v6480_v3 = vpop.eup %6479 }
 0x705   :  { %v1152_v5 = vsel %vm561_vm2, %v6480_v3, 0.0 }
 0x706   :  { %1153 = vadd.xlane.f32.xlu0 %v1152_v5  ;;  %v149_v5 = vld [vmem:[#allocation9 + $0x4] sm:$0x3] }
 0x707   :  { %150 = vst.msk [vmem:[#allocation4 + $0x4] sm:$0x3] %vm90_vm0, %v149_v5 }
 0x708   :  { %v6482_v6 = vpop.eup %6481 }
 0x709   :  { %v1155_v7 = vsel %vm561_vm2, %v6482_v6, 0.0 }
 0x70a   :  { %1156 = vadd.xlane.f32.xlu0 %v1155_v7 }
 0x78f   :  { %v1154_v10 = vpop.xlane.xlu0 %1153 }
 0x790   :  { %6483 = vrcp.f32 %v1154_v10 }
 0x793   :  { %v1157_v12 = vpop.xlane.xlu0 %1156 }
 0x794   :  { %6485 = vrcp.f32 %v1157_v12  ;;  %v156_v12 = vld [vmem:[#allocation9 + $0x6] sm:$0x3] }
 0x795   :  { %157 = vst.msk [vmem:[#allocation4 + $0x6] sm:$0x3] %vm90_vm0, %v156_v12 }
 0x79d   :  { %v6484_v13 = vpop.eup %6483 }
 0x79e   :  { %v1160_v14 = vmul.f32 %v6484_v13, %v6480_v3  ;;  %v145_v3 = vld [vmem:[#allocation12 + $0x2] sm:$0x3]  ;;  %v159_v13 = vld [vmem:[#allocation12 + $0x6] sm:$0x3] }
 0x79f   :  { %v146_v7 = vadd.f32 %v145_v3, %v142_v62  ;;  %v229_v62 = vld [vmem:[#allocation12 + $0x1a] sm:$0x3]  ;;  %v236_v3 = vld [vmem:[#allocation12 + $0x1c] sm:$0x3] }
 0x7a0   :  { %6003 = vmatprep.mubr.msk.f32.mxu0 %vm561_vm2, %v1160_v14  ;;  %v163_v14 = vld [vmem:[#allocation9 + $0x8] sm:$0x3] }
 0x7a1   :  { %v6486_v15 = vpop.eup %6485  ;;  %164 = vst.msk [vmem:[#allocation4 + $0x8] sm:$0x3] %vm90_vm0, %v163_v14  ;;  %147 = vst.msk [vmem:[#allocation5 + $0x2] sm:$0x3] %vm90_vm0, %v146_v7  ;;  %v240_v7 = vld [vmem:[#allocation9 + $0x1e] sm:$0x3] }
 0x7a2   :  { %v1161_v16 = vmul.f32 %v6486_v15, %v6482_v6  ;;  %v152_v6 = vld [vmem:[#allocation12 + $0x4] sm:$0x3]  ;;  %v160_v15 = vadd.f32 %v159_v13, %v156_v12  ;;  %241 = vst.msk [vmem:[#allocation4 + $0x1e] sm:$0x3] %vm90_vm0, %v240_v7 }
 0x7a3   :  { %v153_v10 = vadd.f32 %v152_v6, %v149_v5  ;;  %v230_v5 = vadd.f32 %v229_v62, %v226_v61  ;;  %v237_v6 = vadd.f32 %v236_v3, %v233_v2 }
 0x7a4   :  { %6004 = vmatmul.mubr.msk.f32.vlgmr.msra.gmra.mxu0 %vm561_vm2, %v1161_v16  ;;  %v166_v16 = vld [vmem:[#allocation12 + $0x8] sm:$0x3]  ;;  %161 = vst.msk [vmem:[#allocation5 + $0x6] sm:$0x3] %vm90_vm0, %v160_v15 }
 0x7a5   :  { %6007 = vmatpush3.msra.mxu0 %v7036_v9  ;;  %154 = vst.msk [vmem:[#allocation5 + $0x4] sm:$0x3] %vm90_vm0, %v153_v10  ;;  %v243_v10 = vld [vmem:[#allocation12 + $0x1e] sm:$0x3]  ;;  %231 = vst.msk [vmem:[#allocation5 + $0x1a] sm:$0x3] %vm90_vm0, %v230_v5 }
 0x7a6   :  { %6008 = vmatprep.subr.mxu0 %v7042_v17  ;;  %v244_v12 = vadd.f32 %v243_v10, %v240_v7  ;;  %238 = vst.msk [vmem:[#allocation5 + $0x1c] sm:$0x3] %vm90_vm0, %v237_v6 }
 0x7a7   :  { %6009 = vmatpush3.msra.mxu0 %v7042_v17 }
 0x7a8   :  { %6010 = vmatprep.subr.mxu0 %v7046_v18  ;;  %245 = vst.msk [vmem:[#allocation5 + $0x1e] sm:$0x3] %vm90_vm0, %v244_v12 }
 0x7a9   :  { %6011 = vmatpush3.msra.mxu0 %v7046_v18 }
 0x7aa   :  { %6012 = vmatprep.subr.mxu0 %v7049_v19 }
 0x7ab   :  { %6013 = vmatpush3.msra.mxu0 %v7049_v19 }
 0x7ac   :  { %v254_v13 = vld [vmem:[#allocation5] sm:$0xff] }
 0x864   :  { %v6005_v25 = vpop.f32.mrf.mxu0 }
 0x865   :  { %v1246_v29 = vadd.f32 %v6005_v25, %v1052_v55  ;;  %v7082_v55 = vld [vmem:[#allocation14 + $0x20] sm:$0xff]  ;;  %v173_v25 = vld [vmem:[#allocation12 + $0xa] sm:$0x3] }
 0x866   :  { %v1236_v27 = vpop.f32.mrf.mxu0  ;;  %6023 = vmatprep.subr.mxu1 %v7082_v55 }
 0x867   :  { %v1245_v28 = vadd.f32 %v1236_v27, %v1051_v26  ;;  %6024 = vmatpush3.msra.mxu1 %v7082_v55  ;;  %v167_v26 = vadd.f32 %v166_v16, %v163_v14  ;;  %v174_v27 = vadd.f32 %v173_v25, %v170_v22  ;;  %v7143_v14 = vrot.slane %v6879_v33, %v6884_v35 }
 0x869   :  { %6014 = vmatprep.mubr.msk.f32.mxu0 %vm281_vm1, %v1245_v28  ;;  %v177_v28 = vld [vmem:[#allocation9 + $0xc] sm:$0x3]  ;;  %168 = vst.msk [vmem:[#allocation5 + $0x8] sm:$0x3] %vm90_vm0, %v167_v26  ;;  %175 = vst.msk [vmem:[#allocation5 + $0xa] sm:$0x3] %vm90_vm0, %v174_v27 }
 0x86a   :  { %6015 = vmatmul.mubr.msk.f32.vlgmr.msra.gmra.mxu0 %vm281_vm1, %v1246_v29  ;;  %v180_v29 = vld [vmem:[#allocation12 + $0xc] sm:$0x3]  ;;  %178 = vst.msk [vmem:[#allocation4 + $0xc] sm:$0x3] %vm90_vm0, %v177_v28 }
 0x86b   :  { %6036 = vmatprep.mubr.msk.f32.mxu0 %vm281_vm1, %v254_v13 }
 0x92a   :  { %v6016_v40 = vpop.f32.mrf.mxu0 }
 0x92b   :  { %v1329_v48 = vadd.f32 %v6016_v40, %v1250_v38  ;;  %v181_v40 = vadd.f32 %v180_v29, %v177_v28 }
 0x92c   :  { %v1323_v45 = vpop.f32.mrf.mxu0 }
 0x92d   :  { %v1324_v4 = vadd.f32 %v1323_v45, %v1250_v38  ;;  %v1333_v43 = vadd.f32 %v1329_v48, %v6863_v23  ;;  %v184_v38 = vld [vmem:[#allocation9 + $0xe] sm:$0x3]  ;;  %v187_v45 = vld [vmem:[#allocation12 + $0xe] sm:$0x3]  ;;  %v191_v48 = vld [vmem:[#allocation9 + $0x10] sm:$0x3] }
 0x92e   :  { %185 = vst.msk [vmem:[#allocation4 + $0xe] sm:$0x3] %vm90_vm0, %v184_v38  ;;  %192 = vst.msk [vmem:[#allocation4 + $0x10] sm:$0x3] %vm90_vm0, %v191_v48 }
 0x92f   :  { %v1332_v11 = vadd.f32 %v1324_v4, %v6856_v20  ;;  %v1337_v51 = vsel %vm281_vm1, %v1333_v43, 0.0  ;;  %v1471_v20 = vpop.permute.xlu1 %1470  ;;  %v194_v4 = vld [vmem:[#allocation12 + $0x10] sm:$0x3]  ;;  %182 = vst.msk [vmem:[#allocation5 + $0xc] sm:$0x3] %vm90_vm0, %v181_v40 }
 0x930   :  { %6028 = vmatprep.subr.mxu0 %v1471_v20 }
 0x931   :  { %v1334_v50 = vsel %vm281_vm1, %v1332_v11, 0.0  ;;  %6029 = vmatpush3.msra.mxu0 %v1471_v20  ;;  %v205_v20 = vld [vmem:[#allocation9 + $0x14] sm:$0x3] }
 0x932   :  { %1335 = vadd.xlane.f32.xlu0 %v1334_v50  ;;  %v195_v50 = vadd.f32 %v194_v4, %v191_v48  ;;  %206 = vst.msk [vmem:[#allocation4 + $0x14] sm:$0x3] %vm90_vm0, %v205_v20  ;;  %v1363_v4 = vsub.s32 6, %v6874_v31 }
 0x933   :  { %v1467_v15 = vpop.permute.xlu1 %1466 }
 0x934   :  { %196 = vst.msk [vmem:[#allocation5 + $0x10] sm:$0x3] %vm90_vm0, %v195_v50 }
 0x936   :  { %1338 = vadd.xlane.f32.xlu0 %v1337_v51  ;;  %v201_v51 = vld [vmem:[#allocation12 + $0x12] sm:$0x3] }
 0x9bb   :  { %v1336_v23 = vpop.xlane.xlu0 %1335 }
 0x9bc   :  { %v1341_v37 = vmul.f32 0.03125, %v1336_v23 }
 0x9be   :  { %v7086_v46 = vsub.f32 %v1332_v11, %v1341_v37  ;;  %v188_v11 = vadd.f32 %v187_v45, %v184_v38  ;;  %v208_v37 = vld [vmem:[#allocation12 + $0x14] sm:$0x3] }
 0x9bf   :  { %v1339_v56 = vpop.xlane.xlu0 %1338 }
 0x9c0   :  { %v1342_v57 = vmul.f32 0.03125, %v1339_v56  ;;  %v1345_v58 = vmul.f32 %v7086_v46, %v7086_v46  ;;  %v212_v56 = vld [vmem:[#allocation9 + $0x16] sm:$0x3]  ;;  %189 = vst.msk [vmem:[#allocation5 + $0xe] sm:$0x3] %vm90_vm0, %v188_v11  ;;  %v1369_v11 = vsub.s32 7, %v6874_v31 }
 0x9c1   :  { %213 = vst.msk [vmem:[#allocation4 + $0x16] sm:$0x3] %vm90_vm0, %v212_v56 }
 0x9c2   :  { %v7090_v59 = vsub.f32 %v1333_v43, %v1342_v57  ;;  %v1347_v47 = vsel %vm281_vm1, %v1345_v58, 0.0  ;;  %v198_v43 = vld [vmem:[#allocation9 + $0x12] sm:$0x3]  ;;  %v215_v57 = vld [vmem:[#allocation12 + $0x16] sm:$0x3]  ;;  %v209_v58 = vadd.f32 %v208_v37, %v205_v20 }
 0x9c3   :  { %1348 = vadd.xlane.f32.xlu1 %v1347_v47  ;;  %v202_v23 = vadd.f32 %v201_v51, %v198_v43  ;;  %199 = vst.msk [vmem:[#allocation4 + $0x12] sm:$0x3] %vm90_vm0, %v198_v43  ;;  %v216_v47 = vadd.f32 %v215_v57, %v212_v56  ;;  %v1364_v43 = vrot.slane %v6879_v33, %v1363_v4 }
 0x9c4   :  { %v1346_v39 = vmul.f32 %v7090_v59, %v7090_v59  ;;  %210 = vst.msk [vmem:[#allocation5 + $0x14] sm:$0x3] %vm90_vm0, %v209_v58 }
 0x9c5   :  { %203 = vst.msk [vmem:[#allocation5 + $0x12] sm:$0x3] %vm90_vm0, %v202_v23  ;;  %217 = vst.msk [vmem:[#allocation5 + $0x16] sm:$0x3] %vm90_vm0, %v216_v47  ;;  %v1370_v23 = vrot.slane %v6879_v33, %v1369_v11 }
 0x9c6   :  { %v1350_v60 = vsel %vm281_vm1, %v1346_v39, 0.0  ;;  %v219_v39 = vld [vmem:[#allocation9 + $0x18] sm:$0x3] }
 0x9c7   :  { %1351 = vadd.xlane.f32.xlu0 %v1350_v60  ;;  %v222_v60 = vld [vmem:[#allocation12 + $0x18] sm:$0x3]  ;;  %220 = vst.msk [vmem:[#allocation4 + $0x18] sm:$0x3] %vm90_vm0, %v219_v39  ;;  %v255_v40 = vld [vmem:[#allocation5 + $0x8] sm:$0xff] }
 0x9c8   :  { %v223_v1 = vadd.f32 %v222_v60, %v219_v39 }
 0x9ca   :  { %224 = vst.msk [vmem:[#allocation5 + $0x18] sm:$0x3] %vm90_vm0, %v223_v1  ;;  %v250_v1 = vld [vmem:[#allocation4] sm:$0xff]  ;;  %v252_v62 = vld [vmem:[#allocation4 + $0x10] sm:$0xff] }
 0x9cc   :  { %v256_v48 = vld [vmem:[#allocation5 + $0x10] sm:$0xff] }
 0x9d1   :  { %v257_v50 = vld [vmem:[#allocation5 + $0x18] sm:$0xff] }
 0x9d4   :  { %1464 = vrot.lane.b32.xlu1 %v7082_v55, %s6776_s4 }
 0x9d8   :  { %1581 = vrot.lane.b32.xlu1 %v7076_v53, %s6775_s2 }
 0x9dc   :  { %1477 = vrot.lane.b32.xlu1 %v7143_v14, %s6776_s4 }
 0x9dd   :  { %1468 = vrot.lane.b32.xlu0 %v7076_v53, %s6776_s4 }
 0x9e0   :  { %1693 = vrot.lane.b32.xlu1 %v6941_v54, %s6777_s19 }
 0x9e1   :  { %1583 = vrot.lane.b32.xlu0 %v7057_v30, %s6775_s2 }
 0x9e5   :  { %1579 = vrot.lane.b32.xlu0 %v7062_v34, %s6775_s2 }
 0x9e9   :  { %1577 = vrot.lane.b32.xlu0 %v7082_v55, %s6775_s2 }
 0x9ed   :  { %1695 = vrot.lane.b32.xlu0 %v6939_v52, %s6777_s19 }
 0xa4c   :  { %v1349_v16 = vpop.xlane.xlu1 %1348 }
 0xa4d   :  { %v1353_v22 = vmul.f32 0.03125, %v1349_v16 }
 0xa4f   :  { %v1355_v25 = vadd.f32 1e-05, %v1353_v22 }
 0xa50   :  { %v1352_v26 = vpop.xlane.xlu0 %1351  ;;  %v1465_v38 = vpop.permute.xlu1 %1464 }
 0xa51   :  { %6487 = vrsqrt.f32 %v1355_v25  ;;  %v1354_v27 = vmul.f32 0.03125, %v1352_v26 }
 0xa53   :  { %v1356_v28 = vadd.f32 1e-05, %v1354_v27 }
 0xa54   :  { %v1469_v29 = vpop.permute.xlu0 %1468  ;;  %v1582_v61 = vpop.permute.xlu1 %1581 }
 0xa55   :  { %6489 = vrsqrt.f32 %v1356_v28  ;;  %6030 = vmatprep.subr.mxu0 %v1469_v29 }
 0xa56   :  { %6031 = vmatpush3.msra.mxu0 %v1469_v29 }
 0xa57   :  { %6032 = vmatprep.subr.mxu0 %v1467_v15 }
 0xa58   :  { %6033 = vmatpush3.msra.mxu0 %v1467_v15  ;;  %v1584_v45 = vpop.permute.xlu0 %1583  ;;  %v1478_v5 = vpop.permute.xlu1 %1477 }
 0xa59   :  { %6034 = vmatprep.subr.mxu0 %v1465_v38  ;;  %6042 = vmatprep.subr.mxu1 %v1584_v45 }
 0xa5a   :  { %6035 = vmatpush3.msra.mxu0 %v1465_v38 }
 0xa5b   :  { %6037 = vmatmul.mubr.msk.f32.vlgmr.msra.gmra.mxu0 %vm281_vm1, %v255_v40 }
 0xa5c   :  { %6039 = vmatprep.mubr.msk.f32.mxu0 %vm281_vm1, %v256_v48  ;;  %v1580_v33 = vpop.permute.xlu0 %1579 }
 0xa5e   :  { %v6488_v51 = vpop.eup %6487 }
 0xa5f   :  { %6040 = vmatmul.mubr.msk.f32.gmra.mxu0 %vm281_vm1, %v257_v50  ;;  %v1359_v20 = vmul.f32 %v6488_v51, %v7086_v46 }
 0xa61   :  { %v1365_v37 = vmul.f32 %v1364_v43, %v1359_v20 }
 0xa62   :  { %v6490_v56 = vpop.eup %6489 }
 0xa63   :  { %v1360_v57 = vmul.f32 %v6490_v56, %v7090_v59  ;;  %v7160_v58 = vadd.f32 %v1370_v23, %v1365_v37  ;;  %v1578_v59 = vpop.permute.xlu0 %1577 }
 0xa65   :  { %v1366_v47 = vmul.f32 %v1364_v43, %v1360_v57  ;;  %v1373_v39 = vadd.f32 %v7160_v58, %v6858_v21  ;;  %v251_v21 = vld [vmem:[#allocation4 + $0x8] sm:$0xff]  ;;  %v7236_v43 = vpop.permute.xlu1 %1693 }
 0xa67   :  { %v7164_v60 = vadd.f32 %v1370_v23, %v1366_v47  ;;  %6025 = vmatprep.mubr.msk.f32.mxu1 %vm281_vm1, %v1373_v39  ;;  %v7234_v48 = vpop.permute.xlu0 %1695 }
 0xa69   :  { %v1374_v46 = vadd.f32 %v7164_v60, %v6865_v24  ;;  %v253_v24 = vld [vmem:[#allocation4 + $0x18] sm:$0xff] }
 0xa6b   :  { %6026 = vmatmul.mubr.msk.f32.vlgmr.msra.gmra.mxu1 %vm281_vm1, %v1374_v46 }
 0xa6c   :  { %6043 = vmatpush3.msra.mxu1 %v1584_v45  ;;  %6050 = vmatprep.mubr.msk.f32.mxu1 %vm281_vm1, %v250_v1 }
 0xa6d   :  { %6044 = vmatprep.subr.mxu1 %v1582_v61 }
 0xa6e   :  { %6045 = vmatpush3.msra.mxu1 %v1582_v61 }
 0xa6f   :  { %6046 = vmatprep.subr.mxu1 %v1580_v33 }
 0xa70   :  { %6047 = vmatpush3.msra.mxu1 %v1580_v33 }
 0xa71   :  { %6048 = vmatprep.subr.mxu1 %v1578_v59 }
 0xa72   :  { %6049 = vmatpush3.msra.mxu1 %v1578_v59 }
 0xa73   :  { %6051 = vmatmul.mubr.msk.f32.vlgmr.msra.gmra.mxu1 %vm281_vm1, %v251_v21 }
 0xa74   :  { %6053 = vmatprep.mubr.msk.f32.mxu1 %vm281_vm1, %v252_v62 }
 0xa77   :  { %6054 = vmatmul.mubr.msk.f32.gmra.mxu1 %vm281_vm1, %v253_v24 }
 0xb1b   :  { %v6038_v2 = vpop.f32.mrf.mxu0 }
 0xb1c   :  { %v7192_v52 = vadd.f32 %v6038_v2, %v1478_v5 }
 0xb1d   :  { %v1558_v3 = vpop.f32.mrf.mxu0 }
 0xb1e   :  { %v7202_v54 = vadd.f32 %v1558_v3, %v1478_v5 }
 0xb1f   :  { %v6041_v6 = vpop.f32.mrf.mxu0 }
 0xb20   :  { %v7176_v7 = vadd.f32 %v6041_v6, %v1478_v5 }
 0xb21   :  { %v1568_v10 = vpop.f32.mrf.mxu0 }
 0xb22   :  { %v7178_v12 = vadd.f32 %v1568_v10, %v1478_v5  ;;  %6056 = vmatprep.subr.msk.mxu0 %vm281_vm1, %v7176_v7  ;;  %6067 = vmatprep.subr.msk.mxu1 %vm281_vm1, %v7176_v7 }
 0xb23   :  { %6057 = vmatpush3.xpose.msk.msra.mxu0 %vm281_vm1, %v7176_v7  ;;  %6068 = vmatpush3.xpose.msk.msra.mxu1 %vm281_vm1, %v7176_v7 }
 0xb24   :  { %6058 = vmatprep.subr.msk.mxu0 %vm281_vm1, %v7178_v12  ;;  %6069 = vmatprep.subr.msk.mxu1 %vm281_vm1, %v7178_v12 }
 0xb27   :  { %6059 = vmatpush3.xpose.msk.msra.mxu0 %vm281_vm1, %v7178_v12  ;;  %6070 = vmatpush3.xpose.msk.msra.mxu1 %vm281_vm1, %v7178_v12 }
 0xb28   :  { %6060 = vmatprep.subr.msk.mxu0 %vm281_vm1, %v7192_v52  ;;  %6071 = vmatprep.subr.msk.mxu1 %vm281_vm1, %v7192_v52 }
 0xb2b   :  { %v6027_v13 = vpop.f32.mrf.mxu1  ;;  %6061 = vmatpush3.xpose.msk.msra.mxu0 %vm281_vm1, %v7192_v52  ;;  %6072 = vmatpush3.xpose.msk.msra.mxu1 %vm281_vm1, %v7192_v52 }
 0xb2c   :  { %6062 = vmatprep.subr.msk.mxu0 %vm281_vm1, %v7202_v54  ;;  %6073 = vmatprep.subr.msk.mxu1 %vm281_vm1, %v7202_v54  ;;  %v7213_v16 = vadd.f32 %v6027_v13, %v7143_v14 }
 0xb2d   :  { %v1451_v15 = vpop.f32.mrf.mxu1 }
 0xb2e   :  { %v7216_v22 = vadd.f32 %v1451_v15, %v7143_v14  ;;  %v1690_v27 = vmul.f32 %v7213_v16, %v6895_v41  ;;  %v1819_v28 = vmul.f32 %v7213_v16, %v6899_v42 }
 0xb2f   :  { %6063 = vmatpush3.xpose.msk.msra.mxu0 %vm281_vm1, %v7202_v54  ;;  %6074 = vmatpush3.xpose.msk.msra.mxu1 %vm281_vm1, %v7202_v54 }
 0xb30   :  { %v1689_v25 = vmul.f32 %v7216_v22, %v6895_v41  ;;  %v1818_v26 = vmul.f32 %v7216_v22, %v6899_v42 }
 0xb32   :  { %6064 = vmatprep.mubr.msk.f32.mxu0 %vm281_vm1, %v1689_v25  ;;  %6075 = vmatprep.mubr.msk.f32.mxu1 %vm281_vm1, %v1818_v26 }
 0xb33   :  { %6065 = vmatmul.mubr.msk.f32.vlgmr.msra.gmra.mxu0 %vm281_vm1, %v1690_v27  ;;  %6076 = vmatmul.mubr.msk.f32.vlgmr.msra.gmra.mxu1 %vm281_vm1, %v1819_v28  ;;  %v6052_v29 = vpop.f32.mrf.mxu1 }
 0xb35   :  { %v1670_v38 = vpop.f32.mrf.mxu1 }
 0xb37   :  { %v6055_v40 = vpop.f32.mrf.mxu1 }
 0xb39   :  { %v1680_v45 = vpop.f32.mrf.mxu1 }
 0xbf3   :  { %v6077_v50 = vpop.f32.mrf.mxu1  ;;  %v6066_v59 = vpop.f32.mrf.mxu0 }
 0xbf4   :  { %v1898_v51 = vadd.f32 %v6077_v50, %v7234_v48  ;;  %v1789_v6 = vadd.f32 %v6066_v59, %v7234_v48 }
 0xbf5   :  { %v1892_v20 = vpop.f32.mrf.mxu1  ;;  %v1783_v1 = vpop.f32.mrf.mxu0 }
 0xbf6   :  { %v1893_v23 = vadd.f32 %v1892_v20, %v7236_v43  ;;  %v1904_v37 = vsel %vm281_vm1, %v1898_v51, -inf  ;;  %v7243_v62 = vadd.f32 %v1783_v1, %v7236_v43  ;;  %v1795_v10 = vsel %vm281_vm1, %v1789_v6, -inf }
 0xbf7   :  { %1905 = vmax.xlane.f32.xlu0 %v1904_v37  ;;  %v2089_v1 = vmul.f32 %v7216_v22, %v6957_v8 }
 0xbf8   :  { %v1901_v56 = vsel %vm281_vm1, %v1893_v23, -inf  ;;  %v1792_v5 = vsel %vm281_vm1, %v7243_v62, -inf }
 0xbf9   :  { %1902 = vmax.xlane.f32.xlu1 %v1901_v56 }
 0xc80   :  { %v1906_v57 = vpop.xlane.xlu0 %1905 }
 0xc81   :  { %v1908_v47 = vsub.f32 %v1898_v51, %v1906_v57 }
 0xc82   :  { %v1903_v39 = vpop.xlane.xlu1 %1902 }
 0xc83   :  { %v1911_v46 = vmul.f32 1.442695, %v1908_v47  ;;  %v1907_v61 = vsub.f32 %v1893_v23, %v1903_v39 }
 0xc85   :  { %6491 = vpow2.f32 %v1911_v46  ;;  %v1909_v33 = vmul.f32 1.442695, %v1907_v61 }
 0xc87   :  { %6493 = vpow2.f32 %v1909_v33 }
 0xc92   :  { %v6492_v21 = vpop.eup %6491 }
 0xc93   :  { %v1916_v24 = vsel %vm281_vm1, %v6492_v21, 0.0 }
 0xc94   :  { %v6494_v2 = vpop.eup %6493  ;;  %1917 = vadd.xlane.f32.xlu1 %v1916_v24 }
 0xc95   :  { %v1913_v3 = vsel %vm281_vm1, %v6494_v2, 0.0 }
 0xc96   :  { %1914 = vadd.xlane.f32.xlu0 %v1913_v3  ;;  %v2090_v3 = vmul.f32 %v7213_v16, %v6957_v8 }
 0xc98   :  { %1793 = vmax.xlane.f32.xlu1 %v1792_v5 }
 0xc9c   :  { %1796 = vmax.xlane.f32.xlu1 %v1795_v10 }
 0xcac   :  { %1589 = vrot.lane.b32.xlu0 %v7143_v14, %s6775_s2 }
 0xd1d   :  { %v1918_v13 = vpop.xlane.xlu1 %1917 }
 0xd1e   :  { %6495 = vrcp.f32 %v1918_v13 }
 0xd1f   :  { %v1915_v15 = vpop.xlane.xlu0 %1914 }
 0xd20   :  { %6497 = vrcp.f32 %v1915_v15 }
 0xd21   :  { %v7253_v25 = vpop.xlane.xlu1 %1793 }
 0xd22   :  { %v1798_v13 = vsub.f32 %v7243_v62, %v7253_v25 }
 0xd23   :  { %v1590_v26 = vpop.permute.xlu0 %1589 }
 0xd24   :  { %v7255_v27 = vadd.f32 %v1680_v45, %v1590_v26  ;;  %v1686_v28 = vadd.f32 %v6055_v40, %v1590_v26  ;;  %v7257_v20 = vadd.f32 %v6052_v29, %v1590_v26  ;;  %v7261_v14 = vadd.f32 %v1670_v38, %v1590_v26 }
 0xd25   :  { %v1797_v50 = vpop.xlane.xlu1 %1796  ;;  %v1800_v15 = vmul.f32 1.442695, %v1798_v13 }
 0xd26   :  { %v1799_v51 = vsub.f32 %v1789_v6, %v1797_v50  ;;  %v1926_v23 = vmul.f32 %v1686_v28, %v6899_v42  ;;  %v1817_v37 = vmul.f32 %v1686_v28, %v6895_v41  ;;  %v1925_v57 = vmul.f32 %v7255_v27, %v6899_v42 }
 0xd27   :  { %v1816_v45 = vmul.f32 %v7255_v27, %v6895_v41  ;;  %v1924_v29 = vmul.f32 %v7257_v20, %v6899_v42  ;;  %v1815_v38 = vmul.f32 %v7257_v20, %v6895_v41  ;;  %v1923_v39 = vmul.f32 %v7261_v14, %v6899_v42 }
 0xd28   :  { %v1802_v56 = vmul.f32 1.442695, %v1799_v51  ;;  %6078 = vmatprep.subr.mxu0 %v1926_v23  ;;  %6089 = vmatprep.subr.mxu1 %v1817_v37  ;;  %v1814_v46 = vmul.f32 %v7261_v14, %v6895_v41  ;;  %v7276_v33 = vmul.f32 %v1686_v28, %v6957_v8  ;;  %v2388_v5 = vmul.f32 %v7255_v27, %v6987_v49 }
 0xd29   :  { %6079 = vmatpush3.msra.mxu0 %v1926_v23  ;;  %6090 = vmatpush3.msra.mxu1 %v1817_v37  ;;  %v2387_v6 = vmul.f32 %v7257_v20, %v6987_v49  ;;  %v2386_v10 = vmul.f32 %v7261_v14, %v6987_v49  ;;  %v2195_v13 = vmul.f32 %v7257_v20, %v6957_v8 }
 0xd2a   :  { %6499 = vpow2.f32 %v1802_v56  ;;  %6080 = vmatprep.subr.mxu0 %v1925_v57  ;;  %6091 = vmatprep.subr.mxu1 %v1816_v45 }
 0xd2b   :  { %v6496_v40 = vpop.eup %6495  ;;  %6081 = vmatpush3.msra.mxu0 %v1925_v57  ;;  %6092 = vmatpush3.msra.mxu1 %v1816_v45  ;;  %6501 = vpow2.f32 %v1800_v15  ;;  %v2194_v15 = vmul.f32 %v7261_v14, %v6957_v8 }
 0xd2c   :  { %6082 = vmatprep.subr.mxu0 %v1924_v29  ;;  %6093 = vmatprep.subr.mxu1 %v1815_v38  ;;  %v1922_v59 = vmul.f32 %v6496_v40, %v6492_v21 }
 0xd2d   :  { %v6498_v47 = vpop.eup %6497  ;;  %6083 = vmatpush3.msra.mxu0 %v1924_v29  ;;  %6094 = vmatpush3.msra.mxu1 %v1815_v38 }
 0xd2e   :  { %v1921_v61 = vmul.f32 %v6498_v47, %v6494_v2  ;;  %6084 = vmatprep.subr.mxu0 %v1923_v39  ;;  %6095 = vmatprep.subr.mxu1 %v1814_v46  ;;  %v2389_v2 = vmul.f32 %v1686_v28, %v6987_v49 }
 0xd2f   :  { %6085 = vmatpush3.msra.mxu0 %v1923_v39  ;;  %6096 = vmatpush3.msra.mxu1 %v1814_v46 }
 0xd30   :  { %6086 = vmatprep.mubr.msk.f32.mxu0 %vm281_vm1, %v1921_v61  ;;  %6100 = vmatprep.subr.msk.mxu0 %vm281_vm1, %v7176_v7 }
 0xd31   :  { %6111 = vmatprep.subr.mxu1 %v7276_v33  ;;  %6087 = vmatmul.mubr.msk.f32.vlgmr.msra.gmra.mxu0 %vm281_vm1, %v1922_v59 }
 0xd32   :  { %6101 = vmatpush3.xpose.msk.msra.mxu0 %vm281_vm1, %v7176_v7  ;;  %6108 = vmatprep.mubr.msk.f32.mxu0 %vm281_vm1, %v2089_v1 }
 0xd33   :  { %6102 = vmatprep.subr.msk.mxu0 %vm281_vm1, %v7178_v12 }
 0xd36   :  { %6103 = vmatpush3.xpose.msk.msra.mxu0 %vm281_vm1, %v7178_v12 }
 0xd37   :  { %v6500_v21 = vpop.eup %6499  ;;  %6104 = vmatprep.subr.msk.mxu0 %vm281_vm1, %v7192_v52 }
 0xd38   :  { %v1807_v24 = vsel %vm281_vm1, %v6500_v21, 0.0  ;;  %v6502_v57 = vpop.eup %6501 }
 0xd39   :  { %1808 = vadd.xlane.f32.xlu0 %v1807_v24  ;;  %v1804_v62 = vsel %vm281_vm1, %v6502_v57, 0.0 }
 0xd3a   :  { %6105 = vmatpush3.xpose.msk.msra.mxu0 %vm281_vm1, %v7192_v52 }
 0xd3b   :  { %6106 = vmatprep.subr.msk.mxu0 %vm281_vm1, %v7202_v54 }
 0xd3e   :  { %6107 = vmatpush3.xpose.msk.msra.mxu0 %vm281_vm1, %v7202_v54 }
 0xd3f   :  { %6133 = vmatprep.subr.mxu0 %v2389_v2 }
 0xd41   :  { %6109 = vmatmul.mubr.msk.f32.vlgmr.msra.gmra.mxu0 %vm281_vm1, %v2090_v3 }
 0xd42   :  { %6134 = vmatpush3.msra.mxu0 %v2389_v2 }
 0xd43   :  { %6135 = vmatprep.subr.mxu0 %v2388_v5 }
 0xd44   :  { %6136 = vmatpush3.msra.mxu0 %v2388_v5 }
 0xd45   :  { %6137 = vmatprep.subr.mxu0 %v2387_v6 }
 0xd46   :  { %6138 = vmatpush3.msra.mxu0 %v2387_v6 }
 0xd47   :  { %6139 = vmatprep.subr.mxu0 %v2386_v10 }
 0xd48   :  { %6140 = vmatpush3.msra.mxu0 %v2386_v10  ;;  %v2196_v10 = vmul.f32 %v7255_v27, %v6957_v8 }
 0xd4f   :  { %2485 = vrot.lane.b32.xlu0 %v7042_v17, %s6776_s4 }
 0xdc2   :  { %v1809_v40 = vpop.xlane.xlu0 %1808 }
 0xdf1   :  { %v7315_v26 = vpop.f32.mrf.mxu0 }
 0xdf3   :  { %v7317_v28 = vpop.f32.mrf.mxu0 }
 0xe01   :  { %v6110_v50 = vpop.f32.mrf.mxu0 }
 0xe02   :  { %v2169_v37 = vadd.f32 %v6110_v50, %v7234_v48 }
 0xe03   :  { %v2163_v51 = vpop.f32.mrf.mxu0 }
 0xe04   :  { %v2164_v23 = vadd.f32 %v2163_v51, %v7236_v43  ;;  %v2175_v17 = vsel %vm281_vm1, %v2169_v37, -inf }
 0xe06   :  { %v2172_v56 = vsel %vm281_vm1, %v2164_v23, -inf }
 0xe07   :  { %2173 = vmax.xlane.f32.xlu1 %v2172_v56 }
 0xe0b   :  { %2176 = vmax.xlane.f32.xlu1 %v2175_v17 }
 0xe0f   :  { %1805 = vadd.xlane.f32.xlu1 %v1804_v62 }
 0xe90   :  { %v2174_v25 = vpop.xlane.xlu1 %2173 }
 0xe91   :  { %v2178_v45 = vsub.f32 %v2164_v23, %v2174_v25  ;;  %v2281_v23 = vmul.f32 %v7216_v22, %v6987_v49 }
 0xe93   :  { %v2180_v29 = vmul.f32 1.442695, %v2178_v45 }
 0xe94   :  { %v2177_v38 = vpop.xlane.xlu1 %2176 }
 0xe95   :  { %6503 = vpow2.f32 %v2180_v29  ;;  %v2179_v47 = vsub.f32 %v2169_v37, %v2177_v38 }
 0xe96   :  { %6505 = vrcp.f32 %v1809_v40 }
 0xe97   :  { %v2182_v39 = vmul.f32 1.442695, %v2179_v47 }
 0xe98   :  { %v1806_v46 = vpop.xlane.xlu1 %1805 }
 0xe99   :  { %6507 = vpow2.f32 %v2182_v39 }
 0xe9a   :  { %6509 = vrcp.f32 %v1806_v46 }
 0xea2   :  { %v6504_v61 = vpop.eup %6503 }
 0xea3   :  { %v2184_v59 = vsel %vm281_vm1, %v6504_v61, 0.0  ;;  %v6506_v1 = vpop.eup %6505 }
 0xea4   :  { %2185 = vadd.xlane.f32.xlu1 %v2184_v59  ;;  %v1813_v6 = vmul.f32 %v6506_v1, %v6500_v21 }
 0xea6   :  { %v6508_v24 = vpop.eup %6507 }
 0xea7   :  { %v6510_v2 = vpop.eup %6509  ;;  %v2187_v3 = vsel %vm281_vm1, %v6508_v24, 0.0 }
 0xea8   :  { %2188 = vadd.xlane.f32.xlu1 %v2187_v3  ;;  %v1812_v5 = vmul.f32 %v6510_v2, %v6502_v57 }
 0xeaa   :  { %6097 = vmatprep.mubr.msk.f32.mxu1 %vm281_vm1, %v1812_v5 }
 0xeab   :  { %6098 = vmatmul.mubr.msk.f32.vlgmr.msra.gmra.mxu1 %vm281_vm1, %v1813_v6 }
 0xeac   :  { %6112 = vmatpush3.msra.mxu1 %v7276_v33 }
 0xead   :  { %6113 = vmatprep.subr.mxu1 %v2196_v10 }
 0xeae   :  { %6114 = vmatpush3.msra.mxu1 %v2196_v10 }
 0xeaf   :  { %6115 = vmatprep.subr.mxu1 %v2195_v13 }
 0xeb0   :  { %6116 = vmatpush3.msra.mxu1 %v2195_v13  ;;  %v2486_v13 = vpop.permute.xlu0 %2485 }
 0xeb1   :  { %6117 = vmatprep.subr.mxu1 %v2194_v15 }
 0xeb2   :  { %6118 = vmatpush3.msra.mxu1 %v2194_v15 }
 0xeb3   :  { %6122 = vmatprep.subr.msk.mxu1 %vm281_vm1, %v7176_v7 }
 0xf2d   :  { %v2186_v21 = vpop.xlane.xlu1 %2185 }
 0xf2e   :  { %6511 = vrcp.f32 %v2186_v21 }
 0xf31   :  { %v2189_v27 = vpop.xlane.xlu1 %2188 }
 0xf32   :  { %6513 = vrcp.f32 %v2189_v27 }
 0xf3b   :  { %v6512_v33 = vpop.eup %6511 }
 0xf3c   :  { %v2192_v50 = vmul.f32 %v6512_v33, %v6504_v61 }
 0xf3e   :  { %6119 = vmatprep.mubr.msk.f32.mxu1 %vm281_vm1, %v2192_v50 }
 0xf3f   :  { %v6514_v20 = vpop.eup %6513 }
 0xf40   :  { %v2193_v51 = vmul.f32 %v6514_v20, %v6508_v24  ;;  %v7377_v20 = vld [vmem:[#allocation14 + $0x60] sm:$0xff] }
 0xf42   :  { %6120 = vmatmul.mubr.msk.f32.vlgmr.msra.gmra.mxu1 %vm281_vm1, %v2193_v51  ;;  %v2476_v51 = vrot.slane %v7377_v20, %v6887_v36 }
 0xf43   :  { %6123 = vmatpush3.xpose.msk.msra.mxu1 %vm281_vm1, %v7176_v7  ;;  %6130 = vmatprep.mubr.msk.f32.mxu1 %vm281_vm1, %v2281_v23  ;;  %v2282_v7 = vmul.f32 %v7213_v16, %v6987_v49 }
 0xf44   :  { %6124 = vmatprep.subr.msk.mxu1 %vm281_vm1, %v7178_v12 }
 0xf47   :  { %6125 = vmatpush3.xpose.msk.msra.mxu1 %vm281_vm1, %v7178_v12 }
 0xf48   :  { %6126 = vmatprep.subr.msk.mxu1 %vm281_vm1, %v7192_v52 }
 0xf4b   :  { %6127 = vmatpush3.xpose.msk.msra.mxu1 %vm281_vm1, %v7192_v52 }
 0xf4c   :  { %6128 = vmatprep.subr.msk.mxu1 %vm281_vm1, %v7202_v54 }
 0xf4f   :  { %6129 = vmatpush3.xpose.msk.msra.mxu1 %vm281_vm1, %v7202_v54 }
 0xf52   :  { %6131 = vmatmul.mubr.msk.f32.vlgmr.msra.gmra.mxu1 %vm281_vm1, %v2282_v7 }
 0xf6b   :  { %v6099_v22 = vpop.f32.mrf.mxu1 }
 0xf6c   :  { %v2086_v12 = vadd.f32 %v6099_v22, %v7315_v26 }
 0xf6d   :  { %v2080_v14 = vpop.f32.mrf.mxu1 }
0x1002   :  { %v6121_v37 = vpop.f32.mrf.mxu1 }
0x1003   :  { %v2280_v56 = vadd.f32 %v6121_v37, %v2086_v12 }
0x1004   :  { %v2270_v17 = vpop.f32.mrf.mxu1 }
0x1012   :  { %v6132_v57 = vpop.f32.mrf.mxu1 }
0x1013   :  { %v2361_v25 = vadd.f32 %v6132_v57, %v7234_v48 }
0x1014   :  { %v2355_v52 = vpop.f32.mrf.mxu1 }
0x1015   :  { %v2356_v62 = vadd.f32 %v2355_v52, %v7236_v43  ;;  %v2367_v16 = vsel %vm281_vm1, %v2361_v25, -inf }
0x1017   :  { %v2364_v54 = vsel %vm281_vm1, %v2356_v62, -inf }
0x1018   :  { %2365 = vmax.xlane.f32.xlu1 %v2364_v54 }
0x101c   :  { %2368 = vmax.xlane.f32.xlu1 %v2367_v16 }
0x10a1   :  { %v2366_v45 = vpop.xlane.xlu1 %2365 }
0x10a2   :  { %v2370_v29 = vsub.f32 %v2356_v62, %v2366_v45 }
0x10a4   :  { %v2372_v38 = vmul.f32 1.442695, %v2370_v29  ;;  %v6612_v29 = vld [vmem:[#allocation14 + $0x50] sm:$0xff] }
0x10a5   :  { %v2369_v40 = vpop.xlane.xlu1 %2368 }
0x10a6   :  { %6515 = vpow2.f32 %v2372_v38  ;;  %v2371_v26 = vsub.f32 %v2361_v25, %v2369_v40  ;;  %v6613_v38 = vld [vmem:[#allocation14 + $0x48] sm:$0xff]  ;;  %v6614_v40 = vld [vmem:[#allocation14 + $0x58] sm:$0xff] }
0x10a8   :  { %v2374_v47 = vmul.f32 1.442695, %v2371_v26  ;;  %v6615_v26 = vld [vmem:[#allocation14 + $0x40] sm:$0xff] }
0x10aa   :  { %6517 = vpow2.f32 %v2374_v47  ;;  %v6616_v47 = vld [vmem:[#allocation14 + $0x18] sm:$0xff] }
0x10b3   :  { %v6516_v39 = vpop.eup %6515 }
0x10b4   :  { %v2376_v46 = vsel %vm281_vm1, %v6516_v39, 0.0 }
0x10b5   :  { %2377 = vadd.xlane.f32.xlu1 %v2376_v46  ;;  %v6618_v46 = vld [vmem:[#allocation14 + $0x10] sm:$0xff] }
0x10b7   :  { %v6518_v61 = vpop.eup %6517 }
0x10b8   :  { %v2379_v59 = vsel %vm281_vm1, %v6518_v61, 0.0 }
0x10b9   :  { %2380 = vadd.xlane.f32.xlu1 %v2379_v59 }
0x10ca   :  { %2487 = vrot.lane.b32.xlu1 %v7036_v9, %s6776_s4 }
0x10ce   :  { %2483 = vrot.lane.b32.xlu1 %v7046_v18, %s6776_s4 }
0x10d2   :  { %2481 = vrot.lane.b32.xlu1 %v7049_v19, %s6776_s4  ;;  %v2081_v19 = vadd.f32 %v2080_v14, %v7317_v28 }
0x10d4   :  { %v2279_v21 = vadd.f32 %v2270_v17, %v2081_v19 }
0x113e   :  { %v2378_v1 = vpop.xlane.xlu1 %2377 }
0x113f   :  { %6519 = vrcp.f32 %v2378_v1 }
0x1142   :  { %v2381_v24 = vpop.xlane.xlu1 %2380 }
0x1143   :  { %6521 = vrcp.f32 %v2381_v24 }
0x1146   :  { %v2488_v2 = vpop.permute.xlu1 %2487 }
0x1147   :  { %6144 = vmatprep.subr.mxu0 %v2488_v2 }
0x114a   :  { %v2484_v9 = vpop.permute.xlu1 %2483 }
0x114c   :  { %v6520_v3 = vpop.eup %6519 }
0x114d   :  { %v2384_v5 = vmul.f32 %v6520_v3, %v6516_v39  ;;  %v6617_v39 = vld [vmem:[#allocation14 + $0x8] sm:$0xff] }
0x114e   :  { %v2482_v18 = vpop.permute.xlu1 %2481 }
0x114f   :  { %6141 = vmatprep.mubr.msk.f32.mxu0 %vm281_vm1, %v2384_v5 }
0x1150   :  { %v6522_v6 = vpop.eup %6521 }
0x1151   :  { %v2385_v10 = vmul.f32 %v6522_v6, %v6518_v61 }
0x1153   :  { %6142 = vmatmul.mubr.msk.f32.vlgmr.msra.gmra.mxu0 %vm281_vm1, %v2385_v10 }
0x1154   :  { %6145 = vmatpush3.msra.mxu0 %v2488_v2 }
0x1155   :  { %6146 = vmatprep.subr.mxu0 %v2486_v13 }
0x1156   :  { %6147 = vmatpush3.msra.mxu0 %v2486_v13  ;;  %v7407_v13 = vld [vmem:[#allocation14 + $0x68] sm:$0xf] }
0x1157   :  { %6148 = vmatprep.subr.mxu0 %v2484_v9  ;;  %v2605_v19 = vrot.slane %v7407_v13, %v6877_v32 }
0x1158   :  { %6149 = vmatpush3.msra.mxu0 %v2484_v9 }
0x1159   :  { %6150 = vmatprep.subr.mxu0 %v2482_v18 }
0x115a   :  { %6151 = vmatpush3.msra.mxu0 %v2482_v18 }
0x1213   :  { %v6143_v15 = vpop.f32.mrf.mxu0 }
0x1214   :  { %v2472_v50 = vadd.f32 %v6143_v15, %v2280_v56 }
0x1215   :  { %v2462_v27 = vpop.f32.mrf.mxu0 }
0x1216   :  { %v2471_v33 = vadd.f32 %v2462_v27, %v2279_v21 }
0x1218   :  { %6152 = vmatprep.mubr.msk.f32.mxu0 %vm281_vm1, %v2471_v33 }
0x1219   :  { %6153 = vmatmul.mubr.msk.f32.vlgmr.msra.gmra.mxu0 %vm281_vm1, %v2472_v50 }
0x12d9   :  { %v6154_v23 = vpop.f32.mrf.mxu0 }
0x12da   :  { %v2571_v7 = vadd.f32 %v6154_v23, %v2476_v51  ;;  %v2611_v23 = vrot.slane %v7407_v13, %v7068_v63 }
0x12db   :  { %v2565_v22 = vpop.f32.mrf.mxu0 }
0x12dc   :  { %v2566_v12 = vadd.f32 %v2565_v22, %v2476_v51  ;;  %v2575_v28 = vadd.f32 %v2571_v7, %v7164_v60 }
0x12de   :  { %v2579_v14 = vsel %vm281_vm1, %v2575_v28, 0.0  ;;  %v2574_v37 = vadd.f32 %v2566_v12, %v7160_v58 }
0x12df   :  { %2580 = vadd.xlane.f32.xlu0 %v2579_v14 }
0x12e0   :  { %v2576_v56 = vsel %vm281_vm1, %v2574_v37, 0.0 }
0x12e1   :  { %2577 = vadd.xlane.f32.xlu1 %v2576_v56  ;;  %v2617_v56 = vrot.slane %v7377_v20, %v6949_v0 }
0x1368   :  { %v2581_v17 = vpop.xlane.xlu0 %2580 }
0x1369   :  { %v2583_v57 = vmul.f32 0.03125, %v2581_v17 }
0x136a   :  { %v2578_v52 = vpop.xlane.xlu1 %2577 }
0x136b   :  { %v2585_v62 = vsub.f32 %v2575_v28, %v2583_v57  ;;  %v2582_v25 = vmul.f32 0.03125, %v2578_v52 }
0x136d   :  { %v7385_v54 = vsub.f32 %v2574_v37, %v2582_v25  ;;  %v2587_v16 = vmul.f32 %v2585_v62, %v2585_v62 }
0x136f   :  { %v2591_v45 = vsel %vm281_vm1, %v2587_v16, 0.0  ;;  %v2586_v60 = vmul.f32 %v7385_v54, %v7385_v54  ;;  %v2716_v16 = vrot.slane %v7377_v20, %v6977_v44  ;;  %v2863_v20 = vld [vmem:[#allocation14 + $0x70] sm:$0xff] }
0x1370   :  { %2592 = vadd.xlane.f32.xlu1 %v2591_v45 }
0x1371   :  { %v2588_v58 = vsel %vm281_vm1, %v2586_v60, 0.0 }
0x1372   :  { %2589 = vadd.xlane.f32.xlu0 %v2588_v58 }
0x1381   :  { %2622 = vrot.lane.b32.xlu1 %v6612_v29, %s6775_s2 }
0x1385   :  { %2620 = vrot.lane.b32.xlu1 %v6613_v38, %s6775_s2 }
0x1388   :  { %2624 = vrot.lane.b32.xlu0 %v6614_v40, %s6775_s2 }
0x1389   :  { %2731 = vrot.lane.b32.xlu1 %v7057_v30, %s6768_s23  ;;  %v6619_v30 = vld [vmem:[#allocation14] sm:$0xff] }
0x138c   :  { %2618 = vrot.lane.b32.xlu0 %v6615_v26, %s6775_s2 }
0x138d   :  { %2727 = vrot.lane.b32.xlu1 %v7062_v34, %s6768_s23 }
0x1390   :  { %2729 = vrot.lane.b32.xlu0 %v7076_v53, %s6768_s23 }
0x1391   :  { %2723 = vrot.lane.b32.xlu1 %v6616_v47, %s6768_s23 }
0x1394   :  { %2725 = vrot.lane.b32.xlu0 %v7082_v55, %s6768_s23 }
0x1395   :  { %2719 = vrot.lane.b32.xlu1 %v6617_v39, %s6768_s23  ;;  %v2866_v39 = vld [vmem:[#allocation14 + $0x88] sm:$0xff] }
0x1398   :  { %2721 = vrot.lane.b32.xlu0 %v6618_v46, %s6768_s23  ;;  %v2865_v46 = vld [vmem:[#allocation14 + $0x80] sm:$0xff] }
0x139c   :  { %2717 = vrot.lane.b32.xlu0 %v6619_v30, %s6768_s23  ;;  %v2864_v30 = vld [vmem:[#allocation14 + $0x78] sm:$0xff] }
0x13f9   :  { %v2593_v61 = vpop.xlane.xlu1 %2592 }
0x13fa   :  { %v2595_v34 = vmul.f32 0.03125, %v2593_v61 }
0x13fb   :  { %v2590_v59 = vpop.xlane.xlu0 %2589 }
0x13fc   :  { %v2597_v1 = vadd.f32 1e-05, %v2595_v34  ;;  %v2594_v53 = vmul.f32 0.03125, %v2590_v59 }
0x13fd   :  { %v2623_v24 = vpop.permute.xlu1 %2622 }
0x13fe   :  { %6523 = vrsqrt.f32 %v2597_v1  ;;  %v2596_v2 = vadd.f32 1e-05, %v2594_v53 }
0x13ff   :  { %v2625_v3 = vpop.permute.xlu0 %2624 }
0x1400   :  { %6525 = vrsqrt.f32 %v2596_v2  ;;  %6155 = vmatprep.subr.mxu1 %v2625_v3 }
0x1401   :  { %6156 = vmatpush3.msra.mxu1 %v2625_v3  ;;  %v2621_v55 = vpop.permute.xlu1 %2620 }
0x1402   :  { %6157 = vmatprep.subr.mxu1 %v2623_v24 }
0x1403   :  { %6158 = vmatpush3.msra.mxu1 %v2623_v24  ;;  %v2619_v5 = vpop.permute.xlu0 %2618 }
0x1404   :  { %6159 = vmatprep.subr.mxu1 %v2621_v55 }
0x1405   :  { %6160 = vmatpush3.msra.mxu1 %v2621_v55  ;;  %v2732_v6 = vpop.permute.xlu1 %2731 }
0x1406   :  { %6161 = vmatprep.subr.mxu1 %v2619_v5  ;;  %6166 = vmatprep.subr.mxu0 %v2732_v6 }
0x1407   :  { %6162 = vmatpush3.msra.mxu1 %v2619_v5  ;;  %v2730_v10 = vpop.permute.xlu0 %2729  ;;  %6167 = vmatpush3.msra.mxu0 %v2732_v6 }
0x1408   :  { %6168 = vmatprep.subr.mxu0 %v2730_v10  ;;  %6185 = vmatprep.subr.mxu1 %v2866_v39 }
0x1409   :  { %6169 = vmatpush3.msra.mxu0 %v2730_v10  ;;  %v2728_v9 = vpop.permute.xlu1 %2727 }
0x140a   :  { %6170 = vmatprep.subr.mxu0 %v2728_v9 }
0x140b   :  { %v6524_v18 = vpop.eup %6523  ;;  %v2726_v15 = vpop.permute.xlu0 %2725  ;;  %6171 = vmatpush3.msra.mxu0 %v2728_v9 }
0x140c   :  { %v2601_v21 = vmul.f32 %v6524_v18, %v2585_v62  ;;  %6172 = vmatprep.subr.mxu0 %v2726_v15 }
0x140d   :  { %v6526_v27 = vpop.eup %6525  ;;  %6173 = vmatpush3.msra.mxu0 %v2726_v15  ;;  %v2724_v33 = vpop.permute.xlu1 %2723 }
0x140e   :  { %v2600_v50 = vmul.f32 %v6526_v27, %v7385_v54  ;;  %6174 = vmatprep.subr.mxu0 %v2724_v33  ;;  %v2607_v51 = vmul.f32 %v2605_v19, %v2601_v21  ;;  %v2854_v27 = vrot.slane %v7407_v13, %v6884_v35 }
0x140f   :  { %v2722_v7 = vpop.permute.xlu0 %2721  ;;  %6175 = vmatpush3.msra.mxu0 %v2724_v33 }
0x1410   :  { %v2606_v22 = vmul.f32 %v2605_v19, %v2600_v50  ;;  %6176 = vmatprep.subr.mxu0 %v2722_v7  ;;  %v2613_v28 = vadd.f32 %v2611_v23, %v2607_v51 }
0x1411   :  { %6177 = vmatpush3.msra.mxu0 %v2722_v7  ;;  %v2720_v14 = vpop.permute.xlu1 %2719 }
0x1412   :  { %v2612_v12 = vadd.f32 %v2611_v23, %v2606_v22  ;;  %6178 = vmatprep.subr.mxu0 %v2720_v14  ;;  %v2860_v23 = vrot.slane %v7407_v13, %v6887_v36 }
0x1413   :  { %v2718_v37 = vpop.permute.xlu0 %2717  ;;  %6179 = vmatpush3.msra.mxu0 %v2720_v14 }
0x1414   :  { %6163 = vmatprep.mubr.msk.f32.mxu1 %vm281_vm1, %v2612_v12  ;;  %6180 = vmatprep.subr.mxu0 %v2718_v37 }
0x1415   :  { %6164 = vmatmul.mubr.msk.f32.vlgmr.msra.gmra.mxu1 %vm281_vm1, %v2613_v28  ;;  %6181 = vmatpush3.msra.mxu0 %v2718_v37 }
0x1416   :  { %6186 = vmatpush3.msra.mxu1 %v2866_v39 }
0x1417   :  { %6187 = vmatprep.subr.mxu1 %v2865_v46 }
0x1418   :  { %6188 = vmatpush3.msra.mxu1 %v2865_v46 }
0x1419   :  { %6189 = vmatprep.subr.mxu1 %v2864_v30 }
0x141a   :  { %6190 = vmatpush3.msra.mxu1 %v2864_v30 }
0x141b   :  { %6191 = vmatprep.subr.mxu1 %v2863_v20 }
0x141c   :  { %6192 = vmatpush3.msra.mxu1 %v2863_v20 }
0x14d5   :  { %v6165_v17 = vpop.f32.mrf.mxu1 }
0x14d6   :  { %v2708_v57 = vadd.f32 %v6165_v17, %v2617_v56 }
0x14d7   :  { %v2702_v52 = vpop.f32.mrf.mxu1 }
0x14d8   :  { %v2703_v62 = vadd.f32 %v2702_v52, %v2617_v56  ;;  %v2712_v54 = vmax.f32 %v2708_v57, 0.0  ;;  %v7438_v56 = vld [vmem:[#allocation3] sm:$0xff]  ;;  %v7442_v57 = vld [vmem:[#allocation3 + $0x8] sm:$0xff] }
0x14da   :  { %v2711_v25 = vmax.f32 %v2703_v62, 0.0 }
0x14dc   :  { %6182 = vmatprep.mubr.msk.f32.mxu0 %vm2741_vm3, %v2711_v25  ;;  %v7452_v25 = vld [vmem:[#allocation14 + $0xd0] sm:$0xff] }
0x14dd   :  { %6183 = vmatmul.mubr.msk.f32.vlgmr.msra.gmra.mxu0 %vm2741_vm3, %v2712_v54  ;;  %v2882_v54 = vrot.slane %v7452_v25, %v6877_v32 }
0x159d   :  { %v6184_v45 = vpop.f32.mrf.mxu0 }
0x159e   :  { %v2820_v60 = vadd.f32 %v6184_v45, %v2716_v16 }
0x159f   :  { %v2814_v58 = vpop.f32.mrf.mxu0 }
0x15a0   :  { %v2815_v29 = vadd.f32 %v2814_v58, %v2716_v16  ;;  %v2824_v38 = vadd.f32 %v2820_v60, %v2613_v28 }
0x15a2   :  { %v2828_v40 = vsel %vm281_vm1, %v2824_v38, 0.0  ;;  %v2823_v26 = vadd.f32 %v2815_v29, %v2612_v12 }
0x15a3   :  { %2829 = vadd.xlane.f32.xlu0 %v2828_v40 }
0x15a4   :  { %v2825_v47 = vsel %vm281_vm1, %v2823_v26, 0.0 }
0x15a5   :  { %2826 = vadd.xlane.f32.xlu1 %v2825_v47 }
0x162c   :  { %v2830_v61 = vpop.xlane.xlu0 %2829 }
0x162d   :  { %v2832_v34 = vmul.f32 0.03125, %v2830_v61  ;;  %v7496_v61 = vld [vmem:[#allocation14 + $0xf0] sm:$0xff] }
0x162e   :  { %v2827_v59 = vpop.xlane.xlu1 %2826 }
0x162f   :  { %v2834_v1 = vsub.f32 %v2824_v38, %v2832_v34  ;;  %v2831_v53 = vmul.f32 0.03125, %v2827_v59 }
0x1631   :  { %v2833_v24 = vsub.f32 %v2823_v26, %v2831_v53  ;;  %v2836_v2 = vmul.f32 %v2834_v1, %v2834_v1 }
0x1633   :  { %v2840_v3 = vsel %vm281_vm1, %v2836_v2, 0.0  ;;  %v2835_v55 = vmul.f32 %v2833_v24, %v2833_v24 }
0x1634   :  { %2841 = vadd.xlane.f32.xlu1 %v2840_v3 }
0x1635   :  { %v2837_v5 = vsel %vm281_vm1, %v2835_v55, 0.0 }
0x1636   :  { %2838 = vadd.xlane.f32.xlu0 %v2837_v5 }
0x1645   :  { %2972 = vrot.lane.b32.xlu1 %v2865_v46, %s6775_s2 }
0x1649   :  { %2970 = vrot.lane.b32.xlu1 %v2864_v30, %s6775_s2 }
0x164c   :  { %2974 = vrot.lane.b32.xlu0 %v2866_v39, %s6775_s2 }
0x1650   :  { %2968 = vrot.lane.b32.xlu0 %v2863_v20, %s6775_s2 }
0x16bd   :  { %v2842_v6 = vpop.xlane.xlu1 %2841 }
0x16be   :  { %v2844_v10 = vmul.f32 0.03125, %v2842_v6 }
0x16bf   :  { %v2839_v9 = vpop.xlane.xlu0 %2838 }
0x16c0   :  { %v2846_v18 = vadd.f32 1e-05, %v2844_v10  ;;  %v2843_v19 = vmul.f32 0.03125, %v2839_v9 }
0x16c1   :  { %v2973_v14 = vpop.permute.xlu1 %2972 }
0x16c2   :  { %6527 = vrsqrt.f32 %v2846_v18  ;;  %v2845_v15 = vadd.f32 1e-05, %v2843_v19 }
0x16c3   :  { %v2975_v21 = vpop.permute.xlu0 %2974 }
0x16c4   :  { %6529 = vrsqrt.f32 %v2845_v15  ;;  %6196 = vmatprep.subr.mxu1 %v2975_v21 }
0x16c5   :  { %v2971_v13 = vpop.permute.xlu1 %2970 }
0x16c7   :  { %v2969_v62 = vpop.permute.xlu0 %2968 }
0x16cf   :  { %v6528_v33 = vpop.eup %6527 }
0x16d0   :  { %v2850_v50 = vmul.f32 %v6528_v33, %v2834_v1  ;;  %v7499_v1 = vld [vmem:[#allocation14 + $0xe8] sm:$0xff] }
0x16d1   :  { %v6530_v51 = vpop.eup %6529 }
0x16d2   :  { %v2849_v7 = vmul.f32 %v6530_v51, %v2833_v24  ;;  %v2856_v22 = vmul.f32 %v2854_v27, %v2850_v50 }
0x16d4   :  { %v2855_v12 = vmul.f32 %v2854_v27, %v2849_v7  ;;  %v7434_v28 = vadd.f32 %v2860_v23, %v2856_v22 }
0x16d6   :  { %v7436_v37 = vadd.f32 %v2860_v23, %v2855_v12  ;;  %v2878_v52 = vadd.f32 %v7442_v57, %v7434_v28 }
0x16d8   :  { %v2877_v17 = vadd.f32 %v7438_v56, %v7436_v37 }
0x16da   :  { %6193 = vmatprep.mubr.msk.f32.mxu1 %vm281_vm1, %v2877_v17 }
0x16db   :  { %6194 = vmatmul.mubr.msk.f32.vlgmr.msra.gmra.mxu1 %vm281_vm1, %v2878_v52 }
0x16dc   :  { %6197 = vmatpush3.msra.mxu1 %v2975_v21  ;;  %6204 = vmatprep.mubr.msk.f32.mxu1 %vm281_vm1, %v7436_v37 }
0x16dd   :  { %6198 = vmatprep.subr.mxu1 %v2973_v14 }
0x16de   :  { %6199 = vmatpush3.msra.mxu1 %v2973_v14 }
0x16df   :  { %6200 = vmatprep.subr.mxu1 %v2971_v13 }
0x16e0   :  { %6201 = vmatpush3.msra.mxu1 %v2971_v13 }
0x16e1   :  { %6202 = vmatprep.subr.mxu1 %v2969_v62 }
0x16e2   :  { %6203 = vmatpush3.msra.mxu1 %v2969_v62 }
0x16e3   :  { %6205 = vmatmul.mubr.msk.f32.vlgmr.msra.gmra.mxu1 %vm281_vm1, %v7434_v28 }
0x179b   :  { %v6195_v16 = vpop.f32.mrf.mxu1 }
0x179c   :  { %v7456_v45 = vadd.f32 %v6195_v16, %v2882_v54 }
0x179d   :  { %v2955_v60 = vpop.f32.mrf.mxu1 }
0x179e   :  { %v7458_v58 = vadd.f32 %v2955_v60, %v2882_v54  ;;  %3071 = vrot.lane.b32.xlu1 %v7456_v45, %s6776_s4  ;;  %v3066_v47 = vmul.f32 %v7456_v45, %v6895_v41  ;;  %v3183_v39 = vmul.f32 %v7456_v45, %v6899_v42 }
0x17a0   :  { %3069 = vrot.lane.b32.xlu0 %v7458_v58, %s6776_s4  ;;  %v3065_v29 = vmul.f32 %v7458_v58, %v6895_v41  ;;  %v3182_v38 = vmul.f32 %v7458_v58, %v6899_v42 }
0x17a2   :  { %6211 = vmatprep.mubr.msk.f32.mxu0 %vm281_vm1, %v3065_v29  ;;  %6218 = vmatprep.mubr.msk.f32.mxu1 %vm281_vm1, %v3182_v38 }
0x17a3   :  { %v6206_v46 = vpop.f32.mrf.mxu1 }
0x17a5   :  { %v3056_v30 = vpop.f32.mrf.mxu1 }
0x1810   :  { %v7470_v40 = vpop.permute.xlu1 %3071 }
0x1811   :  { %6207 = vmatprep.subr.msk.mxu0 %vm281_vm1, %v7470_v40  ;;  %6214 = vmatprep.subr.msk.mxu1 %vm281_vm1, %v7470_v40 }
0x1812   :  { %v7476_v26 = vpop.permute.xlu0 %3069  ;;  %6208 = vmatpush3.xpose.msk.msra.mxu0 %vm281_vm1, %v7470_v40  ;;  %6215 = vmatpush3.xpose.msk.msra.mxu1 %vm281_vm1, %v7470_v40 }
0x1813   :  { %6209 = vmatprep.subr.msk.mxu0 %vm281_vm1, %v7476_v26  ;;  %6216 = vmatprep.subr.msk.mxu1 %vm281_vm1, %v7476_v26 }
0x1816   :  { %6210 = vmatpush3.xpose.msk.msra.mxu0 %vm281_vm1, %v7476_v26  ;;  %6217 = vmatpush3.xpose.msk.msra.mxu1 %vm281_vm1, %v7476_v26 }
0x1819   :  { %6212 = vmatmul.mubr.msk.f32.vlgmr.msra.gmra.mxu0 %vm281_vm1, %v3066_v47  ;;  %6219 = vmatmul.mubr.msk.f32.vlgmr.msra.gmra.mxu1 %vm281_vm1, %v3183_v39 }
0x18d9   :  { %v6220_v20 = vpop.f32.mrf.mxu1  ;;  %v6213_v18 = vpop.f32.mrf.mxu0 }
0x18da   :  { %v3262_v34 = vadd.f32 %v7496_v61, %v6220_v20  ;;  %v3155_v51 = vadd.f32 %v7496_v61, %v6213_v18  ;;  %v3452_v20 = vmul.f32 %v7456_v45, %v6957_v8 }
0x18db   :  { %v3256_v59 = vpop.f32.mrf.mxu1  ;;  %v3149_v19 = vpop.f32.mrf.mxu0 }
0x18dc   :  { %v3257_v53 = vadd.f32 %v7499_v1, %v3256_v59  ;;  %v3268_v24 = vsel %vm561_vm2, %v3262_v34, -inf  ;;  %v3150_v21 = vadd.f32 %v7499_v1, %v3149_v19  ;;  %v3161_v7 = vsel %vm561_vm2, %v3155_v51, -inf }
0x18dd   :  { %3269 = vmax.xlane.f32.xlu0 %v3268_v24 }
0x18de   :  { %v3265_v2 = vsel %vm561_vm2, %v3257_v53, -inf  ;;  %v3158_v23 = vsel %vm561_vm2, %v3150_v21, -inf }
0x18df   :  { %3266 = vmax.xlane.f32.xlu1 %v3265_v2 }
0x1966   :  { %v3270_v3 = vpop.xlane.xlu0 %3269 }
0x1967   :  { %v3272_v55 = vsub.f32 %v3262_v34, %v3270_v3 }
0x1968   :  { %v3267_v5 = vpop.xlane.xlu1 %3266 }
0x1969   :  { %v3275_v6 = vmul.f32 1.442695, %v3272_v55  ;;  %v3271_v10 = vsub.f32 %v3257_v53, %v3267_v5 }
0x196b   :  { %6531 = vpow2.f32 %v3275_v6  ;;  %v3273_v9 = vmul.f32 1.442695, %v3271_v10 }
0x196d   :  { %6533 = vpow2.f32 %v3273_v9 }
0x1978   :  { %v6532_v15 = vpop.eup %6531 }
0x1979   :  { %v3280_v27 = vsel %vm561_vm2, %v6532_v15, 0.0 }
0x197a   :  { %v6534_v33 = vpop.eup %6533  ;;  %3281 = vadd.xlane.f32.xlu1 %v3280_v27 }
0x197b   :  { %v3277_v50 = vsel %vm561_vm2, %v6534_v33, 0.0 }
0x197c   :  { %3278 = vadd.xlane.f32.xlu0 %v3277_v50 }
0x197e   :  { %3159 = vmax.xlane.f32.xlu1 %v3158_v23 }
0x1982   :  { %3162 = vmax.xlane.f32.xlu1 %v3161_v7 }
0x1992   :  { %2981 = vrot.lane.b32.xlu0 %v2882_v54, %s6775_s2 }
0x1a03   :  { %v3282_v22 = vpop.xlane.xlu1 %3281 }
0x1a04   :  { %6535 = vrcp.f32 %v3282_v22 }
0x1a05   :  { %v3279_v12 = vpop.xlane.xlu0 %3278 }
0x1a06   :  { %6537 = vrcp.f32 %v3279_v12 }
0x1a07   :  { %v3160_v59 = vpop.xlane.xlu1 %3159 }
0x1a08   :  { %v3164_v53 = vsub.f32 %v3150_v21, %v3160_v59 }
0x1a09   :  { %v2982_v14 = vpop.permute.xlu0 %2981 }
0x1a0a   :  { %v7511_v17 = vadd.f32 %v3056_v30, %v2982_v14  ;;  %v3062_v52 = vadd.f32 %v6206_v46, %v2982_v14  ;;  %v3451_v46 = vmul.f32 %v7458_v58, %v6957_v8  ;;  %v3166_v2 = vmul.f32 1.442695, %v3164_v53 }
0x1a0b   :  { %v3163_v24 = vpop.xlane.xlu1 %3162 }
0x1a0c   :  { %v3288_v13 = vmul.f32 %v3062_v52, %v6899_v42  ;;  %v3181_v62 = vmul.f32 %v3062_v52, %v6895_v41  ;;  %v3287_v16 = vmul.f32 %v7511_v17, %v6899_v42  ;;  %v3180_v54 = vmul.f32 %v7511_v17, %v6895_v41 }
0x1a0d   :  { %v7520_v60 = vmul.f32 %v3062_v52, %v6957_v8  ;;  %v3747_v30 = vmul.f32 %v3062_v52, %v6987_v49  ;;  %v3746_v34 = vmul.f32 %v7511_v17, %v6987_v49  ;;  %v3165_v3 = vsub.f32 %v3155_v51, %v3163_v24 }
0x1a0e   :  { %6221 = vmatprep.subr.mxu0 %v3288_v13  ;;  %6228 = vmatprep.subr.mxu1 %v3181_v62  ;;  %6539 = vpow2.f32 %v3166_v2 }
0x1a0f   :  { %6222 = vmatpush3.msra.mxu0 %v3288_v13  ;;  %6229 = vmatpush3.msra.mxu1 %v3181_v62  ;;  %v3168_v5 = vmul.f32 1.442695, %v3165_v3 }
0x1a10   :  { %6223 = vmatprep.subr.mxu0 %v3287_v16  ;;  %6230 = vmatprep.subr.mxu1 %v3180_v54 }
0x1a11   :  { %6224 = vmatpush3.msra.mxu0 %v3287_v16  ;;  %6231 = vmatpush3.msra.mxu1 %v3180_v54  ;;  %v6536_v29 = vpop.eup %6535  ;;  %6541 = vpow2.f32 %v3168_v5 }
0x1a12   :  { %6235 = vmatprep.subr.msk.mxu0 %vm281_vm1, %v7470_v40  ;;  %6242 = vmatprep.subr.mxu1 %v7520_v60  ;;  %v3286_v39 = vmul.f32 %v6536_v29, %v6532_v15 }
0x1a13   :  { %v6538_v38 = vpop.eup %6537 }
0x1a14   :  { %v3285_v47 = vmul.f32 %v6538_v38, %v6534_v33 }
0x1a16   :  { %6225 = vmatprep.mubr.msk.f32.mxu0 %vm561_vm2, %v3285_v47 }
0x1a17   :  { %6226 = vmatmul.mubr.msk.f32.vlgmr.msra.gmra.mxu0 %vm561_vm2, %v3286_v39 }
0x1a18   :  { %6236 = vmatpush3.xpose.msk.msra.mxu0 %vm281_vm1, %v7470_v40  ;;  %6239 = vmatprep.mubr.msk.f32.mxu0 %vm281_vm1, %v3451_v46 }
0x1a19   :  { %6237 = vmatprep.subr.msk.mxu0 %vm281_vm1, %v7476_v26 }
0x1a1b   :  { %v6540_v27 = vpop.eup %6539 }
0x1a1c   :  { %6238 = vmatpush3.xpose.msk.msra.mxu0 %vm281_vm1, %v7476_v26  ;;  %v3170_v33 = vsel %vm561_vm2, %v6540_v27, 0.0 }
0x1a1d   :  { %6256 = vmatprep.subr.mxu0 %v3747_v30 }
0x1a1e   :  { %v6542_v50 = vpop.eup %6541 }
0x1a1f   :  { %6240 = vmatmul.mubr.msk.f32.vlgmr.msra.gmra.mxu0 %vm281_vm1, %v3452_v20  ;;  %v3173_v51 = vsel %vm561_vm2, %v6542_v50, 0.0  ;;  %v3556_v20 = vmul.f32 %v7511_v17, %v6957_v8  ;;  %v3641_v17 = vmul.f32 %v7458_v58, %v6987_v49 }
0x1a20   :  { %6257 = vmatpush3.msra.mxu0 %v3747_v30 }
0x1a21   :  { %6258 = vmatprep.subr.mxu0 %v3746_v34 }
0x1a22   :  { %6259 = vmatpush3.msra.mxu0 %v3746_v34 }
0x1ad7   :  { %v7542_v55 = vpop.f32.mrf.mxu0 }
0x1ad9   :  { %v7544_v6 = vpop.f32.mrf.mxu0 }
0x1adf   :  { %v6241_v10 = vpop.f32.mrf.mxu0 }
0x1ae0   :  { %v3531_v19 = vadd.f32 %v7496_v61, %v6241_v10 }
0x1ae1   :  { %v3525_v9 = vpop.f32.mrf.mxu0 }
0x1ae2   :  { %v3526_v18 = vadd.f32 %v7499_v1, %v3525_v9  ;;  %v3537_v21 = vsel %vm561_vm2, %v3531_v19, -inf }
0x1ae4   :  { %v3534_v15 = vsel %vm561_vm2, %v3526_v18, -inf }
0x1ae5   :  { %3535 = vmax.xlane.f32.xlu1 %v3534_v15 }
0x1ae9   :  { %3538 = vmax.xlane.f32.xlu1 %v3537_v21 }
0x1aed   :  { %3171 = vadd.xlane.f32.xlu1 %v3170_v33 }
0x1af1   :  { %3174 = vadd.xlane.f32.xlu1 %v3173_v51 }
0x1b6e   :  { %v3536_v23 = vpop.xlane.xlu1 %3535 }
0x1b6f   :  { %v3540_v7 = vsub.f32 %v3526_v18, %v3536_v23 }
0x1b71   :  { %v3542_v22 = vmul.f32 1.442695, %v3540_v7 }
0x1b72   :  { %v3539_v12 = vpop.xlane.xlu1 %3538 }
0x1b73   :  { %6543 = vpow2.f32 %v3542_v22  ;;  %v3541_v14 = vsub.f32 %v3531_v19, %v3539_v12 }
0x1b75   :  { %v3544_v52 = vmul.f32 1.442695, %v3541_v14  ;;  %v7582_v14 = vld [vmem:[#allocation14 + $0xc8] sm:$0xff] }
0x1b76   :  { %v3172_v13 = vpop.xlane.xlu1 %3171  ;;  %6263 = vmatprep.subr.mxu0 %v7582_v14 }
0x1b77   :  { %6545 = vpow2.f32 %v3544_v52 }
0x1b78   :  { %6547 = vrcp.f32 %v3172_v13 }
0x1b7a   :  { %v3175_v62 = vpop.xlane.xlu1 %3174 }
0x1b7b   :  { %6549 = vrcp.f32 %v3175_v62 }
0x1b80   :  { %v6544_v16 = vpop.eup %6543 }
0x1b81   :  { %v3546_v54 = vsel %vm561_vm2, %v6544_v16, 0.0 }
0x1b82   :  { %3547 = vadd.xlane.f32.xlu0 %v3546_v54 }
0x1b84   :  { %v6546_v29 = vpop.eup %6545 }
0x1b85   :  { %v6548_v38 = vpop.eup %6547  ;;  %v3549_v47 = vsel %vm561_vm2, %v6546_v29, 0.0 }
0x1b86   :  { %3550 = vadd.xlane.f32.xlu1 %v3549_v47  ;;  %v3178_v39 = vmul.f32 %v6548_v38, %v6540_v27  ;;  %v7588_v38 = vld [vmem:[#allocation14 + $0xc0] sm:$0xff]  ;;  %v7592_v47 = vld [vmem:[#allocation14 + $0xb8] sm:$0xff] }
0x1b88   :  { %v6550_v46 = vpop.eup %6549  ;;  %6232 = vmatprep.mubr.msk.f32.mxu1 %vm561_vm2, %v3178_v39  ;;  %v7596_v39 = vld [vmem:[#allocation14 + $0xb0] sm:$0xff] }
0x1b89   :  { %v3179_v30 = vmul.f32 %v6550_v46, %v6542_v50 }
0x1b8b   :  { %6233 = vmatmul.mubr.msk.f32.vlgmr.msra.gmra.mxu1 %vm561_vm2, %v3179_v30 }
0x1b8c   :  { %6243 = vmatpush3.msra.mxu1 %v7520_v60  ;;  %v3642_v60 = vmul.f32 %v7456_v45, %v6987_v49 }
0x1b8d   :  { %6244 = vmatprep.subr.mxu1 %v3556_v20 }
0x1b8e   :  { %6245 = vmatpush3.msra.mxu1 %v3556_v20 }
0x1b8f   :  { %6249 = vmatprep.subr.msk.mxu1 %vm281_vm1, %v7470_v40 }
0x1c0b   :  { %v3548_v34 = vpop.xlane.xlu0 %3547 }
0x1c0c   :  { %6551 = vrcp.f32 %v3548_v34 }
0x1c0f   :  { %v3551_v59 = vpop.xlane.xlu1 %3550 }
0x1c10   :  { %6553 = vrcp.f32 %v3551_v59 }
0x1c19   :  { %v6552_v53 = vpop.eup %6551 }
0x1c1a   :  { %v3554_v24 = vmul.f32 %v6552_v53, %v6544_v16 }
0x1c1c   :  { %6246 = vmatprep.mubr.msk.f32.mxu1 %vm561_vm2, %v3554_v24  ;;  %v6624_v24 = vld [vmem:[#allocation5] sm:$0xff] }
0x1c1d   :  { %v6554_v2 = vpop.eup %6553 }
0x1c1e   :  { %v3555_v3 = vmul.f32 %v6554_v2, %v6546_v29  ;;  %v3834_v2 = vrot.slane %v7452_v25, %v7068_v63 }
0x1c20   :  { %6247 = vmatmul.mubr.msk.f32.vlgmr.msra.gmra.mxu1 %vm561_vm2, %v3555_v3 }
0x1c21   :  { %6250 = vmatpush3.xpose.msk.msra.mxu1 %vm281_vm1, %v7470_v40  ;;  %6253 = vmatprep.mubr.msk.f32.mxu1 %vm281_vm1, %v3641_v17 }
0x1c22   :  { %6251 = vmatprep.subr.msk.mxu1 %vm281_vm1, %v7476_v26 }
0x1c25   :  { %6252 = vmatpush3.xpose.msk.msra.mxu1 %vm281_vm1, %v7476_v26 }
0x1c28   :  { %6254 = vmatmul.mubr.msk.f32.vlgmr.msra.gmra.mxu1 %vm281_vm1, %v3642_v60 }
0x1c4b   :  { %v6234_v5 = vpop.f32.mrf.mxu1 }
0x1c4c   :  { %v3448_v10 = vadd.f32 %v6234_v5, %v7542_v55 }
0x1c4d   :  { %v3442_v58 = vpop.f32.mrf.mxu1 }
0x1c4e   :  { %v3443_v46 = vadd.f32 %v3442_v58, %v7544_v6 }
0x1ce0   :  { %v6248_v9 = vpop.f32.mrf.mxu1 }
0x1ce1   :  { %v3640_v18 = vadd.f32 %v6248_v9, %v3448_v10 }
0x1ce2   :  { %v3630_v40 = vpop.f32.mrf.mxu1 }
0x1ce3   :  { %v3639_v20 = vadd.f32 %v3630_v40, %v3443_v46  ;;  %v7614_v40 = vld [vmem:[#allocation14 + $0xa0] sm:$0xff]  ;;  %v3947_v46 = vrot.slane %v7452_v25, %v1363_v4 }
0x1ce8   :  { %v6255_v19 = vpop.f32.mrf.mxu1 }
0x1ce9   :  { %v3721_v27 = vadd.f32 %v7496_v61, %v6255_v19  ;;  %v7617_v19 = vld [vmem:[#allocation14 + $0x98] sm:$0xff] }
0x1cea   :  { %v3715_v15 = vpop.f32.mrf.mxu1 }
0x1ceb   :  { %v3716_v21 = vadd.f32 %v7499_v1, %v3715_v15  ;;  %v3727_v45 = vsel %vm561_vm2, %v3721_v27, -inf }
0x1ced   :  { %v3724_v26 = vsel %vm561_vm2, %v3716_v21, -inf }
0x1cee   :  { %3725 = vmax.xlane.f32.xlu1 %v3724_v26 }
0x1cf2   :  { %3728 = vmax.xlane.f32.xlu1 %v3727_v45 }
0x1d77   :  { %v3726_v33 = vpop.xlane.xlu1 %3725 }
0x1d78   :  { %v3730_v50 = vsub.f32 %v3716_v21, %v3726_v33 }
0x1d7a   :  { %v3732_v51 = vmul.f32 1.442695, %v3730_v50 }
0x1d7b   :  { %v3729_v23 = vpop.xlane.xlu1 %3728 }
0x1d7c   :  { %6555 = vpow2.f32 %v3732_v51  ;;  %v3731_v55 = vsub.f32 %v3721_v27, %v3729_v23 }
0x1d7e   :  { %v3734_v7 = vmul.f32 1.442695, %v3731_v55  ;;  %v7646_v55 = vrot.slane %v7452_v25, %v6884_v35 }
0x1d80   :  { %6557 = vpow2.f32 %v3734_v7 }
0x1d89   :  { %v6556_v22 = vpop.eup %6555 }
0x1d8a   :  { %v3736_v12 = vsel %vm561_vm2, %v6556_v22, 0.0 }
0x1d8b   :  { %3737 = vadd.xlane.f32.xlu1 %v3736_v12 }
0x1d8d   :  { %v6558_v1 = vpop.eup %6557 }
0x1d8e   :  { %v3739_v61 = vsel %vm561_vm2, %v6558_v1, 0.0 }
0x1d8f   :  { %3740 = vadd.xlane.f32.xlu1 %v3739_v61 }
0x1e14   :  { %v3738_v52 = vpop.xlane.xlu1 %3737 }
0x1e15   :  { %6559 = vrcp.f32 %v3738_v52 }
0x1e18   :  { %v3741_v13 = vpop.xlane.xlu1 %3740 }
0x1e19   :  { %6561 = vrcp.f32 %v3741_v13 }
0x1e22   :  { %v6560_v62 = vpop.eup %6559 }
0x1e23   :  { %v3744_v16 = vmul.f32 %v6560_v62, %v6556_v22 }
0x1e25   :  { %6260 = vmatprep.mubr.msk.f32.mxu0 %vm561_vm2, %v3744_v16 }
0x1e26   :  { %v6562_v54 = vpop.eup %6561 }
0x1e27   :  { %v3745_v29 = vmul.f32 %v6562_v54, %v6558_v1 }
0x1e29   :  { %6261 = vmatmul.mubr.msk.f32.vlgmr.msra.gmra.mxu0 %vm561_vm2, %v3745_v29 }
0x1e2a   :  { %6264 = vmatpush3.msra.mxu0 %v7582_v14 }
0x1e2b   :  { %6265 = vmatprep.subr.mxu0 %v7588_v38 }
0x1e2c   :  { %6266 = vmatpush3.msra.mxu0 %v7588_v38 }
0x1e2d   :  { %6267 = vmatprep.subr.mxu0 %v7592_v47 }
0x1e2e   :  { %6268 = vmatpush3.msra.mxu0 %v7592_v47 }
0x1e2f   :  { %6269 = vmatprep.subr.mxu0 %v7596_v39 }
0x1e30   :  { %6270 = vmatpush3.msra.mxu0 %v7596_v39 }
0x1ee9   :  { %v6262_v30 = vpop.f32.mrf.mxu0 }
0x1eea   :  { %v3830_v53 = vadd.f32 %v6262_v30, %v3640_v18  ;;  %v7610_v18 = vld [vmem:[#allocation14 + $0xa8] sm:$0xff] }
0x1eeb   :  { %v3820_v34 = vpop.f32.mrf.mxu0  ;;  %6274 = vmatprep.subr.mxu1 %v7610_v18 }
0x1eec   :  { %v3829_v59 = vadd.f32 %v3820_v34, %v3639_v20  ;;  %6275 = vmatpush3.msra.mxu1 %v7610_v18  ;;  %v6625_v20 = vld [vmem:[#allocation5 + $0x8] sm:$0xff] }
0x1eed   :  { %6276 = vmatprep.subr.mxu1 %v7614_v40 }
0x1eee   :  { %6271 = vmatprep.mubr.msk.f32.mxu0 %vm281_vm1, %v3829_v59  ;;  %6277 = vmatpush3.msra.mxu1 %v7614_v40  ;;  %v3953_v59 = vrot.slane %v7452_v25, %v1369_v11 }
0x1eef   :  { %6272 = vmatmul.mubr.msk.f32.vlgmr.msra.gmra.mxu0 %vm281_vm1, %v3830_v53  ;;  %6278 = vmatprep.subr.mxu1 %v7617_v19  ;;  %v6626_v53 = vld [vmem:[#allocation5 + $0x10] sm:$0xff] }
0x1ef0   :  { %6293 = vmatprep.mubr.msk.f32.mxu0 %vm281_vm1, %v6624_v24  ;;  %6279 = vmatpush3.msra.mxu1 %v7617_v19 }
0x1faf   :  { %v6273_v3 = vpop.f32.mrf.mxu0 }
0x1fb0   :  { %v3913_v60 = vadd.f32 %v6273_v3, %v3834_v2 }
0x1fb1   :  { %v3907_v17 = vpop.f32.mrf.mxu0 }
0x1fb2   :  { %v3908_v5 = vadd.f32 %v3907_v17, %v3834_v2  ;;  %v3917_v58 = vadd.f32 %v3913_v60, %v7434_v28  ;;  %v7621_v28 = vld [vmem:[#allocation14 + $0x90] sm:$0xff]  ;;  %v6627_v17 = vld [vmem:[#allocation5 + $0x18] sm:$0xff] }
0x1fb3   :  { %6280 = vmatprep.subr.mxu1 %v7621_v28 }
0x1fb4   :  { %v3916_v6 = vadd.f32 %v3908_v5, %v7436_v37  ;;  %v3921_v9 = vsel %vm281_vm1, %v3917_v58, 0.0  ;;  %6281 = vmatpush3.msra.mxu1 %v7621_v28 }
0x1fb6   :  { %v3918_v10 = vsel %vm281_vm1, %v3916_v6, 0.0 }
0x1fb7   :  { %3919 = vadd.xlane.f32.xlu1 %v3918_v10  ;;  %v6629_v10 = vld [vmem:[#allocation4 + $0x8] sm:$0xff] }
0x1fbb   :  { %3922 = vadd.xlane.f32.xlu1 %v3921_v9  ;;  %v6630_v9 = vld [vmem:[#allocation4 + $0x10] sm:$0xff] }
0x2040   :  { %v3920_v37 = vpop.xlane.xlu1 %3919 }
0x2041   :  { %v3924_v15 = vmul.f32 0.03125, %v3920_v37 }
0x2043   :  { %v3926_v21 = vsub.f32 %v3916_v6, %v3924_v15 }
0x2044   :  { %v3923_v27 = vpop.xlane.xlu1 %3922 }
0x2045   :  { %v3925_v26 = vmul.f32 0.03125, %v3923_v27  ;;  %v3928_v45 = vmul.f32 %v3926_v21, %v3926_v21 }
0x2047   :  { %v3927_v33 = vsub.f32 %v3917_v58, %v3925_v26  ;;  %v3930_v50 = vsel %vm281_vm1, %v3928_v45, 0.0  ;;  %v6628_v58 = vld [vmem:[#allocation4] sm:$0xff] }
0x2048   :  { %3931 = vadd.xlane.f32.xlu0 %v3930_v50 }
0x2049   :  { %v3929_v51 = vmul.f32 %v3927_v33, %v3927_v33 }
0x204b   :  { %v3933_v23 = vsel %vm281_vm1, %v3929_v51, 0.0 }
0x204c   :  { %3934 = vadd.xlane.f32.xlu1 %v3933_v23 }
0x205d   :  { %4051 = vrot.lane.b32.xlu1 %v7614_v40, %s6776_s4 }
0x205e   :  { %4053 = vrot.lane.b32.xlu0 %v7610_v18, %s6776_s4 }
0x2061   :  { %4049 = vrot.lane.b32.xlu1 %v7617_v19, %s6776_s4 }
0x2062   :  { %4154 = vrot.lane.b32.xlu0 %v7610_v18, %s6775_s2 }
0x2065   :  { %4047 = vrot.lane.b32.xlu1 %v7621_v28, %s6776_s4 }
0x2066   :  { %4150 = vrot.lane.b32.xlu0 %v7617_v19, %s6775_s2 }
0x2069   :  { %4152 = vrot.lane.b32.xlu1 %v7614_v40, %s6775_s2 }
0x206a   :  { %4148 = vrot.lane.b32.xlu0 %v7621_v28, %s6775_s2 }
0x206d   :  { %4060 = vrot.lane.b32.xlu1 %v7646_v55, %s6776_s4 }
0x20d1   :  { %v3932_v7 = vpop.xlane.xlu0 %3931 }
0x20d2   :  { %v3936_v22 = vmul.f32 0.03125, %v3932_v7 }
0x20d4   :  { %v3938_v12 = vadd.f32 1e-05, %v3936_v22 }
0x20d5   :  { %v3935_v1 = vpop.xlane.xlu1 %3934  ;;  %v4054_v61 = vpop.permute.xlu0 %4053 }
0x20d6   :  { %6563 = vrsqrt.f32 %v3938_v12  ;;  %v3937_v52 = vmul.f32 0.03125, %v3935_v1  ;;  %6285 = vmatprep.subr.mxu0 %v4054_v61 }
0x20d7   :  { %6286 = vmatpush3.msra.mxu0 %v4054_v61 }
0x20d8   :  { %v3939_v13 = vadd.f32 1e-05, %v3937_v52 }
0x20d9   :  { %v4052_v62 = vpop.permute.xlu1 %4051  ;;  %v4155_v16 = vpop.permute.xlu0 %4154 }
0x20da   :  { %6565 = vrsqrt.f32 %v3939_v13  ;;  %6287 = vmatprep.subr.mxu0 %v4052_v62  ;;  %6299 = vmatprep.subr.mxu1 %v4155_v16 }
0x20db   :  { %6288 = vmatpush3.msra.mxu0 %v4052_v62 }
0x20dd   :  { %v4050_v54 = vpop.permute.xlu1 %4049  ;;  %v4151_v25 = vpop.permute.xlu0 %4150 }
0x20de   :  { %6289 = vmatprep.subr.mxu0 %v4050_v54 }
0x20df   :  { %6290 = vmatpush3.msra.mxu0 %v4050_v54 }
0x20e1   :  { %v4048_v29 = vpop.permute.xlu1 %4047 }
0x20e2   :  { %6291 = vmatprep.subr.mxu0 %v4048_v29 }
0x20e3   :  { %v6564_v30 = vpop.eup %6563  ;;  %6292 = vmatpush3.msra.mxu0 %v4048_v29 }
0x20e4   :  { %6294 = vmatmul.mubr.msk.f32.vlgmr.msra.gmra.mxu0 %vm281_vm1, %v6625_v20  ;;  %v3942_v34 = vmul.f32 %v6564_v30, %v3926_v21 }
0x20e5   :  { %6296 = vmatprep.mubr.msk.f32.mxu0 %vm281_vm1, %v6626_v53  ;;  %v4153_v11 = vpop.permute.xlu1 %4152 }
0x20e6   :  { %v3948_v24 = vmul.f32 %v3947_v46, %v3942_v34 }
0x20e7   :  { %v6566_v2 = vpop.eup %6565 }
0x20e8   :  { %v3943_v3 = vmul.f32 %v6566_v2, %v3927_v33  ;;  %6297 = vmatmul.mubr.msk.f32.gmra.mxu0 %vm281_vm1, %v6627_v17  ;;  %v7659_v4 = vadd.f32 %v3953_v59, %v3948_v24 }
0x20e9   :  { %v4061_v21 = vpop.permute.xlu1 %4060 }
0x20ea   :  { %v3949_v60 = vmul.f32 %v3947_v46, %v3943_v3  ;;  %v3956_v5 = vadd.f32 %v7438_v56, %v7659_v4  ;;  %v4149_v56 = vpop.permute.xlu0 %4148 }
0x20ec   :  { %v7663_v6 = vadd.f32 %v3953_v59, %v3949_v60  ;;  %6282 = vmatprep.mubr.msk.f32.mxu1 %vm281_vm1, %v3956_v5 }
0x20ee   :  { %v3957_v31 = vadd.f32 %v7442_v57, %v7663_v6  ;;  %v6631_v57 = vld [vmem:[#allocation4 + $0x18] sm:$0xff] }
0x20f0   :  { %6283 = vmatmul.mubr.msk.f32.vlgmr.msra.gmra.mxu1 %vm281_vm1, %v3957_v31 }
0x20f1   :  { %6300 = vmatpush3.msra.mxu1 %v4155_v16  ;;  %6307 = vmatprep.mubr.msk.f32.mxu1 %vm281_vm1, %v6628_v58 }
0x20f2   :  { %6301 = vmatprep.subr.mxu1 %v4153_v11 }
0x20f3   :  { %6302 = vmatpush3.msra.mxu1 %v4153_v11 }
0x20f4   :  { %6303 = vmatprep.subr.mxu1 %v4151_v25 }
0x20f5   :  { %6304 = vmatpush3.msra.mxu1 %v4151_v25 }
0x20f6   :  { %6305 = vmatprep.subr.mxu1 %v4149_v56 }
0x20f7   :  { %6306 = vmatpush3.msra.mxu1 %v4149_v56 }
0x20f8   :  { %6308 = vmatmul.mubr.msk.f32.vlgmr.msra.gmra.mxu1 %vm281_vm1, %v6629_v10 }
0x20f9   :  { %6310 = vmatprep.mubr.msk.f32.mxu1 %vm281_vm1, %v6630_v9 }
0x20fc   :  { %6311 = vmatmul.mubr.msk.f32.gmra.mxu1 %vm281_vm1, %v6631_v57 }
0x21a4   :  { %v6295_v37 = vpop.f32.mrf.mxu0 }
0x21a5   :  { %v7689_v50 = vadd.f32 %v6295_v37, %v4061_v21 }
0x21a6   :  { %v4129_v15 = vpop.f32.mrf.mxu0 }
0x21a7   :  { %v7699_v7 = vadd.f32 %v4129_v15, %v4061_v21 }
0x21a8   :  { %v6298_v27 = vpop.f32.mrf.mxu0 }
0x21a9   :  { %v7673_v26 = vadd.f32 %v6298_v27, %v4061_v21 }
0x21aa   :  { %v4139_v45 = vpop.f32.mrf.mxu0 }
0x21ab   :  { %v7675_v33 = vadd.f32 %v4139_v45, %v4061_v21  ;;  %6313 = vmatprep.subr.msk.mxu0 %vm281_vm1, %v7673_v26  ;;  %6324 = vmatprep.subr.msk.mxu1 %vm281_vm1, %v7673_v26 }
0x21ac   :  { %6314 = vmatpush3.xpose.msk.msra.mxu0 %vm281_vm1, %v7673_v26  ;;  %6325 = vmatpush3.xpose.msk.msra.mxu1 %vm281_vm1, %v7673_v26 }
0x21ad   :  { %6315 = vmatprep.subr.msk.mxu0 %vm281_vm1, %v7675_v33  ;;  %6326 = vmatprep.subr.msk.mxu1 %vm281_vm1, %v7675_v33 }
0x21b0   :  { %v6284_v51 = vpop.f32.mrf.mxu1  ;;  %6316 = vmatpush3.xpose.msk.msra.mxu0 %vm281_vm1, %v7675_v33  ;;  %6327 = vmatpush3.xpose.msk.msra.mxu1 %vm281_vm1, %v7675_v33 }
0x21b1   :  { %6317 = vmatprep.subr.msk.mxu0 %vm281_vm1, %v7689_v50  ;;  %6328 = vmatprep.subr.msk.mxu1 %vm281_vm1, %v7689_v50  ;;  %v7713_v12 = vadd.f32 %v6284_v51, %v7646_v55 }
0x21b2   :  { %v4034_v23 = vpop.f32.mrf.mxu1 }
0x21b3   :  { %v7702_v22 = vadd.f32 %v4034_v23, %v7646_v55  ;;  %v4249_v52 = vmul.f32 %v7713_v12, %v6895_v41  ;;  %v4370_v13 = vmul.f32 %v7713_v12, %v6899_v42 }
0x21b4   :  { %6318 = vmatpush3.xpose.msk.msra.mxu0 %vm281_vm1, %v7689_v50  ;;  %6329 = vmatpush3.xpose.msk.msra.mxu1 %vm281_vm1, %v7689_v50 }
0x21b5   :  { %6319 = vmatprep.subr.msk.mxu0 %vm281_vm1, %v7699_v7  ;;  %6330 = vmatprep.subr.msk.mxu1 %vm281_vm1, %v7699_v7  ;;  %v4248_v1 = vmul.f32 %v7702_v22, %v6895_v41  ;;  %v4369_v61 = vmul.f32 %v7702_v22, %v6899_v42 }
0x21b7   :  { %6321 = vmatprep.mubr.msk.f32.mxu0 %vm281_vm1, %v4248_v1  ;;  %6332 = vmatprep.mubr.msk.f32.mxu1 %vm281_vm1, %v4369_v61 }
0x21b8   :  { %6320 = vmatpush3.xpose.msk.msra.mxu0 %vm281_vm1, %v7699_v7  ;;  %6331 = vmatpush3.xpose.msk.msra.mxu1 %vm281_vm1, %v7699_v7  ;;  %v6309_v62 = vpop.f32.mrf.mxu1 }
0x21ba   :  { %v4229_v16 = vpop.f32.mrf.mxu1 }
0x21bb   :  { %6322 = vmatmul.mubr.msk.f32.vlgmr.msra.gmra.mxu0 %vm281_vm1, %v4249_v52  ;;  %6333 = vmatmul.mubr.msk.f32.vlgmr.msra.gmra.mxu1 %vm281_vm1, %v4370_v13 }
0x21bc   :  { %v6312_v54 = vpop.f32.mrf.mxu1 }
0x21be   :  { %v4239_v29 = vpop.f32.mrf.mxu1 }
0x227b   :  { %v6334_v46 = vpop.f32.mrf.mxu1  ;;  %v6323_v45 = vpop.f32.mrf.mxu0 }
0x227c   :  { %v4449_v30 = vadd.f32 %v6334_v46, %v7234_v48  ;;  %v4340_v13 = vadd.f32 %v6323_v45, %v7234_v48 }
0x227d   :  { %v4443_v20 = vpop.f32.mrf.mxu1  ;;  %v4334_v1 = vpop.f32.mrf.mxu0 }
0x227e   :  { %v4444_v34 = vadd.f32 %v4443_v20, %v7236_v43  ;;  %v4455_v59 = vsel %vm281_vm1, %v4449_v30, -inf  ;;  %v4335_v61 = vadd.f32 %v4334_v1, %v7236_v43 }
0x227f   :  { %4456 = vmax.xlane.f32.xlu0 %v4455_v59 }
0x2280   :  { %v4452_v53 = vsel %vm281_vm1, %v4444_v34, -inf }
0x2281   :  { %4453 = vmax.xlane.f32.xlu1 %v4452_v53 }
0x2292   :  { %4160 = vrot.lane.b32.xlu1 %v7646_v55, %s6775_s2 }
0x2308   :  { %v4457_v24 = vpop.xlane.xlu0 %4456 }
0x2309   :  { %v4459_v2 = vsub.f32 %v4449_v30, %v4457_v24 }
0x230a   :  { %v4454_v3 = vpop.xlane.xlu1 %4453 }
0x230b   :  { %v4458_v17 = vsub.f32 %v4444_v34, %v4454_v3  ;;  %v4462_v60 = vmul.f32 1.442695, %v4459_v2  ;;  %v4640_v2 = vmul.f32 %v7702_v22, %v6957_v8 }
0x230d   :  { %v4460_v5 = vmul.f32 1.442695, %v4458_v17 }
0x230e   :  { %v4161_v31 = vpop.permute.xlu1 %4160 }
0x230f   :  { %6567 = vpow2.f32 %v4460_v5  ;;  %v7737_v11 = vadd.f32 %v4239_v29, %v4161_v31  ;;  %v7739_v25 = vadd.f32 %v6312_v54, %v4161_v31  ;;  %v7741_v58 = vadd.f32 %v6309_v62, %v4161_v31 }
0x2310   :  { %6569 = vpow2.f32 %v4462_v60  ;;  %v7747_v10 = vadd.f32 %v4229_v16, %v4161_v31  ;;  %v4343_v62 = vsel %vm281_vm1, %v4335_v61, -inf  ;;  %v4346_v16 = vsel %vm281_vm1, %v4340_v13, -inf }
0x2311   :  { %v4477_v56 = vmul.f32 %v7739_v25, %v6899_v42  ;;  %v4368_v55 = vmul.f32 %v7739_v25, %v6895_v41  ;;  %v4476_v9 = vmul.f32 %v7737_v11, %v6899_v42  ;;  %v4367_v57 = vmul.f32 %v7737_v11, %v6895_v41 }
0x2312   :  { %v4475_v37 = vmul.f32 %v7741_v58, %v6899_v42  ;;  %v4366_v15 = vmul.f32 %v7741_v58, %v6895_v41  ;;  %v4474_v21 = vmul.f32 %v7747_v10, %v6899_v42  ;;  %v4365_v27 = vmul.f32 %v7747_v10, %v6895_v41 }
0x2313   :  { %6335 = vmatprep.subr.mxu0 %v4477_v56  ;;  %6346 = vmatprep.subr.mxu1 %v4368_v55  ;;  %v7763_v51 = vmul.f32 %v7739_v25, %v6957_v8  ;;  %v4940_v60 = vmul.f32 %v7739_v25, %v6987_v49  ;;  %v4641_v5 = vmul.f32 %v7713_v12, %v6957_v8 }
0x2314   :  { %6336 = vmatpush3.msra.mxu0 %v4477_v56  ;;  %6347 = vmatpush3.msra.mxu1 %v4368_v55  ;;  %v4939_v31 = vmul.f32 %v7737_v11, %v6987_v49  ;;  %v4938_v56 = vmul.f32 %v7741_v58, %v6987_v49  ;;  %v4937_v25 = vmul.f32 %v7747_v10, %v6987_v49 }
0x2315   :  { %6337 = vmatprep.subr.mxu0 %v4476_v9  ;;  %6348 = vmatprep.subr.mxu1 %v4367_v57 }
0x2316   :  { %6338 = vmatpush3.msra.mxu0 %v4476_v9  ;;  %6349 = vmatpush3.msra.mxu1 %v4367_v57 }
0x2317   :  { %6339 = vmatprep.subr.mxu0 %v4475_v37  ;;  %6350 = vmatprep.subr.mxu1 %v4366_v15 }
0x2318   :  { %6340 = vmatpush3.msra.mxu0 %v4475_v37  ;;  %6351 = vmatpush3.msra.mxu1 %v4366_v15 }
0x2319   :  { %6341 = vmatprep.subr.mxu0 %v4474_v21  ;;  %6352 = vmatprep.subr.mxu1 %v4365_v27 }
0x231a   :  { %6342 = vmatpush3.msra.mxu0 %v4474_v21  ;;  %6353 = vmatpush3.msra.mxu1 %v4365_v27 }
0x231b   :  { %6357 = vmatprep.subr.msk.mxu0 %vm281_vm1, %v7673_v26  ;;  %6368 = vmatprep.subr.mxu1 %v7763_v51 }
0x231c   :  { %v6568_v23 = vpop.eup %6567 }
0x231d   :  { %v4464_v42 = vsel %vm281_vm1, %v6568_v23, 0.0  ;;  %v6570_v41 = vpop.eup %6569 }
0x231e   :  { %4465 = vadd.xlane.f32.xlu0 %v4464_v42  ;;  %v4467_v52 = vsel %vm281_vm1, %v6570_v41, 0.0 }
0x2322   :  { %4468 = vadd.xlane.f32.xlu0 %v4467_v52 }
0x2326   :  { %4344 = vmax.xlane.f32.xlu0 %v4343_v62 }
0x232a   :  { %4347 = vmax.xlane.f32.xlu0 %v4346_v16 }
0x23a7   :  { %v4466_v54 = vpop.xlane.xlu0 %4465 }
0x23a8   :  { %6571 = vrcp.f32 %v4466_v54 }
0x23ab   :  { %v4469_v29 = vpop.xlane.xlu0 %4468 }
0x23ac   :  { %6573 = vrcp.f32 %v4469_v29 }
0x23af   :  { %v4345_v46 = vpop.xlane.xlu0 %4344 }
0x23b0   :  { %v4349_v30 = vsub.f32 %v4335_v61, %v4345_v46 }
0x23b2   :  { %v4351_v20 = vmul.f32 1.442695, %v4349_v30 }
0x23b3   :  { %v4348_v37 = vpop.xlane.xlu0 %4347 }
0x23b4   :  { %6575 = vpow2.f32 %v4351_v20  ;;  %v4350_v15 = vsub.f32 %v4340_v13, %v4348_v37 }
0x23b5   :  { %v6572_v34 = vpop.eup %6571 }
0x23b6   :  { %v4472_v59 = vmul.f32 %v6572_v34, %v6568_v23  ;;  %v4353_v21 = vmul.f32 1.442695, %v4350_v15 }
0x23b8   :  { %6343 = vmatprep.mubr.msk.f32.mxu0 %vm281_vm1, %v4472_v59 }
0x23b9   :  { %v6574_v53 = vpop.eup %6573 }
0x23ba   :  { %v4473_v24 = vmul.f32 %v6574_v53, %v6570_v41 }
0x23bc   :  { %6344 = vmatmul.mubr.msk.f32.vlgmr.msra.gmra.mxu0 %vm281_vm1, %v4473_v24 }
0x23bd   :  { %6358 = vmatpush3.xpose.msk.msra.mxu0 %vm281_vm1, %v7673_v26  ;;  %6365 = vmatprep.mubr.msk.f32.mxu0 %vm281_vm1, %v4640_v2 }
0x23be   :  { %6359 = vmatprep.subr.msk.mxu0 %vm281_vm1, %v7675_v33 }
0x23c1   :  { %v6576_v3 = vpop.eup %6575  ;;  %6360 = vmatpush3.xpose.msk.msra.mxu0 %vm281_vm1, %v7675_v33 }
0x23c2   :  { %6361 = vmatprep.subr.msk.mxu0 %vm281_vm1, %v7689_v50  ;;  %v4355_v17 = vsel %vm281_vm1, %v6576_v3, 0.0 }
0x23c3   :  { %4356 = vadd.xlane.f32.xlu1 %v4355_v17 }
0x23c5   :  { %6362 = vmatpush3.xpose.msk.msra.mxu0 %vm281_vm1, %v7689_v50 }
0x23c6   :  { %6363 = vmatprep.subr.msk.mxu0 %vm281_vm1, %v7699_v7 }
0x23c9   :  { %6364 = vmatpush3.xpose.msk.msra.mxu0 %vm281_vm1, %v7699_v7 }
0x23ca   :  { %6390 = vmatprep.subr.mxu0 %v4940_v60 }
0x23cc   :  { %6366 = vmatmul.mubr.msk.f32.vlgmr.msra.gmra.mxu0 %vm281_vm1, %v4641_v5  ;;  %v4746_v5 = vmul.f32 %v7741_v58, %v6957_v8 }
0x23cd   :  { %6391 = vmatpush3.msra.mxu0 %v4940_v60  ;;  %v4747_v60 = vmul.f32 %v7737_v11, %v6957_v8 }
0x23ce   :  { %6392 = vmatprep.subr.mxu0 %v4939_v31 }
0x23cf   :  { %6393 = vmatpush3.msra.mxu0 %v4939_v31  ;;  %v4745_v31 = vmul.f32 %v7747_v10, %v6957_v8  ;;  %v4833_v8 = vmul.f32 %v7713_v12, %v6987_v49 }
0x23d0   :  { %6394 = vmatprep.subr.mxu0 %v4938_v56 }
0x23d1   :  { %6395 = vmatpush3.msra.mxu0 %v4938_v56 }
0x23d2   :  { %6396 = vmatprep.subr.mxu0 %v4937_v25 }
0x23d3   :  { %6397 = vmatpush3.msra.mxu0 %v4937_v25 }
0x23d4   :  { %5036 = vrot.lane.b32.xlu1 %v7588_v38, %s6776_s4 }
0x23d8   :  { %5032 = vrot.lane.b32.xlu1 %v7596_v39, %s6776_s4 }
0x244c   :  { %v4357_v55 = vpop.xlane.xlu1 %4356 }
0x244d   :  { %6577 = vrcp.f32 %v4357_v55 }
0x244e   :  { %6579 = vpow2.f32 %v4353_v21 }
0x245a   :  { %v6578_v9 = vpop.eup %6577 }
0x245b   :  { %v4363_v57 = vmul.f32 %v6578_v9, %v6576_v3  ;;  %v6580_v62 = vpop.eup %6579  ;;  %v4832_v9 = vmul.f32 %v7702_v22, %v6987_v49 }
0x245c   :  { %v4358_v13 = vsel %vm281_vm1, %v6580_v62, 0.0 }
0x245d   :  { %6354 = vmatprep.mubr.msk.f32.mxu1 %vm281_vm1, %v4363_v57 }
0x247c   :  { %v7810_v27 = vpop.f32.mrf.mxu0 }
0x247e   :  { %v7812_v45 = vpop.f32.mrf.mxu0 }
0x248c   :  { %v6367_v23 = vpop.f32.mrf.mxu0 }
0x248d   :  { %v4720_v1 = vadd.f32 %v6367_v23, %v7234_v48 }
0x248e   :  { %v4714_v42 = vpop.f32.mrf.mxu0 }
0x248f   :  { %v4715_v41 = vadd.f32 %v4714_v42, %v7236_v43  ;;  %v4726_v52 = vsel %vm281_vm1, %v4720_v1, -inf }
0x2491   :  { %v4723_v61 = vsel %vm281_vm1, %v4715_v41, -inf }
0x2492   :  { %4724 = vmax.xlane.f32.xlu0 %v4723_v61 }
0x2496   :  { %4727 = vmax.xlane.f32.xlu0 %v4726_v52 }
0x249a   :  { %4359 = vadd.xlane.f32.xlu0 %v4358_v13 }
0x251b   :  { %v4725_v16 = vpop.xlane.xlu0 %4724 }
0x251c   :  { %v4729_v54 = vsub.f32 %v4715_v41, %v4725_v16 }
0x251e   :  { %v4731_v29 = vmul.f32 1.442695, %v4729_v54 }
0x251f   :  { %v4728_v46 = vpop.xlane.xlu0 %4727 }
0x2520   :  { %6581 = vpow2.f32 %v4731_v29  ;;  %v4730_v30 = vsub.f32 %v4720_v1, %v4728_v46 }
0x2522   :  { %v4733_v20 = vmul.f32 1.442695, %v4730_v30 }
0x2523   :  { %v4360_v34 = vpop.xlane.xlu0 %4359 }
0x2524   :  { %6583 = vpow2.f32 %v4733_v20 }
0x2525   :  { %6585 = vrcp.f32 %v4360_v34  ;;  %v5037_v34 = vpop.permute.xlu1 %5036 }
0x252d   :  { %v6582_v59 = vpop.eup %6581 }
0x252e   :  { %v4735_v53 = vsel %vm281_vm1, %v6582_v59, 0.0 }
0x252f   :  { %4736 = vadd.xlane.f32.xlu0 %v4735_v53  ;;  %v5033_v53 = vpop.permute.xlu1 %5032 }
0x2531   :  { %v6584_v24 = vpop.eup %6583 }
0x2532   :  { %v6586_v2 = vpop.eup %6585  ;;  %v4738_v3 = vsel %vm281_vm1, %v6584_v24, 0.0 }
0x2533   :  { %4739 = vadd.xlane.f32.xlu0 %v4738_v3  ;;  %v4364_v17 = vmul.f32 %v6586_v2, %v6580_v62 }
0x2535   :  { %6355 = vmatmul.mubr.msk.f32.vlgmr.msra.gmra.mxu1 %vm281_vm1, %v4364_v17 }
0x2536   :  { %6369 = vmatpush3.msra.mxu1 %v7763_v51 }
0x2537   :  { %6370 = vmatprep.subr.mxu1 %v4747_v60 }
0x2538   :  { %6371 = vmatpush3.msra.mxu1 %v4747_v60 }
0x2539   :  { %6372 = vmatprep.subr.mxu1 %v4746_v5 }
0x253a   :  { %6373 = vmatpush3.msra.mxu1 %v4746_v5 }
0x253b   :  { %6374 = vmatprep.subr.mxu1 %v4745_v31 }
0x253c   :  { %6375 = vmatpush3.msra.mxu1 %v4745_v31  ;;  %v7869_v31 = vld [vmem:[#allocation14 + $0xd0] sm:$0xff] }
0x253d   :  { %6379 = vmatprep.subr.msk.mxu1 %vm281_vm1, %v7673_v26 }
0x25b8   :  { %v4737_v56 = vpop.xlane.xlu0 %4736 }
0x25b9   :  { %6587 = vrcp.f32 %v4737_v56  ;;  %v5027_v56 = vrot.slane %v7869_v31, %v6887_v36 }
0x25bc   :  { %v4740_v11 = vpop.xlane.xlu0 %4739 }
0x25bd   :  { %6589 = vrcp.f32 %v4740_v11 }
0x25c6   :  { %v6588_v51 = vpop.eup %6587 }
0x25c7   :  { %v4743_v25 = vmul.f32 %v6588_v51, %v6582_v59 }
0x25c9   :  { %6376 = vmatprep.mubr.msk.f32.mxu1 %vm281_vm1, %v4743_v25 }
0x25ca   :  { %v6590_v58 = vpop.eup %6589 }
0x25cb   :  { %v4744_v55 = vmul.f32 %v6590_v58, %v6584_v24 }
0x25cd   :  { %6377 = vmatmul.mubr.msk.f32.vlgmr.msra.gmra.mxu1 %vm281_vm1, %v4744_v55 }
0x25ce   :  { %6380 = vmatpush3.xpose.msk.msra.mxu1 %vm281_vm1, %v7673_v26  ;;  %6387 = vmatprep.mubr.msk.f32.mxu1 %vm281_vm1, %v4832_v9 }
0x25cf   :  { %6381 = vmatprep.subr.msk.mxu1 %vm281_vm1, %v7675_v33 }
0x25d2   :  { %6382 = vmatpush3.xpose.msk.msra.mxu1 %vm281_vm1, %v7675_v33 }
0x25d3   :  { %6383 = vmatprep.subr.msk.mxu1 %vm281_vm1, %v7689_v50 }
0x25d6   :  { %6384 = vmatpush3.xpose.msk.msra.mxu1 %vm281_vm1, %v7689_v50 }
0x25d7   :  { %6385 = vmatprep.subr.msk.mxu1 %vm281_vm1, %v7699_v7 }
0x25da   :  { %6386 = vmatpush3.xpose.msk.msra.mxu1 %vm281_vm1, %v7699_v7 }
0x25dd   :  { %6388 = vmatmul.mubr.msk.f32.vlgmr.msra.gmra.mxu1 %vm281_vm1, %v4833_v8 }
0x25f5   :  { %v6356_v26 = vpop.f32.mrf.mxu1 }
0x25f6   :  { %v4637_v33 = vadd.f32 %v6356_v26, %v7810_v27 }
0x25f7   :  { %v4631_v22 = vpop.f32.mrf.mxu1 }
0x25f8   :  { %v4632_v24 = vadd.f32 %v4631_v22, %v7812_v45 }
0x268d   :  { %v6378_v10 = vpop.f32.mrf.mxu1 }
0x268e   :  { %v4831_v57 = vadd.f32 %v6378_v10, %v4637_v33 }
0x268f   :  { %v4821_v37 = vpop.f32.mrf.mxu1 }
0x2690   :  { %v4830_v3 = vadd.f32 %v4821_v37, %v4632_v24 }
0x269d   :  { %v6389_v15 = vpop.f32.mrf.mxu1 }
0x269e   :  { %v4912_v23 = vadd.f32 %v6389_v15, %v7234_v48  ;;  %v6635_v15 = vld [vmem:[#allocation14 + $0x88] sm:$0xff] }
0x269f   :  { %v4906_v50 = vpop.f32.mrf.mxu1 }
0x26a0   :  { %v4907_v21 = vadd.f32 %v4906_v50, %v7236_v43  ;;  %v4918_v49 = vsel %vm281_vm1, %v4912_v23, -inf  ;;  %v6636_v50 = vld [vmem:[#allocation14 + $0x78] sm:$0xff] }
0x26a2   :  { %v4915_v7 = vsel %vm281_vm1, %v4907_v21, -inf }
0x26a3   :  { %4916 = vmax.xlane.f32.xlu0 %v4915_v7 }
0x26a7   :  { %4919 = vmax.xlane.f32.xlu0 %v4918_v49 }
0x272c   :  { %v4917_v12 = vpop.xlane.xlu0 %4916 }
0x272d   :  { %v4921_v42 = vsub.f32 %v4907_v21, %v4917_v12 }
0x272f   :  { %v4923_v41 = vmul.f32 1.442695, %v4921_v42 }
0x2730   :  { %v4920_v1 = vpop.xlane.xlu0 %4919 }
0x2731   :  { %6591 = vpow2.f32 %v4923_v41  ;;  %v4922_v27 = vsub.f32 %v4912_v23, %v4920_v1 }
0x2733   :  { %v4925_v61 = vmul.f32 1.442695, %v4922_v27 }
0x2735   :  { %6593 = vpow2.f32 %v4925_v61 }
0x273e   :  { %v6592_v52 = vpop.eup %6591 }
0x273f   :  { %v4927_v62 = vsel %vm281_vm1, %v6592_v52, 0.0 }
0x2740   :  { %4928 = vadd.xlane.f32.xlu0 %v4927_v62 }
0x2742   :  { %v6594_v43 = vpop.eup %6593 }
0x2743   :  { %v4930_v48 = vsel %vm281_vm1, %v6594_v43, 0.0 }
0x2744   :  { %4931 = vadd.xlane.f32.xlu0 %v4930_v48 }
0x275a   :  { %5038 = vrot.lane.b32.xlu0 %v7582_v14, %s6776_s4 }
0x275e   :  { %5034 = vrot.lane.b32.xlu0 %v7592_v47, %s6776_s4 }
0x27c9   :  { %v4929_v13 = vpop.xlane.xlu0 %4928 }
0x27ca   :  { %6595 = vrcp.f32 %v4929_v13 }
0x27cd   :  { %v4932_v16 = vpop.xlane.xlu0 %4931 }
0x27ce   :  { %6597 = vrcp.f32 %v4932_v16 }
0x27d1   :  { %v5039_v54 = vpop.permute.xlu0 %5038 }
0x27d2   :  { %6401 = vmatprep.subr.mxu0 %v5039_v54 }
0x27d5   :  { %v5035_v59 = vpop.permute.xlu0 %5034 }
0x27d7   :  { %v6596_v29 = vpop.eup %6595 }
0x27d8   :  { %v4935_v46 = vmul.f32 %v6596_v29, %v6592_v52  ;;  %v7899_v52 = vld [vmem:[#allocation14 + $0xd8] sm:$0xf] }
0x27d9   :  { %v5156_v48 = vrot.slane %v7899_v52, %v6877_v32 }
0x27da   :  { %6398 = vmatprep.mubr.msk.f32.mxu0 %vm281_vm1, %v4935_v46 }
0x27db   :  { %v6598_v30 = vpop.eup %6597 }
0x27dc   :  { %v4936_v20 = vmul.f32 %v6598_v30, %v6594_v43  ;;  %v5162_v30 = vrot.slane %v7899_v52, %v7068_v63 }
0x27de   :  { %6399 = vmatmul.mubr.msk.f32.vlgmr.msra.gmra.mxu0 %vm281_vm1, %v4936_v20 }
0x27df   :  { %6402 = vmatpush3.msra.mxu0 %v5039_v54 }
0x27e0   :  { %6403 = vmatprep.subr.mxu0 %v5037_v34 }
0x27e1   :  { %6404 = vmatpush3.msra.mxu0 %v5037_v34 }
0x27e2   :  { %6405 = vmatprep.subr.mxu0 %v5035_v59 }
0x27e3   :  { %6406 = vmatpush3.msra.mxu0 %v5035_v59 }
0x27e4   :  { %6407 = vmatprep.subr.mxu0 %v5033_v53 }
0x27e5   :  { %6408 = vmatpush3.msra.mxu0 %v5033_v53 }
0x289e   :  { %v6400_v2 = vpop.f32.mrf.mxu0 }
0x289f   :  { %v5023_v5 = vadd.f32 %v6400_v2, %v4831_v57  ;;  %v5168_v2 = vrot.slane %v7869_v31, %v6949_v0 }
0x28a0   :  { %v5013_v17 = vpop.f32.mrf.mxu0 }
0x28a1   :  { %v5022_v60 = vadd.f32 %v5013_v17, %v4830_v3 }
0x28a3   :  { %6409 = vmatprep.mubr.msk.f32.mxu0 %vm281_vm1, %v5022_v60 }
0x28a4   :  { %6410 = vmatmul.mubr.msk.f32.vlgmr.msra.gmra.mxu0 %vm281_vm1, %v5023_v5 }
0x2964   :  { %v6411_v11 = vpop.f32.mrf.mxu0 }
0x2965   :  { %v5122_v51 = vadd.f32 %v6411_v11, %v5027_v56 }
0x2966   :  { %v5116_v25 = vpop.f32.mrf.mxu0 }
0x2967   :  { %v5126_v58 = vadd.f32 %v5122_v51, %v7663_v6  ;;  %v5117_v45 = vadd.f32 %v5116_v25, %v5027_v56  ;;  %v6634_v6 = vld [vmem:[#allocation14 + $0x70] sm:$0xff]  ;;  %v5267_v51 = vrot.slane %v7869_v31, %v6977_v44 }
0x2969   :  { %v5125_v55 = vadd.f32 %v5117_v45, %v7659_v4  ;;  %v5130_v9 = vsel %vm281_vm1, %v5126_v58, 0.0  ;;  %v6633_v4 = vld [vmem:[#allocation14 + $0x80] sm:$0xff] }
0x296a   :  { %5131 = vadd.xlane.f32.xlu1 %v5130_v9 }
0x296b   :  { %v5127_v8 = vsel %vm281_vm1, %v5125_v55, 0.0 }
0x296c   :  { %5128 = vadd.xlane.f32.xlu0 %v5127_v8 }
0x297b   :  { %5175 = vrot.lane.b32.xlu1 %v7582_v14, %s6775_s2 }
0x297f   :  { %5171 = vrot.lane.b32.xlu1 %v7592_v47, %s6775_s2 }
0x2983   :  { %5169 = vrot.lane.b32.xlu1 %v7596_v39, %s6775_s2 }
0x2987   :  { %5280 = vrot.lane.b32.xlu1 %v7614_v40, %s6768_s23 }
0x298b   :  { %5276 = vrot.lane.b32.xlu1 %v7621_v28, %s6768_s23 }
0x298f   :  { %5272 = vrot.lane.b32.xlu1 %v6633_v4, %s6768_s23 }
0x2993   :  { %5268 = vrot.lane.b32.xlu1 %v6634_v6, %s6768_s23 }
0x29f3   :  { %v5132_v26 = vpop.xlane.xlu1 %5131 }
0x29f4   :  { %v5134_v14 = vmul.f32 0.03125, %v5132_v26 }
0x29f5   :  { %v5129_v22 = vpop.xlane.xlu0 %5128 }
0x29f6   :  { %v5136_v33 = vsub.f32 %v5126_v58, %v5134_v14  ;;  %v5133_v47 = vmul.f32 0.03125, %v5129_v22 }
0x29f7   :  { %v5176_v28 = vpop.permute.xlu1 %5175 }
0x29f8   :  { %v5135_v10 = vsub.f32 %v5125_v55, %v5133_v47  ;;  %v5138_v57 = vmul.f32 %v5136_v33, %v5136_v33  ;;  %6412 = vmatprep.subr.mxu1 %v5176_v28 }
0x29f9   :  { %6413 = vmatpush3.msra.mxu1 %v5176_v28 }
0x29fa   :  { %v5142_v39 = vsel %vm281_vm1, %v5138_v57, 0.0  ;;  %v5137_v37 = vmul.f32 %v5135_v10, %v5135_v10 }
0x29fb   :  { %5143 = vadd.xlane.f32.xlu0 %v5142_v39  ;;  %v5172_v21 = vpop.permute.xlu1 %5171 }
0x29fc   :  { %v5139_v40 = vsel %vm281_vm1, %v5137_v37, 0.0 }
0x29ff   :  { %5140 = vadd.xlane.f32.xlu0 %v5139_v40  ;;  %v5170_v42 = vpop.permute.xlu1 %5169 }
0x2a15   :  { %5173 = vrot.lane.b32.xlu0 %v7588_v38, %s6775_s2 }
0x2a19   :  { %5282 = vrot.lane.b32.xlu0 %v7610_v18, %s6768_s23  ;;  %v5281_v18 = vpop.permute.xlu1 %5280 }
0x2a1d   :  { %5278 = vrot.lane.b32.xlu0 %v7617_v19, %s6768_s23  ;;  %v5277_v27 = vpop.permute.xlu1 %5276 }
0x2a21   :  { %5274 = vrot.lane.b32.xlu0 %v6635_v15, %s6768_s23  ;;  %v5273_v16 = vpop.permute.xlu1 %5272 }
0x2a25   :  { %5270 = vrot.lane.b32.xlu0 %v6636_v50, %s6768_s23  ;;  %v5269_v24 = vpop.permute.xlu1 %5268 }
0x2a84   :  { %v5144_v23 = vpop.xlane.xlu0 %5143 }
0x2a85   :  { %v5146_v7 = vmul.f32 0.03125, %v5144_v23 }
0x2a87   :  { %v5148_v49 = vadd.f32 1e-05, %v5146_v7 }
0x2a88   :  { %v5141_v12 = vpop.xlane.xlu0 %5140 }
0x2a89   :  { %6599 = vrsqrt.f32 %v5148_v49  ;;  %v5145_v38 = vmul.f32 0.03125, %v5141_v12  ;;  %v5410_v49 = vrot.slane %v7899_v52, %v6887_v36 }
0x2a8b   :  { %v5147_v41 = vadd.f32 1e-05, %v5145_v38 }
0x2a8c   :  { %v5174_v1 = vpop.permute.xlu0 %5173 }
0x2a8d   :  { %6601 = vrsqrt.f32 %v5147_v41  ;;  %6414 = vmatprep.subr.mxu1 %v5174_v1 }
0x2a8e   :  { %6415 = vmatpush3.msra.mxu1 %v5174_v1 }
0x2a8f   :  { %6416 = vmatprep.subr.mxu1 %v5172_v21 }
0x2a90   :  { %6417 = vmatpush3.msra.mxu1 %v5172_v21  ;;  %v5283_v19 = vpop.permute.xlu0 %5282  ;;  %v5404_v21 = vrot.slane %v7899_v52, %v6884_v35 }
0x2a91   :  { %6418 = vmatprep.subr.mxu1 %v5170_v42  ;;  %6423 = vmatprep.subr.mxu0 %v5283_v19 }
0x2a92   :  { %6419 = vmatpush3.msra.mxu1 %v5170_v42  ;;  %6424 = vmatpush3.msra.mxu0 %v5283_v19 }
0x2a93   :  { %6425 = vmatprep.subr.mxu0 %v5281_v18 }
0x2a94   :  { %6426 = vmatpush3.msra.mxu0 %v5281_v18  ;;  %v5279_v61 = vpop.permute.xlu0 %5278 }
0x2a95   :  { %6427 = vmatprep.subr.mxu0 %v5279_v61 }
0x2a96   :  { %v6600_v62 = vpop.eup %6599  ;;  %6428 = vmatpush3.msra.mxu0 %v5279_v61 }
0x2a97   :  { %6429 = vmatprep.subr.mxu0 %v5277_v27  ;;  %v5152_v43 = vmul.f32 %v6600_v62, %v5136_v33 }
0x2a98   :  { %6430 = vmatpush3.msra.mxu0 %v5277_v27  ;;  %v5275_v13 = vpop.permute.xlu0 %5274 }
0x2a99   :  { %6431 = vmatprep.subr.mxu0 %v5275_v13  ;;  %v5158_v46 = vmul.f32 %v5156_v48, %v5152_v43 }
0x2a9a   :  { %v6602_v54 = vpop.eup %6601  ;;  %6432 = vmatpush3.msra.mxu0 %v5275_v13 }
0x2a9b   :  { %v5151_v29 = vmul.f32 %v6602_v54, %v5135_v10  ;;  %6433 = vmatprep.subr.mxu0 %v5273_v16  ;;  %v5164_v59 = vadd.f32 %v5162_v30, %v5158_v46 }
0x2a9c   :  { %6434 = vmatpush3.msra.mxu0 %v5273_v16  ;;  %v5271_v53 = vpop.permute.xlu0 %5270 }
0x2a9d   :  { %v5157_v20 = vmul.f32 %v5156_v48, %v5151_v29  ;;  %6435 = vmatprep.subr.mxu0 %v5271_v53 }
0x2a9e   :  { %6436 = vmatpush3.msra.mxu0 %v5271_v53  ;;  %v6637_v53 = vld [vmem:[#allocation14 + $0xe0] sm:$0xff] }
0x2a9f   :  { %v5163_v34 = vadd.f32 %v5162_v30, %v5157_v20  ;;  %6437 = vmatprep.subr.mxu0 %v5269_v24 }
0x2aa0   :  { %6438 = vmatpush3.msra.mxu0 %v5269_v24  ;;  %v5442_v24 = vrot.slane %v6637_v53, %v6877_v32 }
0x2aa1   :  { %6420 = vmatprep.mubr.msk.f32.mxu1 %vm281_vm1, %v5163_v34 }
0x2aa2   :  { %6421 = vmatmul.mubr.msk.f32.vlgmr.msra.gmra.mxu1 %vm281_vm1, %v5164_v59 }
0x2b62   :  { %v6422_v3 = vpop.f32.mrf.mxu1 }
0x2b63   :  { %v5259_v17 = vadd.f32 %v6422_v3, %v5168_v2  ;;  %v5448_v3 = vrot.slane %v6637_v53, %v7068_v63 }
0x2b64   :  { %v5253_v60 = vpop.f32.mrf.mxu1 }
0x2b65   :  { %v5254_v5 = vadd.f32 %v5253_v60, %v5168_v2  ;;  %v5263_v11 = vmax.f32 %v5259_v17, 0.0 }
0x2b67   :  { %v5262_v56 = vmax.f32 %v5254_v5, 0.0 }
0x2b69   :  { %6439 = vmatprep.mubr.msk.f32.mxu0 %vm2741_vm3, %v5262_v56 }
0x2b6a   :  { %6440 = vmatmul.mubr.msk.f32.vlgmr.msra.gmra.mxu0 %vm2741_vm3, %v5263_v11 }
0x2c2a   :  { %v6441_v25 = vpop.f32.mrf.mxu0 }
0x2c2b   :  { %v5370_v58 = vadd.f32 %v6441_v25, %v5267_v51 }
0x2c2c   :  { %v5364_v45 = vpop.f32.mrf.mxu0 }
0x2c2d   :  { %v5374_v55 = vadd.f32 %v5370_v58, %v5164_v59  ;;  %v5365_v9 = vadd.f32 %v5364_v45, %v5267_v51 }
0x2c2f   :  { %v5373_v8 = vadd.f32 %v5365_v9, %v5163_v34  ;;  %v5378_v0 = vsel %vm281_vm1, %v5374_v55, 0.0 }
0x2c30   :  { %5379 = vadd.xlane.f32.xlu1 %v5378_v0 }
0x2c31   :  { %v5375_v4 = vsel %vm281_vm1, %v5373_v8, 0.0 }
0x2c32   :  { %5376 = vadd.xlane.f32.xlu0 %v5375_v4 }
0x2cb9   :  { %v5380_v6 = vpop.xlane.xlu1 %5379 }
0x2cba   :  { %v5382_v26 = vmul.f32 0.03125, %v5380_v6 }
0x2cbb   :  { %v5377_v14 = vpop.xlane.xlu0 %5376 }
0x2cbc   :  { %v5381_v22 = vmul.f32 0.03125, %v5377_v14  ;;  %v5384_v33 = vsub.f32 %v5374_v55, %v5382_v26 }
0x2cbe   :  { %v5383_v47 = vsub.f32 %v5373_v8, %v5381_v22  ;;  %v5386_v31 = vmul.f32 %v5384_v33, %v5384_v33 }
0x2cc0   :  { %v5385_v10 = vmul.f32 %v5383_v47, %v5383_v47  ;;  %v5390_v57 = vsel %vm281_vm1, %v5386_v31, 0.0 }
0x2cc2   :  { %v5387_v44 = vsel %vm281_vm1, %v5385_v10, 0.0 }
0x2cc3   :  { %5388 = vadd.xlane.f32.xlu0 %v5387_v44 }
0x2cc7   :  { %5391 = vadd.xlane.f32.xlu0 %v5390_v57 }
0x2d4c   :  { %v5389_v39 = vpop.xlane.xlu0 %5388 }
0x2d4d   :  { %v5393_v37 = vmul.f32 0.03125, %v5389_v39 }
0x2d4f   :  { %v5395_v40 = vadd.f32 1e-05, %v5393_v37 }
0x2d50   :  { %v5392_v28 = vpop.xlane.xlu0 %5391 }
0x2d51   :  { %6603 = vrsqrt.f32 %v5395_v40  ;;  %v5394_v15 = vmul.f32 0.03125, %v5392_v28 }
0x2d53   :  { %v5396_v50 = vadd.f32 1e-05, %v5394_v15 }
0x2d55   :  { %6605 = vrsqrt.f32 %v5396_v50 }
0x2d5e   :  { %v6604_v23 = vpop.eup %6603 }
0x2d5f   :  { %v5399_v7 = vmul.f32 %v6604_v23, %v5383_v47 }
0x2d61   :  { %v5405_v12 = vmul.f32 %v5404_v21, %v5399_v7 }
0x2d62   :  { %v6606_v42 = vpop.eup %6605 }
0x2d63   :  { %v5411_v38 = vadd.f32 %v5410_v49, %v5405_v12  ;;  %v5400_v41 = vmul.f32 %v6606_v42, %v5384_v33 }
0x2d65   :  { %v5413_v1 = vsel %vm281_vm1, %v5411_v38, 0.0  ;;  %v5406_v18 = vmul.f32 %v5404_v21, %v5400_v41 }
0x2d66   :  { %5414 = vadd.xlane.f32.xlu1 %v5413_v1 }
0x2d67   :  { %v5412_v19 = vadd.f32 %v5410_v49, %v5406_v18 }
0x2d69   :  { %v5416_v27 = vsel %vm281_vm1, %v5412_v19, 0.0 }
0x2d6a   :  { %5417 = vadd.xlane.f32.xlu0 %v5416_v27 }
0x2def   :  { %v5415_v61 = vpop.xlane.xlu1 %5414 }
0x2df0   :  { %v5419_v62 = vmul.f32 0.03125, %v5415_v61 }
0x2df2   :  { %v5421_v35 = vsub.f32 %v5411_v38, %v5419_v62 }
0x2df3   :  { %v5418_v43 = vpop.xlane.xlu0 %5417 }
0x2df4   :  { %v5420_v48 = vmul.f32 0.03125, %v5418_v43  ;;  %v5423_v13 = vmul.f32 %v5421_v35, %v5421_v35 }
0x2df6   :  { %v5422_v16 = vsub.f32 %v5412_v19, %v5420_v48  ;;  %v5425_v36 = vsel %vm281_vm1, %v5423_v13, 0.0 }
0x2df7   :  { %5426 = vadd.xlane.f32.xlu1 %v5425_v36 }
0x2df8   :  { %v5424_v52 = vmul.f32 %v5422_v16, %v5422_v16 }
0x2dfa   :  { %v5428_v54 = vsel %vm281_vm1, %v5424_v52, 0.0 }
0x2dfb   :  { %5429 = vadd.xlane.f32.xlu0 %v5428_v54 }
0x2e80   :  { %v5427_v29 = vpop.xlane.xlu1 %5426 }
0x2e81   :  { %v5431_v46 = vmul.f32 0.03125, %v5427_v29 }
0x2e83   :  { %v5433_v30 = vadd.f32 1e-05, %v5431_v46 }
0x2e84   :  { %v5430_v20 = vpop.xlane.xlu0 %5429 }
0x2e85   :  { %6607 = vrsqrt.f32 %v5433_v30  ;;  %v5432_v34 = vmul.f32 0.03125, %v5430_v20 }
0x2e87   :  { %v5434_v59 = vadd.f32 1e-05, %v5432_v34 }
0x2e89   :  { %6609 = vrsqrt.f32 %v5434_v59 }
0x2e92   :  { %v6608_v2 = vpop.eup %6607 }
0x2e93   :  { %v5437_v17 = vmul.f32 %v6608_v2, %v5421_v35 }
0x2e95   :  { %v5443_v60 = vmul.f32 %v5442_v24, %v5437_v17 }
0x2e96   :  { %v6610_v5 = vpop.eup %6609 }
0x2e97   :  { %v5449_v56 = vadd.f32 %v5448_v3, %v5443_v60  ;;  %v5438_v11 = vmul.f32 %v6610_v5, %v5422_v16 }
0x2e99   :  { %5451 = vst.msk [vmem:[#allocation15] sm:$0x3] %vm90_vm0, %v5449_v56  ;;  %v5444_v51 = vmul.f32 %v5442_v24, %v5438_v11 }
0x2e9a   :  { %5454 = vst.msk [vmem:[#allocation15] sm:$0xc] %vm5453_vm4, %v5449_v56 }
0x2e9b   :  { %5457 = vst.msk [vmem:[#allocation15] sm:$0x30] %vm5456_vm5, %v5449_v56  ;;  %v5450_v32 = vadd.f32 %v5448_v3, %v5444_v51 }
0x2e9c   :  { %5460 = vst.msk [vmem:[#allocation15] sm:$0xc0] %vm5459_vm6, %v5449_v56 }
0x2e9d   :  { %5462 = vst.msk [vmem:[#allocation15 + $0x8] sm:$0x3] %vm90_vm0, %v5450_v32 }
0x2e9e   :  { %5464 = vst.msk [vmem:[#allocation15 + $0x8] sm:$0xc] %vm5453_vm4, %v5450_v32 }
0x2e9f   :  { %5466 = vst.msk [vmem:[#allocation15 + $0x8] sm:$0x30] %vm5456_vm5, %v5450_v32 }
0x2ea0   :  { %5468 = vst.msk [vmem:[#allocation15 + $0x8] sm:$0xc0] %vm5459_vm6, %v5450_v32 }
0x2ea1   :  { %6749 = shalt.err (!%p6746_p1)
}
0x2ea2   :  { %5480 = dma.vmem_to_hbm [thread:$0]  %s5475_s21, 256, %s7940_s5, [#allocation8], %s6768_s23, %s6768_s23, %s6769_s24  }
0x2ea3   :  { %6764 = dma.done.wait [#allocation8], 256  }
0x2ea4   :  { %6765 = vsyncadd [#allocation8], 4294967040 }
0x2ea5   :  { %5484 = vsyncpa [#allocation7], 1 }
0x2ea6   :  { %5485 = vsyncpa [#allocation10], 1 }
0x2ea7   :  { %5486 = vsyncpa [#allocation13], 1 }
0x2ea8   :  { %5487 = vsyncpa [#allocation8], 1 }

</bundles_post_ra>
